<compile_context>
chip_gen: v7x
topology: tpu7x:2x2x1
jax: 0.10.0
libtpu: 0.0.40
codegen_flags: <defaults>
</compile_context>

<pallas_src>
import functools

import jax
import jax.numpy as jnp
import numpy as np
from jax.experimental import pallas as pl
from jax.experimental.pallas import tpu as pltpu

EPS = 1e-5


# ---------------------------------------------------------------------------
# Kernels
# ---------------------------------------------------------------------------
def _accum_stats(t, h, sum_out, sq_out, sum_sc, sq_sc):
    """Accumulate per-batch column sum / sum-of-squares of h across row tiles."""
    @pl.when(t == 0)
    def _():
        sum_sc[...] = jnp.zeros_like(sum_sc)
        sq_sc[...] = jnp.zeros_like(sq_sc)

    sum_sc[...] += jnp.sum(h, axis=0, keepdims=True)
    sq_sc[...] += jnp.sum(h * h, axis=0, keepdims=True)

    @pl.when(t == pl.num_programs(1) - 1)
    def _():
        sum_out[...] = sum_sc[...].reshape(sum_out.shape)
        sq_out[...] = sq_sc[...].reshape(sq_out.shape)


def _conv_in_kernel(x_ref, w_ref, h_ref, sum_ref, sq_ref, sum_sc, sq_sc):
    """conv1 on one row tile (bias dropped: cancelled by bn1's mean subtraction)."""
    t = pl.program_id(1)
    h = jnp.dot(x_ref[...], w_ref[...], preferred_element_type=jnp.float32)
    h_ref[...] = h.astype(h_ref.dtype)
    _accum_stats(t, h, sum_ref, sq_ref, sum_sc, sq_sc)


def _conv_mid_kernel(h_in_ref, scale_ref, shift_ref, w_ref,
                     h_ref, sum_ref, sq_ref, sum_sc, sq_sc):
    """bn(prev, folded scale/shift) + relu + 1x1 conv on one row tile + stats."""
    t = pl.program_id(1)
    a = h_in_ref[...].astype(jnp.float32)
    a = jnp.maximum(a * scale_ref[...] + shift_ref[...], 0.0)
    h = jnp.dot(a.astype(w_ref.dtype), w_ref[...],
                preferred_element_type=jnp.float32)
    h_ref[...] = h.astype(h_ref.dtype)
    _accum_stats(t, h, sum_ref, sq_ref, sum_sc, sq_sc)


def _conv_out_kernel(h_in_ref, scale_ref, shift_ref, w_ref,
                     sum_ref, sq_ref, max_ref, min_ref,
                     sum_sc, sq_sc, max_sc, min_sc):
    """bn2 + relu + conv3; emits stats + per-batch running max/min of the raw
    conv3 output -- the (rows, 1024) activation itself never leaves VMEM."""
    t = pl.program_id(1)
    a = h_in_ref[...].astype(jnp.float32)
    a = jnp.maximum(a * scale_ref[...] + shift_ref[...], 0.0)
    h = jnp.dot(a.astype(w_ref.dtype), w_ref[...],
                preferred_element_type=jnp.float32)

    @pl.when(t == 0)
    def _():
        sum_sc[...] = jnp.zeros_like(sum_sc)
        sq_sc[...] = jnp.zeros_like(sq_sc)
        max_sc[...] = jnp.full_like(max_sc, -jnp.inf)
        min_sc[...] = jnp.full_like(min_sc, jnp.inf)

    sum_sc[...] += jnp.sum(h, axis=0, keepdims=True)
    sq_sc[...] += jnp.sum(h * h, axis=0, keepdims=True)
    max_sc[...] = jnp.maximum(max_sc[...], jnp.max(h, axis=0, keepdims=True))
    min_sc[...] = jnp.minimum(min_sc[...], jnp.min(h, axis=0, keepdims=True))

    @pl.when(t == pl.num_programs(1) - 1)
    def _():
        sum_ref[...] = sum_sc[...].reshape(sum_ref.shape)
        sq_ref[...] = sq_sc[...].reshape(sq_ref.shape)
        max_ref[...] = max_sc[...].reshape(max_ref.shape)
        min_ref[...] = min_sc[...].reshape(min_ref.shape)


def _fc_head_kernel(max_ref, min_ref, scale3_ref, shift3_ref,
                    w4_ref, g4_ref, be4_ref,
                    w5_ref, g5_ref, be5_ref,
                    w6_ref, b6_ref, out_ref):
    """Maxpool finalization + fc1/bn4/relu + fc2/bn5/relu + fc3 (only B rows)."""
    s3 = scale3_ref[...]
    # bn3(x) = s3*x + shift3 is monotone per channel and relu is monotone, so
    # max_n relu(bn3(h3)) = relu(s3 * (max h3 if s3>=0 else min h3) + shift3).
    pooled = jnp.where(s3 >= 0.0, max_ref[...] * s3, min_ref[...] * s3) + shift3_ref[...]
    pooled = jnp.maximum(pooled, 0.0)

    def bn_relu_rows(h, gamma, beta):
        # nn.BatchNorm1d on a 2-D (B, C) input: batch stats over rows, biased var.
        mean = jnp.mean(h, axis=0, keepdims=True)
        var = jnp.mean((h - mean) ** 2, axis=0, keepdims=True)
        scale = gamma * jax.lax.rsqrt(var + EPS)
        return jnp.maximum(h * scale + (beta - mean * scale), 0.0)

    f = jnp.dot(pooled.astype(w4_ref.dtype), w4_ref[...],
                preferred_element_type=jnp.float32)
    f = bn_relu_rows(f, g4_ref[...], be4_ref[...])        # fc1 bias cancelled by bn4
    f = jnp.dot(f.astype(w5_ref.dtype), w5_ref[...],
                preferred_element_type=jnp.float32)
    f = bn_relu_rows(f, g5_ref[...], be5_ref[...])        # fc2 bias cancelled by bn5
    out_ref[...] = jnp.dot(f, w6_ref[...],
                           preferred_element_type=jnp.float32) + b6_ref[...]


# ---------------------------------------------------------------------------
# Wrapper
# ---------------------------------------------------------------------------
def _fold_bn(sum_b, sq_b, n_rows, gamma, beta):
    """Fold training-mode BN (biased var, eps=1e-5) into y = x*scale + shift."""
    s = jnp.sum(sum_b, axis=0)                     # (1, C)
    q = jnp.sum(sq_b, axis=0)
    mean = s / n_rows
    # TODO(synk): switch to Welford / centered second pass if E[x^2]-E[x]^2
    # cancellation ever matters at very large B*N.
    var = jnp.maximum(q / n_rows - mean * mean, 0.0)
    scale = gamma * jax.lax.rsqrt(var + EPS)
    return scale, beta - mean * scale


def _pick_tile_rows(n_points, target=512):
    """Largest multiple-of-16 divisor of n_points that is <= target rows/tile."""
    best = 0
    cand = 16
    while cand <= n_points and cand <= target:
        if n_points % cand == 0:
            best = cand
        cand += 16
    return best


def tnet_forward(x, params, *, tile_n=None, matmul_dtype=jnp.bfloat16,
                 vmem_limit_bytes=32 * 1024 * 1024):
    """Tnet forward. x: (B, k, N) float32 in the module's NCW layout."""
    (w1, _b1, g1, be1, w2, _b2, g2, be2, w3, _b3, g3, be3,
     w4, _b4, g4, be4, w5, _b5, g5, be5, w6, b6) = params
    B, k, N = x.shape
    if tile_n is None:
        # Production sizing: ~512 rows fits v7x's 64 MiB VMEM with headroom;
        # v5e/v6e can go larger.  Demo passes a smaller tile explicitly.
        tile_n = _pick_tile_rows(N)
    if tile_n <= 0 or N % tile_n != 0 or tile_n % 16 != 0:
        # TODO(synk): pad N to a multiple of 16 to support arbitrary point counts.
        raise ValueError(f"need a multiple-of-16 row tile dividing N={N}")
    T = N // tile_n
    n_rows = B * N
    act_bytes = jnp.dtype(matmul_dtype).itemsize

    # NCW -> (points, channels).  conv1's K=k contraction is <0.2% of the FLOPs
    # and x is only k floats/point, so the simple row-major layout is kept.
    # TODO(synk): fuse as an in-kernel (k, N_tile) transposed conv1 to make the
    # input DMA lane-dense.
    x_rows = jnp.transpose(x, (0, 2, 1)).reshape(n_rows, k)

    # bf16 MXU operands (f32 accumulation); BN / elementwise math stays f32.
    w2c, w3c, w4c, w5c = (w.astype(matmul_dtype) for w in (w2, w3, w4, w5))

    def conv_stage(kernel, ins, cin, cout, *, h_out, extrema):
        row_spec = lambda c: pl.BlockSpec((tile_n, c), lambda b, t: (b * T + t, 0))
        full_spec = lambda shape: pl.BlockSpec(shape, lambda b, t: (0, 0))
        batch_spec = lambda c: pl.BlockSpec((1, 1, c), lambda b, t: (b, 0, 0))

        in_specs = [row_spec(cin)]
        if len(ins) == 4:                      # (h_in, scale, shift, w)
            in_specs += [full_spec((1, cin)), full_spec((1, cin))]
        in_specs += [full_spec((cin, cout))]

        out_specs, out_shape = [], []
        if h_out:
            out_specs.append(row_spec(cout))
            out_shape.append(jax.ShapeDtypeStruct((n_rows, cout), matmul_dtype))
        n_stats = 4 if extrema else 2          # sum, sumsq (+ max, min)
        out_specs += [batch_spec(cout)] * n_stats
        out_shape += [jax.ShapeDtypeStruct((B, 1, cout), jnp.float32)] * n_stats
        scratch = [pltpu.VMEM((1, cout), jnp.float32) for _ in range(n_stats)]

        bytes_accessed = (n_rows * cin * (4 if len(ins) == 2 else act_bytes)
                          + cin * cout * act_bytes
                          + (n_rows * cout * act_bytes if h_out else 0)
                          + n_stats * B * cout * 4)
        return pl.pallas_call(
            kernel,
            grid_spec=pltpu.PrefetchScalarGridSpec(
                num_scalar_prefetch=0,
                grid=(B, T),
                in_specs=in_specs,
                out_specs=tuple(out_specs),
                scratch_shapes=scratch),
            out_shape=tuple(out_shape),
            compiler_params=pltpu.CompilerParams(
                dimension_semantics=("parallel", "arbitrary"),
                vmem_limit_bytes=vmem_limit_bytes),
            cost_estimate=pl.CostEstimate(
                flops=2 * n_rows * cin * cout,
                transcendentals=0,
                bytes_accessed=bytes_accessed),
        )(*ins)

    # conv1 -> h1_raw + per-batch stats; the (1, C) BN folding is tiny XLA glue.
    h1, s1, q1 = conv_stage(_conv_in_kernel, (x_rows, w1), k, 64,
                            h_out=True, extrema=False)
    scale1, shift1 = _fold_bn(s1, q1, n_rows, g1, be1)

    # bn1 + relu + conv2 -> h2_raw + stats.
    h2, s2, q2 = conv_stage(_conv_mid_kernel, (h1, scale1, shift1, w2c), 64, 128,
                            h_out=True, extrema=False)
    scale2, shift2 = _fold_bn(s2, q2, n_rows, g2, be2)

    # bn2 + relu + conv3 -> stats + per-batch max/min (no (rows,1024) writeback).
    s3, q3, hmax, hmin = conv_stage(_conv_out_kernel, (h2, scale2, shift2, w3c),
                                    128, 1024, h_out=False, extrema=True)
    scale3, shift3 = _fold_bn(s3, q3, n_rows, g3, be3)

    # Maxpool finalization + fc head as one tiny un-gridded kernel (B rows).
    vmem = pl.BlockSpec(memory_space=pltpu.MemorySpace.VMEM)
    flat = pl.pallas_call(
        _fc_head_kernel,
        out_shape=jax.ShapeDtypeStruct((B, k * k), jnp.float32),
        in_specs=[vmem] * 12,
        out_specs=vmem,
    )(hmax.reshape(B, 1024), hmin.reshape(B, 1024), scale3, shift3,
      w4c, g4, be4, w5c, g5, be5, w6, b6)

    # Identity-matrix addition + reshape is glue; done outside the kernel.
    eye = jnp.eye(k, dtype=jnp.float32)
    return flat.reshape(B, k, k) + eye[None]


# ---------------------------------------------------------------------------
# Pure-JAX reference and parameter construction
# ---------------------------------------------------------------------------
def tnet_reference(x, params):
    """f32 reference mirroring the PyTorch forward (training-mode BN, biases).

    Matmuls use HIGHEST precision so the reference is true f32 (XLA's DEFAULT
    TPU matmul precision truncates f32 operands, which would confound the
    comparison against the kernel)."""
    (w1, b1, g1, be1, w2, b2, g2, be2, w3, b3, g3, be3,
     w4, b4, g4, be4, w5, b5, g5, be5, w6, b6) = params
    B, k, N = x.shape
    mm = functools.partial(jnp.dot, precision=jax.lax.Precision.HIGHEST)

    def bn_relu(h, gamma, beta):
        mean = jnp.mean(h, axis=0, keepdims=True)
        var = jnp.mean((h - mean) ** 2, axis=0, keepdims=True)
        return jnp.maximum((h - mean) * jax.lax.rsqrt(var + EPS) * gamma + beta, 0.0)

    h = jnp.transpose(x, (0, 2, 1)).reshape(B * N, k)
    h = bn_relu(mm(h, w1) + b1, g1, be1)
    h = bn_relu(mm(h, w2) + b2, g2, be2)
    h = bn_relu(mm(h, w3) + b3, g3, be3)
    pooled = h.reshape(B, N, -1).max(axis=1)
    f = bn_relu(mm(pooled, w4) + b4, g4, be4)
    f = bn_relu(mm(f, w5) + b5, g5, be5)
    out = mm(f, w6) + b6
    return out.reshape(B, k, k) + jnp.eye(k, dtype=jnp.float32)[None]


def init_params(key, k=3):
    """Deterministic synthetic parameters matching the module's shapes.

    Conv1d(cin, cout, 1) weight (cout, cin, 1) and Linear(cin, cout) weight
    (cout, cin) are both stored pre-transposed as (cin, cout) matmul matrices.
    Biases b1..b5 are generated (the reference uses them) but the kernel drops
    them: training-mode BN cancels them exactly."""
    layer_dims = [(k, 64), (64, 128), (128, 1024),        # conv1, conv2, conv3
                  (1024, 512), (512, 256), (256, k * k)]  # fc1, fc2, fc3
    keys = jax.random.split(key, 4 * len(layer_dims))
    params = []
    for i, (cin, cout) in enumerate(layer_dims):
        kw, kb, kg, kbe = keys[4 * i:4 * i + 4]
        params.append(jax.random.normal(kw, (cin, cout), jnp.float32) * 0.05)
        params.append(jax.random.normal(kb, (1, cout), jnp.float32) * 0.05)
        if i < 5:  # bn1..bn5 (fc3 has no BN)
            params.append(1.0 + 0.1 * jax.random.normal(kg, (1, cout), jnp.float32))
            params.append(0.1 * jax.random.normal(kbe, (1, cout), jnp.float32))
    return params


if __name__ == "__main__":
    B, k, N = 8, 3, 64     # small demo; channel widths (64/128/1024/...) are fixed by the module
    TILE_N = 32            # 2 row tiles per batch element -> exercises the cross-tile
                           # stats / max-min accumulation path (production: ~512+ rows)
    key = jax.random.PRNGKey(0)
    kx, kp = jax.random.split(key)
    x = jax.random.normal(kx, (B, k, N), jnp.float32)
    params = init_params(kp, k=k)

    ref = jax.block_until_ready(tnet_reference(x, params))

    # Correctness gate: the identical kernel path with f32 matmul operands must
    # match the f32 reference tightly (validates tiling, cross-tile BN stats,
    # bias cancellation, the max/min pooling trick and the FC head).
    fwd_f32 = jax.jit(functools.partial(tnet_forward, tile_n=TILE_N,
                                        matmul_dtype=jnp.float32))
    out_f32 = jax.block_until_ready(fwd_f32(x, params))
    np.testing.assert_allclose(np.asarray(out_f32), np.asarray(ref),
                               rtol=5e-3, atol=5e-3)

    # Performance configuration: bf16 MXU operands, f32 accumulation, f32 BN.
    # Training-mode BN divides by the across-batch spread of the pooled
    # features, which is several times smaller than their magnitude, so bf16's
    # ~1% matmul error is legitimately amplified to a few percent at the output;
    # sanity-check it against the f32 kernel rather than elementwise.
    fwd_bf16 = jax.jit(functools.partial(tnet_forward, tile_n=TILE_N,
                                         matmul_dtype=jnp.bfloat16))
    out = jax.block_until_ready(fwd_bf16(x, params))
    assert out.shape == (B, k, k)
    assert bool(jnp.all(jnp.isfinite(out)))
    rel = float(jnp.linalg.norm(out - out_f32) / jnp.linalg.norm(out_f32))
    assert rel < 0.3, f"bf16 path deviates too much: rel={rel:.3f}"

    print("KERNEL_OK")
</pallas_src>

<mosaic_0001>
module attributes {stable_mosaic.version = 11 : i64} {
  func.func @_conv_in_kernel(%arg0: i32, %arg1: i32, %arg2: memref<32x3xf32, #tpu.memory_space<vmem>>, %arg3: memref<3x64xf32, #tpu.memory_space<vmem>>, %arg4: memref<32x64xf32, #tpu.memory_space<vmem>>, %arg5: memref<1x1x64xf32, #tpu.memory_space<vmem>>, %arg6: memref<1x1x64xf32, #tpu.memory_space<vmem>>, %arg7: memref<1x64xf32, #tpu.memory_space<vmem>>, %arg8: memref<1x64xf32, #tpu.memory_space<vmem>>) attributes {dimension_semantics = [#tpu.dimension_semantics<parallel>, #tpu.dimension_semantics<arbitrary>], iteration_bounds = array<i64: 8, 2>, scalar_prefetch = 0 : i64, scratch_operands = 2 : i64, tpu.core_type = #tpu.core_type<tc>, window_params = [{transform_indices = @transform_0, window_bounds = array<i64: 32, 3>}, {pipeline_mode = #tpu.pipeline_mode<synchronous>, transform_indices = @transform_1, window_bounds = array<i64: 3, 64>}, {transform_indices = @transform_2, window_bounds = array<i64: 32, 64>}, {transform_indices = @transform_3, window_bounds = array<i64: 1, 1, 64>}, {transform_indices = @transform_4, window_bounds = array<i64: 1, 1, 64>}]} {
    %c0 = arith.constant 0 : index
    %c0_0 = arith.constant 0 : index
    %0 = vector.load %arg2[%c0, %c0_0] : memref<32x3xf32, #tpu.memory_space<vmem>>, vector<32x3xf32>
    %c0_1 = arith.constant 0 : index
    %c0_2 = arith.constant 0 : index
    %1 = vector.load %arg3[%c0_1, %c0_2] : memref<3x64xf32, #tpu.memory_space<vmem>>, vector<3x64xf32>
    %cst = arith.constant dense<0.000000e+00> : vector<32x64xf32>
    %2 = tpu.matmul %0, %1, %cst {dimension_numbers = #tpu.dot_dimension_numbers<[1], [0], [0], [1], [0, 0, 1, 1], [], []>} : vector<32x3xf32>, vector<3x64xf32>, vector<32x64xf32> -> vector<32x64xf32>
    %c0_3 = arith.constant 0 : index
    %c0_4 = arith.constant 0 : index
    %3 = vector.load %arg4[%c0_3, %c0_4] : memref<32x64xf32, #tpu.memory_space<vmem>>, vector<32x64xf32>
    tpu.vector_store %arg4[%c0_3, %c0_4], %2 {strides = array<i32>} : memref<32x64xf32, #tpu.memory_space<vmem>>, vector<32x64xf32>,
    %c0_i32 = arith.constant 0 : i32
    %4 = arith.cmpi eq, %arg1, %c0_i32 : i32
    %5 = arith.extui %4 : i1 to i32
    %c0_i32_5 = arith.constant 0 : i32
    %6 = arith.cmpi ne, %5, %c0_i32_5 : i32
    scf.if %6 {
      %cst_17 = arith.constant 0.000000e+00 : f32
      %21 = vector.broadcast %cst_17 : f32 to vector<1x64xf32>
      %c0_18 = arith.constant 0 : index
      %c0_19 = arith.constant 0 : index
      %22 = vector.load %arg7[%c0_18, %c0_19] : memref<1x64xf32, #tpu.memory_space<vmem>>, vector<1x64xf32>
      tpu.vector_store %arg7[%c0_18, %c0_19], %21 {strides = array<i32>} : memref<1x64xf32, #tpu.memory_space<vmem>>, vector<1x64xf32>,
      %cst_20 = arith.constant 0.000000e+00 : f32
      %23 = vector.broadcast %cst_20 : f32 to vector<1x64xf32>
      %c0_21 = arith.constant 0 : index
      %c0_22 = arith.constant 0 : index
      %24 = vector.load %arg8[%c0_21, %c0_22] : memref<1x64xf32, #tpu.memory_space<vmem>>, vector<1x64xf32>
      tpu.vector_store %arg8[%c0_21, %c0_22], %23 {strides = array<i32>} : memref<1x64xf32, #tpu.memory_space<vmem>>, vector<1x64xf32>,
    } else {
    }
    %c0_6 = arith.constant 0 : index
    %c0_7 = arith.constant 0 : index
    %7 = vector.load %arg7[%c0_6, %c0_7] : memref<1x64xf32, #tpu.memory_space<vmem>>, vector<1x64xf32>
    %cst_8 = arith.constant dense<0.000000e+00> : vector<64xf32>
    %8 = vector.multi_reduction <add>, %2, %cst_8 [0] : vector<32x64xf32> to vector<64xf32>
    %9 = vector.shape_cast %8 : vector<64xf32> to vector<1x64xf32>
    %10 = arith.addf %7, %9 : vector<1x64xf32>
    %c0_9 = arith.constant 0 : index
    %c0_10 = arith.constant 0 : index
    %11 = vector.load %arg7[%c0_9, %c0_10] : memref<1x64xf32, #tpu.memory_space<vmem>>, vector<1x64xf32>
    tpu.vector_store %arg7[%c0_9, %c0_10], %10 {strides = array<i32>} : memref<1x64xf32, #tpu.memory_space<vmem>>, vector<1x64xf32>,
    %c0_11 = arith.constant 0 : index
    %c0_12 = arith.constant 0 : index
    %12 = vector.load %arg8[%c0_11, %c0_12] : memref<1x64xf32, #tpu.memory_space<vmem>>, vector<1x64xf32>
    %13 = arith.mulf %2, %2 : vector<32x64xf32>
    %cst_13 = arith.constant dense<0.000000e+00> : vector<64xf32>
    %14 = vector.multi_reduction <add>, %13, %cst_13 [0] : vector<32x64xf32> to vector<64xf32>
    %15 = vector.shape_cast %14 : vector<64xf32> to vector<1x64xf32>
    %16 = arith.addf %12, %15 : vector<1x64xf32>
    %c0_14 = arith.constant 0 : index
    %c0_15 = arith.constant 0 : index
    %17 = vector.load %arg8[%c0_14, %c0_15] : memref<1x64xf32, #tpu.memory_space<vmem>>, vector<1x64xf32>
    tpu.vector_store %arg8[%c0_14, %c0_15], %16 {strides = array<i32>} : memref<1x64xf32, #tpu.memory_space<vmem>>, vector<1x64xf32>,
    %c1_i32 = arith.constant 1 : i32
    %18 = arith.cmpi eq, %arg1, %c1_i32 : i32
    %19 = arith.extui %18 : i1 to i32
    %c0_i32_16 = arith.constant 0 : i32
    %20 = arith.cmpi ne, %19, %c0_i32_16 : i32
    scf.if %20 {
      %c0_17 = arith.constant 0 : index
      %c0_18 = arith.constant 0 : index
      %21 = vector.load %arg7[%c0_17, %c0_18] : memref<1x64xf32, #tpu.memory_space<vmem>>, vector<1x64xf32>
      %22 = vector.shape_cast %21 : vector<1x64xf32> to vector<1x1x64xf32>
      %c0_19 = arith.constant 0 : index
      %c0_20 = arith.constant 0 : index
      %c0_21 = arith.constant 0 : index
      %23 = vector.load %arg5[%c0_19, %c0_20, %c0_21] : memref<1x1x64xf32, #tpu.memory_space<vmem>>, vector<1x1x64xf32>
      tpu.vector_store %arg5[%c0_19, %c0_20, %c0_21], %22 {strides = array<i32>} : memref<1x1x64xf32, #tpu.memory_space<vmem>>, vector<1x1x64xf32>,
      %c0_22 = arith.constant 0 : index
      %c0_23 = arith.constant 0 : index
      %24 = vector.load %arg8[%c0_22, %c0_23] : memref<1x64xf32, #tpu.memory_space<vmem>>, vector<1x64xf32>
      %25 = vector.shape_cast %24 : vector<1x64xf32> to vector<1x1x64xf32>
      %c0_24 = arith.constant 0 : index
      %c0_25 = arith.constant 0 : index
      %c0_26 = arith.constant 0 : index
      %26 = vector.load %arg6[%c0_24, %c0_25, %c0_26] : memref<1x1x64xf32, #tpu.memory_space<vmem>>, vector<1x1x64xf32>
      tpu.vector_store %arg6[%c0_24, %c0_25, %c0_26], %25 {strides = array<i32>} : memref<1x1x64xf32, #tpu.memory_space<vmem>>, vector<1x1x64xf32>,
    } else {
    }
    return
  }
  func.func @transform_0(%arg0: i32, %arg1: i32) -> (i32, i32) {
    %c2_i32 = arith.constant 2 : i32
    %0 = arith.muli %arg0, %c2_i32 : i32
    %1 = arith.addi %0, %arg1 : i32
    %c0_i32 = arith.constant 0 : i32
    %c0_i32_0 = arith.constant 0 : i32
    return %1, %c0_i32 : i32, i32
  }
  func.func @transform_1(%arg0: i32, %arg1: i32) -> (i32, i32) {
    %c0_i32 = arith.constant 0 : i32
    %c0_i32_0 = arith.constant 0 : i32
    %c0_i32_1 = arith.constant 0 : i32
    return %c0_i32, %c0_i32_0 : i32, i32
  }
  func.func @transform_2(%arg0: i32, %arg1: i32) -> (i32, i32) {
    %c2_i32 = arith.constant 2 : i32
    %0 = arith.muli %arg0, %c2_i32 : i32
    %1 = arith.addi %0, %arg1 : i32
    %c0_i32 = arith.constant 0 : i32
    %c0_i32_0 = arith.constant 0 : i32
    return %1, %c0_i32 : i32, i32
  }
  func.func @transform_3(%arg0: i32, %arg1: i32) -> (i32, i32, i32) {
    %c0_i32 = arith.constant 0 : i32
    %c0_i32_0 = arith.constant 0 : i32
    %c0_i32_1 = arith.constant 0 : i32
    return %arg0, %c0_i32, %c0_i32_0 : i32, i32, i32
  }
  func.func @transform_4(%arg0: i32, %arg1: i32) -> (i32, i32, i32) {
    %c0_i32 = arith.constant 0 : i32
    %c0_i32_0 = arith.constant 0 : i32
    %c0_i32_1 = arith.constant 0 : i32
    return %arg0, %c0_i32, %c0_i32_0 : i32, i32, i32
  }
}

module attributes {stable_mosaic.version = 11 : i64} {
  func.func @_conv_mid_kernel(%arg0: i32, %arg1: i32, %arg2: memref<32x64xf32, #tpu.memory_space<vmem>>, %arg3: memref<1x64xf32, #tpu.memory_space<vmem>>, %arg4: memref<1x64xf32, #tpu.memory_space<vmem>>, %arg5: memref<64x128xf32, #tpu.memory_space<vmem>>, %arg6: memref<32x128xf32, #tpu.memory_space<vmem>>, %arg7: memref<1x1x128xf32, #tpu.memory_space<vmem>>, %arg8: memref<1x1x128xf32, #tpu.memory_space<vmem>>, %arg9: memref<1x128xf32, #tpu.memory_space<vmem>>, %arg10: memref<1x128xf32, #tpu.memory_space<vmem>>) attributes {dimension_semantics = [#tpu.dimension_semantics<parallel>, #tpu.dimension_semantics<arbitrary>], iteration_bounds = array<i64: 8, 2>, scalar_prefetch = 0 : i64, scratch_operands = 2 : i64, tpu.core_type = #tpu.core_type<tc>, window_params = [{transform_indices = @transform_0, window_bounds = array<i64: 32, 64>}, {pipeline_mode = #tpu.pipeline_mode<synchronous>, transform_indices = @transform_1, window_bounds = array<i64: 1, 64>}, {pipeline_mode = #tpu.pipeline_mode<synchronous>, transform_indices = @transform_2, window_bounds = array<i64: 1, 64>}, {pipeline_mode = #tpu.pipeline_mode<synchronous>, transform_indices = @transform_3, window_bounds = array<i64: 64, 128>}, {transform_indices = @transform_4, window_bounds = array<i64: 32, 128>}, {transform_indices = @transform_5, window_bounds = array<i64: 1, 1, 128>}, {transform_indices = @transform_6, window_bounds = array<i64: 1, 1, 128>}]} {
    %c0 = arith.constant 0 : index
    %c0_0 = arith.constant 0 : index
    %0 = vector.load %arg2[%c0, %c0_0] : memref<32x64xf32, #tpu.memory_space<vmem>>, vector<32x64xf32>
    %c0_1 = arith.constant 0 : index
    %c0_2 = arith.constant 0 : index
    %1 = vector.load %arg3[%c0_1, %c0_2] : memref<1x64xf32, #tpu.memory_space<vmem>>, vector<1x64xf32>
    %2 = vector.broadcast %1 : vector<1x64xf32> to vector<32x64xf32>
    %3 = arith.mulf %0, %2 : vector<32x64xf32>
    %c0_3 = arith.constant 0 : index
    %c0_4 = arith.constant 0 : index
    %4 = vector.load %arg4[%c0_3, %c0_4] : memref<1x64xf32, #tpu.memory_space<vmem>>, vector<1x64xf32>
    %5 = vector.broadcast %4 : vector<1x64xf32> to vector<32x64xf32>
    %6 = arith.addf %3, %5 : vector<32x64xf32>
    %cst = arith.constant 0.000000e+00 : f32
    %7 = vector.broadcast %cst : f32 to vector<32x64xf32>
    %8 = arith.maximumf %6, %7 : vector<32x64xf32>
    %c0_5 = arith.constant 0 : index
    %c0_6 = arith.constant 0 : index
    %9 = vector.load %arg5[%c0_5, %c0_6] : memref<64x128xf32, #tpu.memory_space<vmem>>, vector<64x128xf32>
    %cst_7 = arith.constant dense<0.000000e+00> : vector<32x128xf32>
    %10 = tpu.matmul %8, %9, %cst_7 {dimension_numbers = #tpu.dot_dimension_numbers<[1], [0], [0], [1], [0, 0, 1, 1], [], []>} : vector<32x64xf32>, vector<64x128xf32>, vector<32x128xf32> -> vector<32x128xf32>
    %c0_8 = arith.constant 0 : index
    %c0_9 = arith.constant 0 : index
    %11 = vector.load %arg6[%c0_8, %c0_9] : memref<32x128xf32, #tpu.memory_space<vmem>>, vector<32x128xf32>
    tpu.vector_store %arg6[%c0_8, %c0_9], %10 {strides = array<i32>} : memref<32x128xf32, #tpu.memory_space<vmem>>, vector<32x128xf32>,
    %c0_i32 = arith.constant 0 : i32
    %12 = arith.cmpi eq, %arg1, %c0_i32 : i32
    %13 = arith.extui %12 : i1 to i32
    %c0_i32_10 = arith.constant 0 : i32
    %14 = arith.cmpi ne, %13, %c0_i32_10 : i32
    scf.if %14 {
      %cst_22 = arith.constant 0.000000e+00 : f32
      %29 = vector.broadcast %cst_22 : f32 to vector<1x128xf32>
      %c0_23 = arith.constant 0 : index
      %c0_24 = arith.constant 0 : index
      %30 = vector.load %arg9[%c0_23, %c0_24] : memref<1x128xf32, #tpu.memory_space<vmem>>, vector<1x128xf32>
      tpu.vector_store %arg9[%c0_23, %c0_24], %29 {strides = array<i32>} : memref<1x128xf32, #tpu.memory_space<vmem>>, vector<1x128xf32>,
      %cst_25 = arith.constant 0.000000e+00 : f32
      %31 = vector.broadcast %cst_25 : f32 to vector<1x128xf32>
      %c0_26 = arith.constant 0 : index
      %c0_27 = arith.constant 0 : index
      %32 = vector.load %arg10[%c0_26, %c0_27] : memref<1x128xf32, #tpu.memory_space<vmem>>, vector<1x128xf32>
      tpu.vector_store %arg10[%c0_26, %c0_27], %31 {strides = array<i32>} : memref<1x128xf32, #tpu.memory_space<vmem>>, vector<1x128xf32>,
    } else {
    }
    %c0_11 = arith.constant 0 : index
    %c0_12 = arith.constant 0 : index
    %15 = vector.load %arg9[%c0_11, %c0_12] : memref<1x128xf32, #tpu.memory_space<vmem>>, vector<1x128xf32>
    %cst_13 = arith.constant dense<0.000000e+00> : vector<128xf32>
    %16 = vector.multi_reduction <add>, %10, %cst_13 [0] : vector<32x128xf32> to vector<128xf32>
    %17 = vector.shape_cast %16 : vector<128xf32> to vector<1x128xf32>
    %18 = arith.addf %15, %17 : vector<1x128xf32>
    %c0_14 = arith.constant 0 : index
    %c0_15 = arith.constant 0 : index
    %19 = vector.load %arg9[%c0_14, %c0_15] : memref<1x128xf32, #tpu.memory_space<vmem>>, vector<1x128xf32>
    tpu.vector_store %arg9[%c0_14, %c0_15], %18 {strides = array<i32>} : memref<1x128xf32, #tpu.memory_space<vmem>>, vector<1x128xf32>,
    %c0_16 = arith.constant 0 : index
    %c0_17 = arith.constant 0 : index
    %20 = vector.load %arg10[%c0_16, %c0_17] : memref<1x128xf32, #tpu.memory_space<vmem>>, vector<1x128xf32>
    %21 = arith.mulf %10, %10 : vector<32x128xf32>
    %cst_18 = arith.constant dense<0.000000e+00> : vector<128xf32>
    %22 = vector.multi_reduction <add>, %21, %cst_18 [0] : vector<32x128xf32> to vector<128xf32>
    %23 = vector.shape_cast %22 : vector<128xf32> to vector<1x128xf32>
    %24 = arith.addf %20, %23 : vector<1x128xf32>
    %c0_19 = arith.constant 0 : index
    %c0_20 = arith.constant 0 : index
    %25 = vector.load %arg10[%c0_19, %c0_20] : memref<1x128xf32, #tpu.memory_space<vmem>>, vector<1x128xf32>
    tpu.vector_store %arg10[%c0_19, %c0_20], %24 {strides = array<i32>} : memref<1x128xf32, #tpu.memory_space<vmem>>, vector<1x128xf32>,
    %c1_i32 = arith.constant 1 : i32
    %26 = arith.cmpi eq, %arg1, %c1_i32 : i32
    %27 = arith.extui %26 : i1 to i32
    %c0_i32_21 = arith.constant 0 : i32
    %28 = arith.cmpi ne, %27, %c0_i32_21 : i32
    scf.if %28 {
      %c0_22 = arith.constant 0 : index
      %c0_23 = arith.constant 0 : index
      %29 = vector.load %arg9[%c0_22, %c0_23] : memref<1x128xf32, #tpu.memory_space<vmem>>, vector<1x128xf32>
      %30 = vector.shape_cast %29 : vector<1x128xf32> to vector<1x1x128xf32>
      %c0_24 = arith.constant 0 : index
      %c0_25 = arith.constant 0 : index
      %c0_26 = arith.constant 0 : index
      %31 = vector.load %arg7[%c0_24, %c0_25, %c0_26] : memref<1x1x128xf32, #tpu.memory_space<vmem>>, vector<1x1x128xf32>
      tpu.vector_store %arg7[%c0_24, %c0_25, %c0_26], %30 {strides = array<i32>} : memref<1x1x128xf32, #tpu.memory_space<vmem>>, vector<1x1x128xf32>,
      %c0_27 = arith.constant 0 : index
      %c0_28 = arith.constant 0 : index
      %32 = vector.load %arg10[%c0_27, %c0_28] : memref<1x128xf32, #tpu.memory_space<vmem>>, vector<1x128xf32>
      %33 = vector.shape_cast %32 : vector<1x128xf32> to vector<1x1x128xf32>
      %c0_29 = arith.constant 0 : index
      %c0_30 = arith.constant 0 : index
      %c0_31 = arith.constant 0 : index
      %34 = vector.load %arg8[%c0_29, %c0_30, %c0_31] : memref<1x1x128xf32, #tpu.memory_space<vmem>>, vector<1x1x128xf32>
      tpu.vector_store %arg8[%c0_29, %c0_30, %c0_31], %33 {strides = array<i32>} : memref<1x1x128xf32, #tpu.memory_space<vmem>>, vector<1x1x128xf32>,
    } else {
    }
    return
  }
  func.func @transform_0(%arg0: i32, %arg1: i32) -> (i32, i32) {
    %c2_i32 = arith.constant 2 : i32
    %0 = arith.muli %arg0, %c2_i32 : i32
    %1 = arith.addi %0, %arg1 : i32
    %c0_i32 = arith.constant 0 : i32
    %c0_i32_0 = arith.constant 0 : i32
    return %1, %c0_i32 : i32, i32
  }
  func.func @transform_1(%arg0: i32, %arg1: i32) -> (i32, i32) {
    %c0_i32 = arith.constant 0 : i32
    %c0_i32_0 = arith.constant 0 : i32
    %c0_i32_1 = arith.constant 0 : i32
    return %c0_i32, %c0_i32_0 : i32, i32
  }
  func.func @transform_2(%arg0: i32, %arg1: i32) -> (i32, i32) {
    %c0_i32 = arith.constant 0 : i32
    %c0_i32_0 = arith.constant 0 : i32
    %c0_i32_1 = arith.constant 0 : i32
    return %c0_i32, %c0_i32_0 : i32, i32
  }
  func.func @transform_3(%arg0: i32, %arg1: i32) -> (i32, i32) {
    %c0_i32 = arith.constant 0 : i32
    %c0_i32_0 = arith.constant 0 : i32
    %c0_i32_1 = arith.constant 0 : i32
    return %c0_i32, %c0_i32_0 : i32, i32
  }
  func.func @transform_4(%arg0: i32, %arg1: i32) -> (i32, i32) {
    %c2_i32 = arith.constant 2 : i32
    %0 = arith.muli %arg0, %c2_i32 : i32
    %1 = arith.addi %0, %arg1 : i32
    %c0_i32 = arith.constant 0 : i32
    %c0_i32_0 = arith.constant 0 : i32
    return %1, %c0_i32 : i32, i32
  }
  func.func @transform_5(%arg0: i32, %arg1: i32) -> (i32, i32, i32) {
    %c0_i32 = arith.constant 0 : i32
    %c0_i32_0 = arith.constant 0 : i32
    %c0_i32_1 = arith.constant 0 : i32
    return %arg0, %c0_i32, %c0_i32_0 : i32, i32, i32
  }
  func.func @transform_6(%arg0: i32, %arg1: i32) -> (i32, i32, i32) {
    %c0_i32 = arith.constant 0 : i32
    %c0_i32_0 = arith.constant 0 : i32
    %c0_i32_1 = arith.constant 0 : i32
    return %arg0, %c0_i32, %c0_i32_0 : i32, i32, i32
  }
}

module attributes {stable_mosaic.version = 11 : i64} {
  func.func @_conv_out_kernel(%arg0: i32, %arg1: i32, %arg2: memref<32x128xf32, #tpu.memory_space<vmem>>, %arg3: memref<1x128xf32, #tpu.memory_space<vmem>>, %arg4: memref<1x128xf32, #tpu.memory_space<vmem>>, %arg5: memref<128x1024xf32, #tpu.memory_space<vmem>>, %arg6: memref<1x1x1024xf32, #tpu.memory_space<vmem>>, %arg7: memref<1x1x1024xf32, #tpu.memory_space<vmem>>, %arg8: memref<1x1x1024xf32, #tpu.memory_space<vmem>>, %arg9: memref<1x1x1024xf32, #tpu.memory_space<vmem>>, %arg10: memref<1x1024xf32, #tpu.memory_space<vmem>>, %arg11: memref<1x1024xf32, #tpu.memory_space<vmem>>, %arg12: memref<1x1024xf32, #tpu.memory_space<vmem>>, %arg13: memref<1x1024xf32, #tpu.memory_space<vmem>>) attributes {dimension_semantics = [#tpu.dimension_semantics<parallel>, #tpu.dimension_semantics<arbitrary>], iteration_bounds = array<i64: 8, 2>, scalar_prefetch = 0 : i64, scratch_operands = 4 : i64, tpu.core_type = #tpu.core_type<tc>, window_params = [{transform_indices = @transform_0, window_bounds = array<i64: 32, 128>}, {pipeline_mode = #tpu.pipeline_mode<synchronous>, transform_indices = @transform_1, window_bounds = array<i64: 1, 128>}, {pipeline_mode = #tpu.pipeline_mode<synchronous>, transform_indices = @transform_2, window_bounds = array<i64: 1, 128>}, {pipeline_mode = #tpu.pipeline_mode<synchronous>, transform_indices = @transform_3, window_bounds = array<i64: 128, 1024>}, {transform_indices = @transform_4, window_bounds = array<i64: 1, 1, 1024>}, {transform_indices = @transform_5, window_bounds = array<i64: 1, 1, 1024>}, {transform_indices = @transform_6, window_bounds = array<i64: 1, 1, 1024>}, {transform_indices = @transform_7, window_bounds = array<i64: 1, 1, 1024>}]} {
    %c0 = arith.constant 0 : index
    %c0_0 = arith.constant 0 : index
    %0 = vector.load %arg2[%c0, %c0_0] : memref<32x128xf32, #tpu.memory_space<vmem>>, vector<32x128xf32>
    %c0_1 = arith.constant 0 : index
    %c0_2 = arith.constant 0 : index
    %1 = vector.load %arg3[%c0_1, %c0_2] : memref<1x128xf32, #tpu.memory_space<vmem>>, vector<1x128xf32>
    %2 = vector.broadcast %1 : vector<1x128xf32> to vector<32x128xf32>
    %3 = arith.mulf %0, %2 : vector<32x128xf32>
    %c0_3 = arith.constant 0 : index
    %c0_4 = arith.constant 0 : index
    %4 = vector.load %arg4[%c0_3, %c0_4] : memref<1x128xf32, #tpu.memory_space<vmem>>, vector<1x128xf32>
    %5 = vector.broadcast %4 : vector<1x128xf32> to vector<32x128xf32>
    %6 = arith.addf %3, %5 : vector<32x128xf32>
    %cst = arith.constant 0.000000e+00 : f32
    %7 = vector.broadcast %cst : f32 to vector<32x128xf32>
    %8 = arith.maximumf %6, %7 : vector<32x128xf32>
    %c0_5 = arith.constant 0 : index
    %c0_6 = arith.constant 0 : index
    %9 = vector.load %arg5[%c0_5, %c0_6] : memref<128x1024xf32, #tpu.memory_space<vmem>>, vector<128x1024xf32>
    %cst_7 = arith.constant dense<0.000000e+00> : vector<32x1024xf32>
    %10 = tpu.matmul %8, %9, %cst_7 {dimension_numbers = #tpu.dot_dimension_numbers<[1], [0], [0], [1], [0, 0, 1, 1], [], []>} : vector<32x128xf32>, vector<128x1024xf32>, vector<32x1024xf32> -> vector<32x1024xf32>
    %c0_i32 = arith.constant 0 : i32
    %11 = arith.cmpi eq, %arg1, %c0_i32 : i32
    %12 = arith.extui %11 : i1 to i32
    %c0_i32_8 = arith.constant 0 : i32
    %13 = arith.cmpi ne, %12, %c0_i32_8 : i32
    scf.if %13 {
      %cst_30 = arith.constant 0.000000e+00 : f32
      %38 = vector.broadcast %cst_30 : f32 to vector<1x1024xf32>
      %c0_31 = arith.constant 0 : index
      %c0_32 = arith.constant 0 : index
      %39 = vector.load %arg10[%c0_31, %c0_32] : memref<1x1024xf32, #tpu.memory_space<vmem>>, vector<1x1024xf32>
      tpu.vector_store %arg10[%c0_31, %c0_32], %38 {strides = array<i32>} : memref<1x1024xf32, #tpu.memory_space<vmem>>, vector<1x1024xf32>,
      %cst_33 = arith.constant 0.000000e+00 : f32
      %40 = vector.broadcast %cst_33 : f32 to vector<1x1024xf32>
      %c0_34 = arith.constant 0 : index
      %c0_35 = arith.constant 0 : index
      %41 = vector.load %arg11[%c0_34, %c0_35] : memref<1x1024xf32, #tpu.memory_space<vmem>>, vector<1x1024xf32>
      tpu.vector_store %arg11[%c0_34, %c0_35], %40 {strides = array<i32>} : memref<1x1024xf32, #tpu.memory_space<vmem>>, vector<1x1024xf32>,
      %cst_36 = arith.constant 0xFF800000 : f32
      %42 = vector.broadcast %cst_36 : f32 to vector<1x1024xf32>
      %c0_37 = arith.constant 0 : index
      %c0_38 = arith.constant 0 : index
      %43 = vector.load %arg12[%c0_37, %c0_38] : memref<1x1024xf32, #tpu.memory_space<vmem>>, vector<1x1024xf32>
      tpu.vector_store %arg12[%c0_37, %c0_38], %42 {strides = array<i32>} : memref<1x1024xf32, #tpu.memory_space<vmem>>, vector<1x1024xf32>,
      %cst_39 = arith.constant 0x7F800000 : f32
      %44 = vector.broadcast %cst_39 : f32 to vector<1x1024xf32>
      %c0_40 = arith.constant 0 : index
      %c0_41 = arith.constant 0 : index
      %45 = vector.load %arg13[%c0_40, %c0_41] : memref<1x1024xf32, #tpu.memory_space<vmem>>, vector<1x1024xf32>
      tpu.vector_store %arg13[%c0_40, %c0_41], %44 {strides = array<i32>} : memref<1x1024xf32, #tpu.memory_space<vmem>>, vector<1x1024xf32>,
    } else {
    }
    %c0_9 = arith.constant 0 : index
    %c0_10 = arith.constant 0 : index
    %14 = vector.load %arg10[%c0_9, %c0_10] : memref<1x1024xf32, #tpu.memory_space<vmem>>, vector<1x1024xf32>
    %cst_11 = arith.constant dense<0.000000e+00> : vector<1024xf32>
    %15 = vector.multi_reduction <add>, %10, %cst_11 [0] : vector<32x1024xf32> to vector<1024xf32>
    %16 = vector.shape_cast %15 : vector<1024xf32> to vector<1x1024xf32>
    %17 = arith.addf %14, %16 : vector<1x1024xf32>
    %c0_12 = arith.constant 0 : index
    %c0_13 = arith.constant 0 : index
    %18 = vector.load %arg10[%c0_12, %c0_13] : memref<1x1024xf32, #tpu.memory_space<vmem>>, vector<1x1024xf32>
    tpu.vector_store %arg10[%c0_12, %c0_13], %17 {strides = array<i32>} : memref<1x1024xf32, #tpu.memory_space<vmem>>, vector<1x1024xf32>,
    %c0_14 = arith.constant 0 : index
    %c0_15 = arith.constant 0 : index
    %19 = vector.load %arg11[%c0_14, %c0_15] : memref<1x1024xf32, #tpu.memory_space<vmem>>, vector<1x1024xf32>
    %20 = arith.mulf %10, %10 : vector<32x1024xf32>
    %cst_16 = arith.constant dense<0.000000e+00> : vector<1024xf32>
    %21 = vector.multi_reduction <add>, %20, %cst_16 [0] : vector<32x1024xf32> to vector<1024xf32>
    %22 = vector.shape_cast %21 : vector<1024xf32> to vector<1x1024xf32>
    %23 = arith.addf %19, %22 : vector<1x1024xf32>
    %c0_17 = arith.constant 0 : index
    %c0_18 = arith.constant 0 : index
    %24 = vector.load %arg11[%c0_17, %c0_18] : memref<1x1024xf32, #tpu.memory_space<vmem>>, vector<1x1024xf32>
    tpu.vector_store %arg11[%c0_17, %c0_18], %23 {strides = array<i32>} : memref<1x1024xf32, #tpu.memory_space<vmem>>, vector<1x1024xf32>,
    %c0_19 = arith.constant 0 : index
    %c0_20 = arith.constant 0 : index
    %25 = vector.load %arg12[%c0_19, %c0_20] : memref<1x1024xf32, #tpu.memory_space<vmem>>, vector<1x1024xf32>
    %cst_21 = arith.constant dense<0xFF800000> : vector<1024xf32>
    %26 = vector.multi_reduction <maximumf>, %10, %cst_21 [0] : vector<32x1024xf32> to vector<1024xf32>
    %27 = vector.shape_cast %26 : vector<1024xf32> to vector<1x1024xf32>
    %28 = arith.maximumf %25, %27 : vector<1x1024xf32>
    %c0_22 = arith.constant 0 : index
    %c0_23 = arith.constant 0 : index
    %29 = vector.load %arg12[%c0_22, %c0_23] : memref<1x1024xf32, #tpu.memory_space<vmem>>, vector<1x1024xf32>
    tpu.vector_store %arg12[%c0_22, %c0_23], %28 {strides = array<i32>} : memref<1x1024xf32, #tpu.memory_space<vmem>>, vector<1x1024xf32>,
    %c0_24 = arith.constant 0 : index
    %c0_25 = arith.constant 0 : index
    %30 = vector.load %arg13[%c0_24, %c0_25] : memref<1x1024xf32, #tpu.memory_space<vmem>>, vector<1x1024xf32>
    %cst_26 = arith.constant dense<0x7F800000> : vector<1024xf32>
    %31 = vector.multi_reduction <minimumf>, %10, %cst_26 [0] : vector<32x1024xf32> to vector<1024xf32>
    %32 = vector.shape_cast %31 : vector<1024xf32> to vector<1x1024xf32>
    %33 = arith.minimumf %30, %32 : vector<1x1024xf32>
    %c0_27 = arith.constant 0 : index
    %c0_28 = arith.constant 0 : index
    %34 = vector.load %arg13[%c0_27, %c0_28] : memref<1x1024xf32, #tpu.memory_space<vmem>>, vector<1x1024xf32>
    tpu.vector_store %arg13[%c0_27, %c0_28], %33 {strides = array<i32>} : memref<1x1024xf32, #tpu.memory_space<vmem>>, vector<1x1024xf32>,
    %c1_i32 = arith.constant 1 : i32
    %35 = arith.cmpi eq, %arg1, %c1_i32 : i32
    %36 = arith.extui %35 : i1 to i32
    %c0_i32_29 = arith.constant 0 : i32
    %37 = arith.cmpi ne, %36, %c0_i32_29 : i32
    scf.if %37 {
      %c0_30 = arith.constant 0 : index
      %c0_31 = arith.constant 0 : index
      %38 = vector.load %arg10[%c0_30, %c0_31] : memref<1x1024xf32, #tpu.memory_space<vmem>>, vector<1x1024xf32>
      %39 = vector.shape_cast %38 : vector<1x1024xf32> to vector<1x1x1024xf32>
      %c0_32 = arith.constant 0 : index
      %c0_33 = arith.constant 0 : index
      %c0_34 = arith.constant 0 : index
      %40 = vector.load %arg6[%c0_32, %c0_33, %c0_34] : memref<1x1x1024xf32, #tpu.memory_space<vmem>>, vector<1x1x1024xf32>
      tpu.vector_store %arg6[%c0_32, %c0_33, %c0_34], %39 {strides = array<i32>} : memref<1x1x1024xf32, #tpu.memory_space<vmem>>, vector<1x1x1024xf32>,
      %c0_35 = arith.constant 0 : index
      %c0_36 = arith.constant 0 : index
      %41 = vector.load %arg11[%c0_35, %c0_36] : memref<1x1024xf32, #tpu.memory_space<vmem>>, vector<1x1024xf32>
      %42 = vector.shape_cast %41 : vector<1x1024xf32> to vector<1x1x1024xf32>
      %c0_37 = arith.constant 0 : index
      %c0_38 = arith.constant 0 : index
      %c0_39 = arith.constant 0 : index
      %43 = vector.load %arg7[%c0_37, %c0_38, %c0_39] : memref<1x1x1024xf32, #tpu.memory_space<vmem>>, vector<1x1x1024xf32>
      tpu.vector_store %arg7[%c0_37, %c0_38, %c0_39], %42 {strides = array<i32>} : memref<1x1x1024xf32, #tpu.memory_space<vmem>>, vector<1x1x1024xf32>,
      %c0_40 = arith.constant 0 : index
      %c0_41 = arith.constant 0 : index
      %44 = vector.load %arg12[%c0_40, %c0_41] : memref<1x1024xf32, #tpu.memory_space<vmem>>, vector<1x1024xf32>
      %45 = vector.shape_cast %44 : vector<1x1024xf32> to vector<1x1x1024xf32>
      %c0_42 = arith.constant 0 : index
      %c0_43 = arith.constant 0 : index
      %c0_44 = arith.constant 0 : index
      %46 = vector.load %arg8[%c0_42, %c0_43, %c0_44] : memref<1x1x1024xf32, #tpu.memory_space<vmem>>, vector<1x1x1024xf32>
      tpu.vector_store %arg8[%c0_42, %c0_43, %c0_44], %45 {strides = array<i32>} : memref<1x1x1024xf32, #tpu.memory_space<vmem>>, vector<1x1x1024xf32>,
      %c0_45 = arith.constant 0 : index
      %c0_46 = arith.constant 0 : index
      %47 = vector.load %arg13[%c0_45, %c0_46] : memref<1x1024xf32, #tpu.memory_space<vmem>>, vector<1x1024xf32>
      %48 = vector.shape_cast %47 : vector<1x1024xf32> to vector<1x1x1024xf32>
      %c0_47 = arith.constant 0 : index
      %c0_48 = arith.constant 0 : index
      %c0_49 = arith.constant 0 : index
      %49 = vector.load %arg9[%c0_47, %c0_48, %c0_49] : memref<1x1x1024xf32, #tpu.memory_space<vmem>>, vector<1x1x1024xf32>
      tpu.vector_store %arg9[%c0_47, %c0_48, %c0_49], %48 {strides = array<i32>} : memref<1x1x1024xf32, #tpu.memory_space<vmem>>, vector<1x1x1024xf32>,
    } else {
    }
    return
  }
  func.func @transform_0(%arg0: i32, %arg1: i32) -> (i32, i32) {
    %c2_i32 = arith.constant 2 : i32
    %0 = arith.muli %arg0, %c2_i32 : i32
    %1 = arith.addi %0, %arg1 : i32
    %c0_i32 = arith.constant 0 : i32
    %c0_i32_0 = arith.constant 0 : i32
    return %1, %c0_i32 : i32, i32
  }
  func.func @transform_1(%arg0: i32, %arg1: i32) -> (i32, i32) {
    %c0_i32 = arith.constant 0 : i32
    %c0_i32_0 = arith.constant 0 : i32
    %c0_i32_1 = arith.constant 0 : i32
    return %c0_i32, %c0_i32_0 : i32, i32
  }
  func.func @transform_2(%arg0: i32, %arg1: i32) -> (i32, i32) {
    %c0_i32 = arith.constant 0 : i32
    %c0_i32_0 = arith.constant 0 : i32
    %c0_i32_1 = arith.constant 0 : i32
    return %c0_i32, %c0_i32_0 : i32, i32
  }
  func.func @transform_3(%arg0: i32, %arg1: i32) -> (i32, i32) {
    %c0_i32 = arith.constant 0 : i32
    %c0_i32_0 = arith.constant 0 : i32
    %c0_i32_1 = arith.constant 0 : i32
    return %c0_i32, %c0_i32_0 : i32, i32
  }
  func.func @transform_4(%arg0: i32, %arg1: i32) -> (i32, i32, i32) {
    %c0_i32 = arith.constant 0 : i32
    %c0_i32_0 = arith.constant 0 : i32
    %c0_i32_1 = arith.constant 0 : i32
    return %arg0, %c0_i32, %c0_i32_0 : i32, i32, i32
  }
  func.func @transform_5(%arg0: i32, %arg1: i32) -> (i32, i32, i32) {
    %c0_i32 = arith.constant 0 : i32
    %c0_i32_0 = arith.constant 0 : i32
    %c0_i32_1 = arith.constant 0 : i32
    return %arg0, %c0_i32, %c0_i32_0 : i32, i32, i32
  }
  func.func @transform_6(%arg0: i32, %arg1: i32) -> (i32, i32, i32) {
    %c0_i32 = arith.constant 0 : i32
    %c0_i32_0 = arith.constant 0 : i32
    %c0_i32_1 = arith.constant 0 : i32
    return %arg0, %c0_i32, %c0_i32_0 : i32, i32, i32
  }
  func.func @transform_7(%arg0: i32, %arg1: i32) -> (i32, i32, i32) {
    %c0_i32 = arith.constant 0 : i32
    %c0_i32_0 = arith.constant 0 : i32
    %c0_i32_1 = arith.constant 0 : i32
    return %arg0, %c0_i32, %c0_i32_0 : i32, i32, i32
  }
}

module attributes {stable_mosaic.version = 11 : i64} {
  func.func @_fc_head_kernel(%arg0: memref<8x1024xf32, #tpu.memory_space<vmem>>, %arg1: memref<8x1024xf32, #tpu.memory_space<vmem>>, %arg2: memref<1x1024xf32, #tpu.memory_space<vmem>>, %arg3: memref<1x1024xf32, #tpu.memory_space<vmem>>, %arg4: memref<1024x512xf32, #tpu.memory_space<vmem>>, %arg5: memref<1x512xf32, #tpu.memory_space<vmem>>, %arg6: memref<1x512xf32, #tpu.memory_space<vmem>>, %arg7: memref<512x256xf32, #tpu.memory_space<vmem>>, %arg8: memref<1x256xf32, #tpu.memory_space<vmem>>, %arg9: memref<1x256xf32, #tpu.memory_space<vmem>>, %arg10: memref<256x9xf32, #tpu.memory_space<vmem>>, %arg11: memref<1x9xf32, #tpu.memory_space<vmem>>, %arg12: memref<8x9xf32, #tpu.memory_space<vmem>>) attributes {dimension_semantics = [], scalar_prefetch = 0 : i64, scratch_operands = 0 : i64, tpu.core_type = #tpu.core_type<tc>} {
    %c0 = arith.constant 0 : index
    %c0_0 = arith.constant 0 : index
    %0 = vector.load %arg2[%c0, %c0_0] : memref<1x1024xf32, #tpu.memory_space<vmem>>, vector<1x1024xf32>
    %cst = arith.constant 0.000000e+00 : f32
    %1 = vector.broadcast %cst : f32 to vector<1x1024xf32>
    %2 = arith.cmpf oge, %0, %1 : vector<1x1024xf32>
    %c0_1 = arith.constant 0 : index
    %c0_2 = arith.constant 0 : index
    %3 = vector.load %arg0[%c0_1, %c0_2] : memref<8x1024xf32, #tpu.memory_space<vmem>>, vector<8x1024xf32>
    %4 = vector.broadcast %0 : vector<1x1024xf32> to vector<8x1024xf32>
    %5 = arith.mulf %3, %4 : vector<8x1024xf32>
    %c0_3 = arith.constant 0 : index
    %c0_4 = arith.constant 0 : index
    %6 = vector.load %arg1[%c0_3, %c0_4] : memref<8x1024xf32, #tpu.memory_space<vmem>>, vector<8x1024xf32>
    %7 = vector.broadcast %0 : vector<1x1024xf32> to vector<8x1024xf32>
    %8 = arith.mulf %6, %7 : vector<8x1024xf32>
    %9 = vector.shape_cast %2 : vector<1x1024xi1> to vector<1x1024xi1>
    %10 = vector.broadcast %9 : vector<1x1024xi1> to vector<8x1024xi1>
    %11 = arith.select %10, %5, %8 : vector<8x1024xi1>, vector<8x1024xf32>
    %c0_5 = arith.constant 0 : index
    %c0_6 = arith.constant 0 : index
    %12 = vector.load %arg3[%c0_5, %c0_6] : memref<1x1024xf32, #tpu.memory_space<vmem>>, vector<1x1024xf32>
    %13 = vector.broadcast %12 : vector<1x1024xf32> to vector<8x1024xf32>
    %14 = arith.addf %11, %13 : vector<8x1024xf32>
    %cst_7 = arith.constant 0.000000e+00 : f32
    %15 = vector.broadcast %cst_7 : f32 to vector<8x1024xf32>
    %16 = arith.maximumf %14, %15 : vector<8x1024xf32>
    %c0_8 = arith.constant 0 : index
    %c0_9 = arith.constant 0 : index
    %17 = vector.load %arg4[%c0_8, %c0_9] : memref<1024x512xf32, #tpu.memory_space<vmem>>, vector<1024x512xf32>
    %cst_10 = arith.constant dense<0.000000e+00> : vector<8x512xf32>
    %18 = tpu.matmul %16, %17, %cst_10 {dimension_numbers = #tpu.dot_dimension_numbers<[1], [0], [0], [1], [0, 0, 1, 1], [], []>} : vector<8x1024xf32>, vector<1024x512xf32>, vector<8x512xf32> -> vector<8x512xf32>
    %c0_11 = arith.constant 0 : index
    %c0_12 = arith.constant 0 : index
    %19 = vector.load %arg5[%c0_11, %c0_12] : memref<1x512xf32, #tpu.memory_space<vmem>>, vector<1x512xf32>
    %c0_13 = arith.constant 0 : index
    %c0_14 = arith.constant 0 : index
    %20 = vector.load %arg6[%c0_13, %c0_14] : memref<1x512xf32, #tpu.memory_space<vmem>>, vector<1x512xf32>
    %cst_15 = arith.constant dense<0.000000e+00> : vector<512xf32>
    %21 = vector.multi_reduction <add>, %18, %cst_15 [0] : vector<8x512xf32> to vector<512xf32>
    %22 = vector.shape_cast %21 : vector<512xf32> to vector<1x512xf32>
    %cst_16 = arith.constant 8.000000e+00 : f32
    %23 = vector.broadcast %cst_16 : f32 to vector<1x512xf32>
    %24 = arith.divf %22, %23 : vector<1x512xf32>
    %25 = vector.broadcast %24 : vector<1x512xf32> to vector<8x512xf32>
    %26 = arith.subf %18, %25 : vector<8x512xf32>
    %27 = arith.mulf %26, %26 : vector<8x512xf32>
    %cst_17 = arith.constant dense<0.000000e+00> : vector<512xf32>
    %28 = vector.multi_reduction <add>, %27, %cst_17 [0] : vector<8x512xf32> to vector<512xf32>
    %29 = vector.shape_cast %28 : vector<512xf32> to vector<1x512xf32>
    %cst_18 = arith.constant 8.000000e+00 : f32
    %30 = vector.broadcast %cst_18 : f32 to vector<1x512xf32>
    %31 = arith.divf %29, %30 : vector<1x512xf32>
    %cst_19 = arith.constant 9.99999974E-6 : f32
    %32 = vector.broadcast %cst_19 : f32 to vector<1x512xf32>
    %33 = arith.addf %31, %32 : vector<1x512xf32>
    %34 = math.rsqrt %33 : vector<1x512xf32>
    %35 = arith.mulf %19, %34 : vector<1x512xf32>
    %36 = vector.broadcast %35 : vector<1x512xf32> to vector<8x512xf32>
    %37 = arith.mulf %18, %36 : vector<8x512xf32>
    %38 = arith.mulf %24, %35 : vector<1x512xf32>
    %39 = arith.subf %20, %38 : vector<1x512xf32>
    %40 = vector.broadcast %39 : vector<1x512xf32> to vector<8x512xf32>
    %41 = arith.addf %37, %40 : vector<8x512xf32>
    %cst_20 = arith.constant 0.000000e+00 : f32
    %42 = vector.broadcast %cst_20 : f32 to vector<8x512xf32>
    %43 = arith.maximumf %41, %42 : vector<8x512xf32>
    %c0_21 = arith.constant 0 : index
    %c0_22 = arith.constant 0 : index
    %44 = vector.load %arg7[%c0_21, %c0_22] : memref<512x256xf32, #tpu.memory_space<vmem>>, vector<512x256xf32>
    %cst_23 = arith.constant dense<0.000000e+00> : vector<8x256xf32>
    %45 = tpu.matmul %43, %44, %cst_23 {dimension_numbers = #tpu.dot_dimension_numbers<[1], [0], [0], [1], [0, 0, 1, 1], [], []>} : vector<8x512xf32>, vector<512x256xf32>, vector<8x256xf32> -> vector<8x256xf32>
    %c0_24 = arith.constant 0 : index
    %c0_25 = arith.constant 0 : index
    %46 = vector.load %arg8[%c0_24, %c0_25] : memref<1x256xf32, #tpu.memory_space<vmem>>, vector<1x256xf32>
    %c0_26 = arith.constant 0 : index
    %c0_27 = arith.constant 0 : index
    %47 = vector.load %arg9[%c0_26, %c0_27] : memref<1x256xf32, #tpu.memory_space<vmem>>, vector<1x256xf32>
    %cst_28 = arith.constant dense<0.000000e+00> : vector<256xf32>
    %48 = vector.multi_reduction <add>, %45, %cst_28 [0] : vector<8x256xf32> to vector<256xf32>
    %49 = vector.shape_cast %48 : vector<256xf32> to vector<1x256xf32>
    %cst_29 = arith.constant 8.000000e+00 : f32
    %50 = vector.broadcast %cst_29 : f32 to vector<1x256xf32>
    %51 = arith.divf %49, %50 : vector<1x256xf32>
    %52 = vector.broadcast %51 : vector<1x256xf32> to vector<8x256xf32>
    %53 = arith.subf %45, %52 : vector<8x256xf32>
    %54 = arith.mulf %53, %53 : vector<8x256xf32>
    %cst_30 = arith.constant dense<0.000000e+00> : vector<256xf32>
    %55 = vector.multi_reduction <add>, %54, %cst_30 [0] : vector<8x256xf32> to vector<256xf32>
    %56 = vector.shape_cast %55 : vector<256xf32> to vector<1x256xf32>
    %cst_31 = arith.constant 8.000000e+00 : f32
    %57 = vector.broadcast %cst_31 : f32 to vector<1x256xf32>
    %58 = arith.divf %56, %57 : vector<1x256xf32>
    %cst_32 = arith.constant 9.99999974E-6 : f32
    %59 = vector.broadcast %cst_32 : f32 to vector<1x256xf32>
    %60 = arith.addf %58, %59 : vector<1x256xf32>
    %61 = math.rsqrt %60 : vector<1x256xf32>
    %62 = arith.mulf %46, %61 : vector<1x256xf32>
    %63 = vector.broadcast %62 : vector<1x256xf32> to vector<8x256xf32>
    %64 = arith.mulf %45, %63 : vector<8x256xf32>
    %65 = arith.mulf %51, %62 : vector<1x256xf32>
    %66 = arith.subf %47, %65 : vector<1x256xf32>
    %67 = vector.broadcast %66 : vector<1x256xf32> to vector<8x256xf32>
    %68 = arith.addf %64, %67 : vector<8x256xf32>
    %cst_33 = arith.constant 0.000000e+00 : f32
    %69 = vector.broadcast %cst_33 : f32 to vector<8x256xf32>
    %70 = arith.maximumf %68, %69 : vector<8x256xf32>
    %c0_34 = arith.constant 0 : index
    %c0_35 = arith.constant 0 : index
    %71 = vector.load %arg10[%c0_34, %c0_35] : memref<256x9xf32, #tpu.memory_space<vmem>>, vector<256x9xf32>
    %cst_36 = arith.constant dense<0.000000e+00> : vector<8x9xf32>
    %72 = tpu.matmul %70, %71, %cst_36 {dimension_numbers = #tpu.dot_dimension_numbers<[1], [0], [0], [1], [0, 0, 1, 1], [], []>} : vector<8x256xf32>, vector<256x9xf32>, vector<8x9xf32> -> vector<8x9xf32>
    %c0_37 = arith.constant 0 : index
    %c0_38 = arith.constant 0 : index
    %73 = vector.load %arg11[%c0_37, %c0_38] : memref<1x9xf32, #tpu.memory_space<vmem>>, vector<1x9xf32>
    %74 = vector.broadcast %73 : vector<1x9xf32> to vector<8x9xf32>
    %75 = arith.addf %72, %74 : vector<8x9xf32>
    %c0_39 = arith.constant 0 : index
    %c0_40 = arith.constant 0 : index
    %76 = vector.load %arg12[%c0_39, %c0_40] : memref<8x9xf32, #tpu.memory_space<vmem>>, vector<8x9xf32>
    tpu.vector_store %arg12[%c0_39, %c0_40], %75 {strides = array<i32>} : memref<8x9xf32, #tpu.memory_space<vmem>>, vector<8x9xf32>,
    return
  }
}

</mosaic_0001>

<bundles_post_ra>
// kernel: tnet_forward.4
= control target key start
LH: loop header
LB: loop body
LE: loop exit
PB: predicated region body
PF: predicated region fallthrough
CT: control target
= control target key end

     0   :  { %10 = vsyncpa [#allocation5], 0  ;;  %s759_s15 = smov 0   ;;  %s761_s16 = smov 0   ;;  %s891_s0 = inlined_call_operand.vmem [shape: f32[512,3], index: 0, kind: input, shape index: {}]   ;;  %s892_s1 = inlined_call_operand.hbm [shape: f32[3,64], index: 1, kind: input, shape index: {}]   ;;  %s893_s2 = inlined_call_operand.vmem [shape: f32[512,64], index: 2, kind: output, shape index: {0}]   ;;  %s894_s3 = inlined_call_operand.vmem [shape: f32[8,1,64], index: 3, kind: output, shape index: {1}]   ;;  %s895_s4 = inlined_call_operand.vmem [shape: f32[8,1,64], index: 4, kind: output, shape index: {2}]  }
   0x1   :  { %s763_s17 = smov 0   ;;  %s765_s18 = smov 0  }
   0x2   :  { %s767_s19 = smov 0  }
   0x3 LB: > { %s567_s20 = sadd.s32 4294967295, %s730_s19   ;;  %s25_s21 = sadd.s32 1, %s722_s17  ;;  %s730_s19 = sphi %s767_s19, %s16_s19   ;;  %s726_s18 = sphi %s765_s18, %s907_s18   ;;  %s722_s17 = sphi %s763_s17, %s906_s17   ;;  %s718_s16 = sphi %s761_s16, %s905_s16   ;;  %s714_s15 = sphi %s759_s15, %s904_s15  }
   0x4   : > { %p26_p0 = scmp.ge.s32.totalorder %s25_s21, 2  ;;  %s28_s22 = sadd.s32 1, %s726_s18 }
   0x5   : > { %p573_p1 = scmp.ge.s32.totalorder %s730_s19, 1  ;;  %p166_p2 = scmp.lt.s32.totalorder %s730_s19, 17 }
   0x6   : > { %s909_s21 = smov (%p26_p0, %s25_s21), 0  ;;  %s911_s22 = smov (!%p26_p0, %s28_s22), %s726_s18 }
   0x7   : > { %p792_p3 = pnand %p573_p1, %p166_p2  ;;  %p30_p4 = scmp.ge.s32.totalorder %s911_s22, 8 }
   0x8   : > { %p796_p5 = scmp.eq.s32.totalorder %s567_s20, 0  ;;  %s732_s25 = smov [#allocation4]  }
   0x9   : > { %s899_s23 = scalar_select %p792_p3, 1, 0 }
   0xa   : > { %s900_s24 = scalar_select %p796_p5, 1, 0 }
   0xb   : > { %p612_p6 = pneg %p792_p3  ;;  %s913_s22 = smov (%p30_p4, %s911_s22), 0 }
   0xc   : > { %s179_s26 = sshll.u32 %s732_s25, 4  ;;  %s660_s30 = scalar_lea.hbm %s892_s1, 64  ;;  %s180_s26 = int_to_ptr.vmem [resolvable:$true] %s179_s26 }
   0xd   : > { %p806_p7 = pnand %p796_p5, %p612_p6  ;;  %p661_p8 = scmp.ne.s32.totalorder %s892_s1, %s660_s30 }
   0xe   : > { %p667_p12 = scmp.lt.u32.totalorder %s660_s30, %s892_s1 }
   0xf   : > { %p662_p9 = pneg %p806_p7 }
  0x11   : > { %p663_p10 = pnand %p662_p9, %p661_p8 }
  0x13   : > { %p664_p11 = pneg %p663_p10 }
  0x15   : > { %p669_p13 = pnand %p667_p12, %p664_p11 }
  0x17   : > { %672 = shalt.err (!%p669_p13)
}
  0x18   : > { %s673_s9 = scalar_lea.vmem %s180_s26, 64  ;;  %p681_p4 = scmp.lt.s32.totalorder %s180_s26, %s180_s26 }
  0x19   : > { %p674_p0 = scmp.ne.s32.totalorder %s180_s26, %s673_s9  ;;  %p682_p6 = scmp.lt.s32.totalorder %s673_s9, %s673_s9 }
  0x1b   : > { %p676_p1 = pnand %p674_p0, %p662_p9  ;;  %p683_p5 = por %p682_p6, %p681_p4 }
  0x1d   : > { %p677_p2 = pneg %p676_p1 }
  0x1f   : > { %p684_p3 = pnand %p683_p5, %p677_p2 }
  0x21   : > { %687 = shalt.err (!%p684_p3)
}
  0x22   : > { %615 = dma.hbm_to_vmem [thread:$0]  (!%p806_p7), %s892_s1, 64, %s180_s26, [#allocation5]  }
  0x23   : > { %p902_p8 = scmp.ne.s32.totalorder %s899_s23, 0 }
  0x24   : > { %p903_p10 = scmp.ne.s32.totalorder (!%p902_p8), %s900_s24, 0 }
  0x25   : > { %205 = sbr.rel (%p902_p8) target bundleno = 303 (0x12f), region = 28 }
  0x2c   : > { %709 = dma.done.wait (%p903_p10), [#allocation5], 64  }
  0x2d   : > { %711 = vsyncadd (%p903_p10), [#allocation5], 4294967232  ;;  %p261_p3 = scmp.lt.s32.totalorder %s718_s16, 7  ;;  %s578_s12 = sshll.u32 %s718_s16, 1  ;;  %vm285_vm0 = vcmask 1042432   ;;  %vm272_vm1 = vcmask 23552  }
  0x2e   : > { %s242_s13 = sadd.s32 %s714_s15, %s578_s12  ;;  %v271_v0 = vld [vmem:[#allocation4] sm:$0x7]  ;;  %vm374_vm2 = vcmask 523264   ;;  %p589_p7 = scmp.ne.s32.totalorder %s714_s15, 0 }
  0x2f   : > { %s915_s16 = smov (!%p261_p3, %s718_s16), 7  ;;  %s579_s14 = sshll.u32 %s242_s13, 2  ;;  %598 = vmatprep.subr.msk.mxu0 %vm285_vm0, %v271_v0  ;;  %606 = vmatprep.subr.msk.mxu1 %vm285_vm0, %v271_v0  ;;  %vm383_vm3 = vcmask (!%p589_p7), 516096   ;;  %v733_v9 = vmov (!%p589_p7), 0.0  }
  0x30   : > { %s263_s25 = scalar_lea.vmem %s894_s3, %s915_s16  ;;  %s266_s24 = scalar_lea.vmem %s895_s4, %s915_s16  ;;  %599 = vmatpush3.msk.msra.mxu0 %vm285_vm0, %v271_v0  ;;  %607 = vmatpush3.msk.msra.mxu1 %vm285_vm0, %v271_v0  ;;  %384 = vst.msk [vmem:[#allocation2] sm:$0x1] (!%p589_p7), %vm383_vm3, %v733_v9  ;;  %385 = vst.msk [vmem:[#allocation3] sm:$0x1] (!%p589_p7), %vm383_vm3, %v733_v9 }
  0x31   : > { %p244_p5 = scmp.lt.s32.totalorder %s579_s14, 63 }
  0x33   : > { %s917_s14 = smov (!%p244_p5, %s579_s14), 63 }
  0x34   : > { %s580_s28 = sshll.u32 %s917_s14, 3 }
  0x35   : > { %s247_s5 = scalar_lea.vmem %s891_s0, %s580_s28  ;;  %s257_s8 = scalar_lea.vmem %s893_s2, %s580_s28 }
  0x36   : > { %v267_v1 = vld [vmem:[%s247_s5] sm:$0xff]  ;;  %v269_v2 = vld [vmem:[%s247_s5 + $0x10] sm:$0xff]  ;;  %v268_v3 = vld [vmem:[%s247_s5 + $0x8] sm:$0xff] }
  0x37   : > { %600 = vmatprep.mubr.msk.f32.mxu0 %vm272_vm1, %v267_v1  ;;  %603 = vmatprep.mubr.msk.f32.mxu1 %vm272_vm1, %v269_v2  ;;  %v270_v4 = vld [vmem:[%s247_s5 + $0x18] sm:$0xff] }
  0x38   : > { %601 = vmatmul.mubr.msk.f32.vlgmr.msra.gmra.mrb[0].mxu0 %vm272_vm1, %v268_v3  ;;  %604 = vmatmul.mubr.msk.f32.vlgmr.msra.gmra.mrb[0].mxu1 %vm272_vm1, %v270_v4 }
 0x107   : > { %382 = sbr.rel (%p589_p7) target bundleno = 270 (0x10e), region = 36 }
 0x10b   : > { %v602_v5 = vpop.f32.mrb[0].mxu0  ;;  %v605_v6 = vpop.f32.mrb[0].mxu1 }
 0x10c   : > { %376 = vst.msk [vmem:[%s257_s8 + $0x8] sm:$0xff] %vm374_vm2, %v602_v5  ;;  %378 = vst.msk [vmem:[%s257_s8 + $0x18] sm:$0xff] %vm374_vm2, %v605_v6  ;;  %v355_v7 = vpop.f32.mrb[1].mxu0  ;;  %v365_v8 = vpop.f32.mrb[1].mxu1 }
 0x10d   : > { %375 = vst.msk [vmem:[%s257_s8] sm:$0xff] %vm374_vm2, %v355_v7  ;;  %377 = vst.msk [vmem:[%s257_s8 + $0x10] sm:$0xff] %vm374_vm2, %v365_v8 }
 0x10e PF: > { %v387_v10 = vsel %vm374_vm2, %v355_v7, 0.0  ;;  %v388_v11 = vsel %vm374_vm2, %v602_v5, 0.0  ;;  %v390_v12 = vsel %vm374_vm2, %v365_v8, 0.0  ;;  %v404_v14 = vmul.f32 %v355_v7, %v355_v7  ;;  %v386_v36 = vld [vmem:[#allocation2] sm:$0x1]  ;;  %p590_p9 = scmp.ne.s32.totalorder %s714_s15, 1 }
 0x10f   : > { %v389_v13 = vadd.f32 %v388_v11, %v387_v10  ;;  %v405_v15 = vmul.f32 %v602_v5, %v602_v5  ;;  %v392_v16 = vsel %vm374_vm2, %v605_v6, 0.0  ;;  %v406_v17 = vmul.f32 %v365_v8, %v365_v8  ;;  %v403_v41 = vld [vmem:[#allocation3] sm:$0x1] }
 0x110   : > { %v407_v18 = vmul.f32 %v605_v6, %v605_v6  ;;  %v408_v20 = vsel %vm374_vm2, %v404_v14, 0.0  ;;  %vm401_vm4 = vcmask 516096  }
 0x111   : > { %v391_v19 = vadd.f32 %v390_v12, %v389_v13  ;;  %v409_v21 = vsel %vm374_vm2, %v405_v15, 0.0  ;;  %v411_v23 = vsel %vm374_vm2, %v406_v17, 0.0 }
 0x112   : > { %v410_v22 = vadd.f32 %v409_v21, %v408_v20  ;;  %v413_v25 = vsel %vm374_vm2, %v407_v18, 0.0 }
 0x113   : > { %v393_v24 = vadd.f32 %v392_v16, %v391_v19 }
 0x114   : > { %v412_v26 = vadd.f32 %v411_v23, %v410_v22 }
 0x115   : > { %v394_v27 = vrot.slane %v393_v24, 4 }
 0x116   : > { %v414_v28 = vadd.f32 %v413_v25, %v412_v26 }
 0x117   : > { %v395_v29 = vadd.f32 %v394_v27, %v393_v24 }
 0x118   : > { %v415_v30 = vrot.slane %v414_v28, 4 }
 0x119   : > { %v396_v31 = vrot.slane %v395_v29, 2 }
 0x11a   : > { %v416_v32 = vadd.f32 %v415_v30, %v414_v28 }
 0x11b   : > { %v397_v33 = vadd.f32 %v396_v31, %v395_v29 }
 0x11c   : > { %v417_v34 = vrot.slane %v416_v32, 2 }
 0x11d   : > { %v398_v35 = vrot.slane %v397_v33, 1 }
 0x11e   : > { %v418_v37 = vadd.f32 %v417_v34, %v416_v32 }
 0x11f   : > { %v399_v38 = vadd.f32 %v398_v35, %v397_v33 }
 0x120   : > { %v419_v39 = vrot.slane %v418_v37, 1  ;;  %426 = sbr.rel (%p590_p9) target bundleno = 303 (0x12f), region = 40 }
 0x121   : > { %v400_v40 = vadd.f32 %v399_v38, %v386_v36 }
 0x122   : > { %v420_v42 = vadd.f32 %v419_v39, %v418_v37 }
 0x123   : > { %402 = vst.msk [vmem:[#allocation2] sm:$0x1] %vm401_vm4, %v400_v40 }
 0x124   : > { %v421_v43 = vadd.f32 %v420_v42, %v403_v41 }
 0x126   : > { %422 = vst.msk [vmem:[#allocation3] sm:$0x1] %vm401_vm4, %v421_v43 }
 0x12a   : > { %v427_v44 = vld [vmem:[#allocation2] sm:$0x1] }
 0x12b   : > { %428 = vst.msk [vmem:[%s263_s25] sm:$0x1] %vm401_vm4, %v427_v44 }
 0x12d   : > { %v429_v45 = vld [vmem:[#allocation3] sm:$0x1] }
 0x12e   : > { %430 = vst.msk [vmem:[%s266_s24] sm:$0x1] %vm401_vm4, %v429_v45 }
 0x12f PF: > { %s16_s19 = sadd.s32 1, %s730_s19   ;;  %s904_s15 = smov %s722_s17 }
 0x130   : > { %p13_p11 = scmp.ge.s32.totalorder %s16_s19, 18   ;;  %s905_s16 = smov %s726_s18 }
 0x131   : > { %s906_s17 = smov %s909_s21  ;;  %s907_s18 = smov %s913_s22 }
 0x132   :  { %15 = sbr.rel (!%p13_p11) target bundleno = 3 (0x3), region = 95 }
 0x139   :  { %483 = vsyncpa [#allocation5], 1 }
 0x13a   :  { %485 = vsyncpa [#allocation5 + $0x1], 1 }

// kernel: tnet_forward.5
= control target key start
LH: loop header
LB: loop body
LE: loop exit
PB: predicated region body
PF: predicated region fallthrough
CT: control target
= control target key end

     0   :  { %12 = vsyncpa [#allocation5], 0  ;;  %s891_s21 = smov 0   ;;  %s893_s22 = smov 0   ;;  %s1028_s0 = inlined_call_operand.vmem [shape: f32[512,64], index: 0, kind: input, shape index: {}]   ;;  %s1029_s1 = inlined_call_operand.vmem [shape: f32[1,64], index: 1, kind: input, shape index: {}]   ;;  %s1030_s2 = inlined_call_operand.vmem [shape: f32[1,64], index: 2, kind: input, shape index: {}]   ;;  %s1031_s3 = inlined_call_operand.hbm [shape: f32[64,128], index: 3, kind: input, shape index: {}]   ;;  %s1032_s4 = inlined_call_operand.vmem [shape: f32[512,128], index: 4, kind: output, shape index: {0}]   ;;  %s1033_s5 = inlined_call_operand.vmem [shape: f32[8,1,128], index: 5, kind: output, shape index: {1}]   ;;  %s1034_s6 = inlined_call_operand.vmem [shape: f32[8,1,128], index: 6, kind: output, shape index: {2}]  }
   0x1   :  { %s895_s23 = smov 0   ;;  %s897_s24 = smov 0  }
   0x2   :  { %s899_s25 = smov 0  }
   0x3 LB: > { %s641_s26 = sadd.s32 4294967295, %s850_s25   ;;  %s27_s27 = sadd.s32 1, %s842_s23  ;;  %s850_s25 = sphi %s899_s25, %s18_s25   ;;  %s846_s24 = sphi %s897_s24, %s1046_s24   ;;  %s842_s23 = sphi %s895_s23, %s1045_s23   ;;  %s838_s22 = sphi %s893_s22, %s1044_s22   ;;  %s834_s21 = sphi %s891_s21, %s1043_s21  }
   0x4   : > { %p28_p0 = scmp.ge.s32.totalorder %s27_s27, 2  ;;  %s30_s28 = sadd.s32 1, %s846_s24 }
   0x5   : > { %p647_p1 = scmp.ge.s32.totalorder %s850_s25, 1  ;;  %p210_p2 = scmp.lt.s32.totalorder %s850_s25, 17 }
   0x6   : > { %s1048_s27 = smov (%p28_p0, %s27_s27), 0  ;;  %s1050_s28 = smov (!%p28_p0, %s30_s28), %s846_s24 }
   0x7   : > { %p924_p3 = pnand %p647_p1, %p210_p2  ;;  %p32_p4 = scmp.ge.s32.totalorder %s1050_s28, 8 }
   0x8   : > { %p928_p5 = scmp.eq.s32.totalorder %s641_s26, 0  ;;  %s852_s7 = smov [#allocation4]  }
   0x9   : > { %s1038_s29 = scalar_select %p924_p3, 1, 0 }
   0xa   : > { %s1039_s30 = scalar_select %p928_p5, 1, 0 }
   0xb   : > { %p730_p6 = pneg %p924_p3  ;;  %s1052_s28 = smov (%p32_p4, %s1050_s28), 0 }
   0xc   : > { %s228_s8 = sshll.u32 %s852_s7, 4  ;;  %s780_s12 = scalar_lea.hbm %s1031_s3, 1024  ;;  %s229_s8 = int_to_ptr.vmem [resolvable:$true] %s228_s8 }
   0xd   : > { %p938_p7 = pnand %p928_p5, %p730_p6  ;;  %p781_p8 = scmp.ne.s32.totalorder %s1031_s3, %s780_s12 }
   0xe   : > { %p787_p12 = scmp.lt.u32.totalorder %s780_s12, %s1031_s3 }
   0xf   : > { %p782_p9 = pneg %p938_p7 }
  0x11   : > { %p783_p10 = pnand %p782_p9, %p781_p8 }
  0x13   : > { %p784_p11 = pneg %p783_p10 }
  0x15   : > { %p789_p13 = pnand %p787_p12, %p784_p11 }
  0x17   : > { %792 = shalt.err (!%p789_p13)
}
  0x18   : > { %s793_s17 = scalar_lea.vmem %s229_s8, 1024  ;;  %p801_p4 = scmp.lt.s32.totalorder %s229_s8, %s229_s8 }
  0x19   : > { %p794_p0 = scmp.ne.s32.totalorder %s229_s8, %s793_s17  ;;  %p802_p6 = scmp.lt.s32.totalorder %s793_s17, %s793_s17 }
  0x1b   : > { %p796_p1 = pnand %p794_p0, %p782_p9  ;;  %p803_p5 = por %p802_p6, %p801_p4 }
  0x1d   : > { %p797_p2 = pneg %p796_p1 }
  0x1f   : > { %p804_p3 = pnand %p803_p5, %p797_p2 }
  0x21   : > { %807 = shalt.err (!%p804_p3)
}
  0x22   : > { %s853_s18 = smov 128   ;;  %s854_s19 = smov 8  }
  0x23   : > { %733 = dma.hbm_to_vmem [thread:$0]  (!%p938_p7), %s1031_s3, 1024, %s229_s8, [#allocation5], %s853_s18, %s853_s18, %s854_s19  }
  0x24   : > { %p1041_p8 = scmp.ne.s32.totalorder %s1038_s29, 0 }
  0x25   : > { %p1042_p10 = scmp.ne.s32.totalorder (!%p1041_p8), %s1039_s30, 0 }
  0x26   : > { %257 = sbr.rel (%p1041_p8) target bundleno = 311 (0x137), region = 36 }
  0x2d   : > { %829 = dma.done.wait (%p1042_p10), [#allocation5], 1024  }
  0x2e   : > { %831 = vsyncadd (%p1042_p10), [#allocation5], 4294966272  ;;  %p317_p3 = scmp.lt.s32.totalorder %s838_s22, 7  ;;  %s652_s7 = sshll.u32 %s838_s22, 1  ;;  %v353_v0 = vld [vmem:[#allocation4] sm:$0xff]  ;;  %v354_v1 = vld [vmem:[#allocation4 + $0x8] sm:$0xff] }
  0x2f   : > { %s298_s9 = sadd.s32 %s834_s21, %s652_s7  ;;  %v355_v2 = vld [vmem:[#allocation4 + $0x10] sm:$0xff]  ;;  %v702_v3 = vpack.c.bf16 %v354_v1, %v353_v0  ;;  %v356_v4 = vld [vmem:[#allocation4 + $0x18] sm:$0xff]  ;;  %v357_v6 = vld [vmem:[#allocation4 + $0x20] sm:$0xff]  ;;  %vm361_vm0 = vcmask 523264   ;;  %p664_p7 = scmp.ne.s32.totalorder %s834_s21, 0 }
  0x30   : > { %s1054_s22 = smov (!%p317_p3, %s838_s22), 7  ;;  %s653_s8 = sshll.u32 %s298_s9, 2  ;;  %v706_v5 = vpack.c.bf16 %v356_v4, %v355_v2  ;;  %v358_v7 = vld [vmem:[#allocation4 + $0x28] sm:$0xff]  ;;  %v658_v8 = vld [vmem:[%s1029_s1] ss:$0 sm:$0xff]  ;;  %v359_v17 = vld [vmem:[#allocation4 + $0x30] sm:$0xff] }
  0x31   : > { %s319_s11 = scalar_lea.vmem %s1033_s5, %s1054_s22  ;;  %s322_s30 = scalar_lea.vmem %s1034_s6, %s1054_s22  ;;  %703 = vmatprep.subr.bf16.mxu0 %v702_v3  ;;  %718 = vmatprep.subr.bf16.mxu1 %v702_v3  ;;  %v659_v9 = vld [vmem:[%s1030_s2] ss:$0 sm:$0xff]  ;;  %v710_v13 = vpack.c.bf16 %v358_v7, %v357_v6  ;;  %v855_v34 = vmov (!%p664_p7), 0.0  }
  0x32   : > { %p300_p5 = scmp.lt.s32.totalorder %s653_s8, 63  ;;  %705 = vmatpush3.bf16.msra.mxu0 %v702_v3  ;;  %722 = vmatpush3.bf16.msra.mxu1 %v702_v3  ;;  %v360_v18 = vld [vmem:[#allocation4 + $0x38] sm:$0xff]  ;;  %467 = vst [vmem:[#allocation2] sm:$0x1] (!%p664_p7), %v855_v34  ;;  %468 = vst [vmem:[#allocation3] sm:$0x1] (!%p664_p7), %v855_v34 }
  0x33   : > { %707 = vmatprep.subr.bf16.mxu0 %v706_v5  ;;  %719 = vmatprep.subr.bf16.mxu1 %v706_v5  ;;  %v714_v23 = vpack.c.bf16 %v360_v18, %v359_v17 }
  0x34   : > { %s1056_s8 = smov (!%p300_p5, %s653_s8), 63 }
  0x35   : > { %s654_s14 = sshll.u32 %s1056_s8, 3 }
  0x36   : > { %s303_s19 = scalar_lea.vmem %s1028_s0, %s654_s14  ;;  %709 = vmatpush3.bf16.msra.mxu0 %v706_v5  ;;  %723 = vmatpush3.bf16.msra.mxu1 %v706_v5  ;;  %s313_s29 = scalar_lea.vmem %s1032_s4, %s654_s14 }
  0x37   : > { %v323_v10 = vld [vmem:[%s303_s19] sm:$0xff]  ;;  %v325_v11 = vld [vmem:[%s303_s19 + $0x10] sm:$0xff]  ;;  %v324_v12 = vld [vmem:[%s303_s19 + $0x8] sm:$0xff]  ;;  %711 = vmatprep.subr.bf16.mxu0 %v710_v13  ;;  %720 = vmatprep.subr.bf16.mxu1 %v710_v13 }
  0x38   : > { %v334_v14 = vmul.f32 %v658_v8, %v323_v10  ;;  %v336_v15 = vmul.f32 %v658_v8, %v325_v11  ;;  %v326_v16 = vld [vmem:[%s303_s19 + $0x18] sm:$0xff]  ;;  %v335_v21 = vmul.f32 %v658_v8, %v324_v12 }
  0x39   : > { %v337_v22 = vmul.f32 %v658_v8, %v326_v16 }
  0x3a   : > { %v345_v19 = vadd.f32 %v659_v9, %v334_v14  ;;  %v347_v20 = vadd.f32 %v659_v9, %v336_v15  ;;  %v346_v26 = vadd.f32 %v659_v9, %v335_v21  ;;  %713 = vmatpush3.bf16.msra.mxu0 %v710_v13  ;;  %724 = vmatpush3.bf16.msra.mxu1 %v710_v13 }
  0x3b   : > { %v348_v27 = vadd.f32 %v659_v9, %v337_v22  ;;  %715 = vmatprep.subr.bf16.mxu0 %v714_v23  ;;  %721 = vmatprep.subr.bf16.mxu1 %v714_v23 }
  0x3c   : > { %v349_v24 = vmax.f32 %v345_v19, 0.0  ;;  %v351_v25 = vmax.f32 %v347_v20, 0.0  ;;  %v350_v28 = vmax.f32 %v346_v26, 0.0 }
  0x3d   : > { %v352_v29 = vmax.f32 %v348_v27, 0.0 }
  0x3e   : > { %696 = vmatprep.mubr.msk.f32.mxu0 %vm361_vm0, %v349_v24  ;;  %699 = vmatprep.mubr.msk.f32.mxu1 %vm361_vm0, %v351_v25 }
  0x3f   : > { %717 = vmatpush3.bf16.msra.mxu0 %v714_v23  ;;  %725 = vmatpush3.bf16.msra.mxu1 %v714_v23 }
  0x42   : > { %697 = vmatmul.mubr.msk.f32.vlgmr.msra.gmra.mrb[0].mxu0 %vm361_vm0, %v350_v28  ;;  %700 = vmatmul.mubr.msk.f32.vlgmr.msra.gmra.mrb[0].mxu1 %vm361_vm0, %v352_v29 }
 0x111   : > { %466 = sbr.rel (%p664_p7) target bundleno = 280 (0x118), region = 44 }
 0x115   : > { %v698_v30 = vpop.f32.mrb[0].mxu0  ;;  %v701_v31 = vpop.f32.mrb[0].mxu1 }
 0x116   : > { %460 = vst [vmem:[%s313_s29 + $0x8] sm:$0xff] %v698_v30  ;;  %462 = vst [vmem:[%s313_s29 + $0x18] sm:$0xff] %v701_v31  ;;  %v440_v32 = vpop.f32.mrb[1].mxu0  ;;  %v450_v33 = vpop.f32.mrb[1].mxu1 }
 0x117   : > { %459 = vst [vmem:[%s313_s29] sm:$0xff] %v440_v32  ;;  %461 = vst [vmem:[%s313_s29 + $0x10] sm:$0xff] %v450_v33 }
 0x118 PF: > { %v470_v35 = vadd.f32 %v698_v30, %v440_v32  ;;  %v482_v36 = vmul.f32 %v440_v32, %v440_v32  ;;  %v483_v37 = vmul.f32 %v698_v30, %v698_v30  ;;  %v484_v38 = vmul.f32 %v450_v33, %v450_v33  ;;  %v469_v54 = vld [vmem:[#allocation2] sm:$0x1]  ;;  %v481_v57 = vld [vmem:[#allocation3] sm:$0x1]  ;;  %p665_p9 = scmp.ne.s32.totalorder %s834_s21, 1 }
 0x119   : > { %v485_v40 = vmul.f32 %v701_v31, %v701_v31 }
 0x11a   : > { %v471_v39 = vadd.f32 %v470_v35, %v450_v33  ;;  %v486_v41 = vadd.f32 %v483_v37, %v482_v36 }
 0x11c   : > { %v472_v42 = vadd.f32 %v701_v31, %v471_v39  ;;  %v487_v43 = vadd.f32 %v486_v41, %v484_v38 }
 0x11e   : > { %v473_v44 = vrot.slane %v472_v42, 4  ;;  %v488_v45 = vadd.f32 %v487_v43, %v485_v40 }
 0x120   : > { %v474_v46 = vadd.f32 %v473_v44, %v472_v42  ;;  %v489_v47 = vrot.slane %v488_v45, 4 }
 0x122   : > { %v475_v48 = vrot.slane %v474_v46, 2  ;;  %v490_v49 = vadd.f32 %v489_v47, %v488_v45 }
 0x124   : > { %v476_v50 = vadd.f32 %v475_v48, %v474_v46  ;;  %v491_v51 = vrot.slane %v490_v49, 2 }
 0x126   : > { %v477_v52 = vrot.slane %v476_v50, 1  ;;  %v492_v53 = vadd.f32 %v491_v51, %v490_v49 }
 0x128   : > { %v478_v55 = vadd.f32 %v477_v52, %v476_v50  ;;  %v493_v56 = vrot.slane %v492_v53, 1  ;;  %500 = sbr.rel (%p665_p9) target bundleno = 311 (0x137), region = 48 }
 0x12a   : > { %v479_v58 = vadd.f32 %v478_v55, %v469_v54  ;;  %v494_v59 = vadd.f32 %v493_v56, %v492_v53 }
 0x12c   : > { %480 = vst [vmem:[#allocation2] sm:$0x1] %v479_v58  ;;  %v495_v60 = vadd.f32 %v494_v59, %v481_v57 }
 0x12e   : > { %496 = vst [vmem:[#allocation3] sm:$0x1] %v495_v60 }
 0x133   : > { %v501_v61 = vld [vmem:[#allocation2] sm:$0x1] }
 0x134   : > { %502 = vst [vmem:[%s319_s11] sm:$0x1] %v501_v61 }
 0x135   : > { %v503_v62 = vld [vmem:[#allocation3] sm:$0x1] }
 0x136   : > { %504 = vst [vmem:[%s322_s30] sm:$0x1] %v503_v62 }
 0x137 PF: > { %s18_s25 = sadd.s32 1, %s850_s25   ;;  %s1043_s21 = smov %s842_s23 }
 0x138   : > { %p15_p11 = scmp.ge.s32.totalorder %s18_s25, 18   ;;  %s1044_s22 = smov %s846_s24 }
 0x139   : > { %s1045_s23 = smov %s1048_s27  ;;  %s1046_s24 = smov %s1052_s28 }
 0x13a   :  { %17 = sbr.rel (!%p15_p11) target bundleno = 3 (0x3), region = 103 }
 0x141   :  { %557 = vsyncpa [#allocation5], 1 }
 0x142   :  { %559 = vsyncpa [#allocation5 + $0x1], 1 }

// kernel: tnet_forward.6
= control target key start
LH: loop header
LB: loop body
LE: loop exit
PB: predicated region body
PF: predicated region fallthrough
CT: control target
= control target key end

     0   :  { %13 = vsyncpa [#allocation7], 0  ;;  %s1947_s24 = smov 0   ;;  %s1949_s25 = smov 0   ;;  %s2412_s0 = inlined_call_operand.vmem [shape: f32[512,128], index: 0, kind: input, shape index: {}]   ;;  %s2413_s1 = inlined_call_operand.vmem [shape: f32[1,128], index: 1, kind: input, shape index: {}]   ;;  %s2414_s2 = inlined_call_operand.vmem [shape: f32[1,128], index: 2, kind: input, shape index: {}]   ;;  %s2415_s3 = inlined_call_operand.hbm [shape: f32[128,1024], index: 3, kind: input, shape index: {}]   ;;  %s2416_s4 = inlined_call_operand.vmem [shape: f32[8,1,1024], index: 4, kind: output, shape index: {0}]   ;;  %s2417_s5 = inlined_call_operand.vmem [shape: f32[8,1,1024], index: 5, kind: output, shape index: {1}]   ;;  %s2418_s6 = inlined_call_operand.vmem [shape: f32[8,1,1024], index: 6, kind: output, shape index: {2}]   ;;  %s2419_s7 = inlined_call_operand.vmem [shape: f32[8,1,1024], index: 7, kind: output, shape index: {3}]  }
   0x1   :  { %s1951_s26 = smov 0   ;;  %s1953_s27 = smov 0  }
   0x2   :  { %s1955_s28 = smov 0  }
   0x3 LB: > { %s1619_s29 = sadd.s32 4294967295, %s1897_s28   ;;  %s28_s30 = sadd.s32 1, %s1889_s26  ;;  %s1897_s28 = sphi %s1955_s28, %s19_s28   ;;  %s1893_s27 = sphi %s1953_s27, %s2528_s27   ;;  %s1889_s26 = sphi %s1951_s26, %s2527_s26   ;;  %s1885_s25 = sphi %s1949_s25, %s2526_s25   ;;  %s1881_s24 = sphi %s1947_s24, %s2525_s24  }
   0x4   : > { %p29_p0 = scmp.ge.s32.totalorder %s28_s30, 2  ;;  %s31_s8 = sadd.s32 1, %s1893_s27 }
   0x5   : > { %p1623_p1 = scmp.ge.s32.totalorder %s1897_s28, 1  ;;  %p233_p2 = scmp.lt.s32.totalorder %s1897_s28, 17 }
   0x6   : > { %s2530_s30 = smov (%p29_p0, %s28_s30), 0  ;;  %s2532_s8 = smov (!%p29_p0, %s31_s8), %s1893_s27 }
   0x7   : > { %p1980_p3 = pnand %p1623_p1, %p233_p2  ;;  %p33_p4 = scmp.ge.s32.totalorder %s2532_s8, 8 }
   0x8   : > { %p1984_p5 = scmp.eq.s32.totalorder %s1619_s29, 0  ;;  %s1899_s11 = smov [#allocation6]  }
   0x9   : > { %s2469_s9 = scalar_select %p1980_p3, 1, 0 }
   0xa   : > { %s2470_s10 = scalar_select %p1984_p5, 1, 0 }
   0xb   : > { %p1773_p6 = pneg %p1980_p3  ;;  %s2534_s8 = smov (%p33_p4, %s2532_s8), 0 }
   0xc   : > { %s251_s12 = sshll.u32 %s1899_s11, 4  ;;  %s1827_s16 = scalar_lea.hbm %s2415_s3, 16384  ;;  %s252_s12 = int_to_ptr.vmem [resolvable:$true] %s251_s12 }
   0xd   : > { %p1994_p7 = pnand %p1984_p5, %p1773_p6  ;;  %p1828_p8 = scmp.ne.s32.totalorder %s2415_s3, %s1827_s16 }
   0xe   : > { %p1834_p12 = scmp.lt.u32.totalorder %s1827_s16, %s2415_s3 }
   0xf   : > { %p1829_p9 = pneg %p1994_p7 }
  0x11   : > { %p1830_p10 = pnand %p1829_p9, %p1828_p8 }
  0x13   : > { %p1831_p11 = pneg %p1830_p10 }
  0x15   : > { %p1836_p13 = pnand %p1834_p12, %p1831_p11 }
  0x17   : > { %1839 = shalt.err (!%p1836_p13)
}
  0x18   : > { %s1840_s21 = scalar_lea.vmem %s252_s12, 16384  ;;  %p1848_p4 = scmp.lt.s32.totalorder %s252_s12, %s252_s12 }
  0x19   : > { %p1841_p0 = scmp.ne.s32.totalorder %s252_s12, %s1840_s21  ;;  %p1849_p6 = scmp.lt.s32.totalorder %s1840_s21, %s1840_s21 }
  0x1b   : > { %p1843_p1 = pnand %p1841_p0, %p1829_p9  ;;  %p1850_p5 = por %p1849_p6, %p1848_p4 }
  0x1d   : > { %p1844_p2 = pneg %p1843_p1 }
  0x1f   : > { %p1851_p3 = pnand %p1850_p5, %p1844_p2 }
  0x21   : > { %1854 = shalt.err (!%p1851_p3)
}
  0x22   : > { %s1900_s22 = smov 1024   ;;  %s1901_s23 = smov 64  }
  0x23   : > { %1776 = dma.hbm_to_vmem [thread:$0]  (!%p1994_p7), %s2415_s3, 16384, %s252_s12, [#allocation7], %s1900_s22, %s1900_s22, %s1901_s23  }
  0x24   : > { %p2472_p8 = scmp.ne.s32.totalorder %s2469_s9, 0 }
  0x26   : > { %280 = sbr.rel (%p2472_p8) target bundleno = 465 (0x1d1), region = 36 }
  0x2d   : > { %p2473_p10 = scmp.ne.s32.totalorder %s2470_s10, 0 }
  0x2f   : > { %1876 = dma.done.wait (%p2473_p10), [#allocation7], 16384  }
  0x30   : > { %1878 = vsyncadd (%p2473_p10), [#allocation7], 4294950912  ;;  %p335_p3 = scmp.lt.s32.totalorder %s1885_s25, 7  ;;  %v1902_v0 = vmov 0.0   ;;  %s1628_s9 = sshll.u32 %s1885_s25, 1  ;;  %v382_v1 = vld [vmem:[#allocation6 + $0x8] sm:$0xff] }
  0x31   : > { %573 = vmatprep.mubr.f32.mxu0 %v1902_v0  ;;  %662 = vmatprep.mubr.f32.mxu1 %v1902_v0  ;;  %v390_v2 = vld [vmem:[#allocation6 + $0x48] sm:$0xff]  ;;  %v384_v3 = vld [vmem:[#allocation6 + $0x18] sm:$0xff]  ;;  %v381_v6 = vld [vmem:[#allocation6] sm:$0xff]  ;;  %p1637_p7 = scmp.ne.s32.totalorder %s1881_s24, 0 }
  0x32   : > { %s336_s12 = scalar_select %p335_p3, %s1885_s25, 7  ;;  %v1641_v4 = vpack.c.bf16 %v390_v2, %v382_v1  ;;  %v392_v5 = vld [vmem:[#allocation6 + $0x58] sm:$0xff]  ;;  %v389_v7 = vld [vmem:[#allocation6 + $0x40] sm:$0xff]  ;;  %v383_v10 = vld [vmem:[#allocation6 + $0x10] sm:$0xff] }
  0x33   : > { %s2044_s25 = sadd.s32 %s1881_s24, %s1628_s9  ;;  %v1673_v8 = vpack.c.bf16 %v392_v5, %v384_v3  ;;  %v1643_v9 = vpack.c.bf16 %v389_v7, %v381_v6  ;;  %v391_v11 = vld [vmem:[#allocation6 + $0x50] sm:$0xff]  ;;  %v398_v12 = vld [vmem:[#allocation6 + $0x88] sm:$0xff]  ;;  %v400_v15 = vld [vmem:[#allocation6 + $0x98] sm:$0xff] }
  0x34   : > { %s2024_s13 = sshll.u32 %s336_s12, 3  ;;  %1642 = vmatprep.subr.bf16.mxu0 %v1641_v4  ;;  %v1675_v13 = vpack.c.bf16 %v391_v11, %v383_v10  ;;  %v406_v14 = vld [vmem:[#allocation6 + $0xc8] sm:$0xff]  ;;  %v408_v16 = vld [vmem:[#allocation6 + $0xd8] sm:$0xff]  ;;  %v397_v19 = vld [vmem:[#allocation6 + $0x80] sm:$0xff]  ;;  %s1629_s11 = sshll.u32 %s2044_s25, 2 }
  0x35   : > { %s338_s15 = scalar_lea.vmem %s2416_s4, %s2024_s13  ;;  %s342_s18 = scalar_lea.vmem %s2417_s5, %s2024_s13  ;;  %1674 = vmatprep.subr.bf16.mxu1 %v1673_v8  ;;  %1644 = vmatpush1.bf16.msra.mxu0 %v1643_v9  ;;  %v1645_v17 = vpack.c.bf16 %v406_v14, %v398_v12  ;;  %v1677_v18 = vpack.c.bf16 %v408_v16, %v400_v15  ;;  %v405_v20 = vld [vmem:[#allocation6 + $0xc0] sm:$0xff]  ;;  %v399_v21 = vld [vmem:[#allocation6 + $0x90] sm:$0xff]  ;;  %v414_v24 = vld [vmem:[#allocation6 + $0x108] sm:$0xff] }
  0x36   : > { %s346_s21 = scalar_lea.vmem %s2418_s6, %s2024_s13  ;;  %s350_s29 = scalar_lea.vmem %s2419_s7, %s2024_s13  ;;  %1676 = vmatpush1.bf16.msra.mxu1 %v1675_v13  ;;  %v1647_v22 = vpack.c.bf16 %v405_v20, %v397_v19  ;;  %v407_v23 = vld [vmem:[#allocation6 + $0xd0] sm:$0xff]  ;;  %v422_v25 = vld [vmem:[#allocation6 + $0x148] sm:$0xff]  ;;  %v416_v28 = vld [vmem:[#allocation6 + $0x118] sm:$0xff] }
  0x37   : > { %1646 = vmatprep.subr.bf16.mxu0 %v1645_v17  ;;  %1678 = vmatprep.subr.bf16.mxu1 %v1677_v18  ;;  %v1679_v26 = vpack.c.bf16 %v407_v23, %v399_v21  ;;  %v1649_v27 = vpack.c.bf16 %v422_v25, %v414_v24  ;;  %v424_v29 = vld [vmem:[#allocation6 + $0x158] sm:$0xff]  ;;  %v413_v30 = vld [vmem:[#allocation6 + $0x100] sm:$0xff]  ;;  %v415_v33 = vld [vmem:[#allocation6 + $0x110] sm:$0xff]  ;;  %p2049_p5 = scmp.lt.s32.totalorder %s1629_s11, 63 }
  0x38   : > { %v1681_v31 = vpack.c.bf16 %v424_v29, %v416_v28  ;;  %v421_v32 = vld [vmem:[#allocation6 + $0x140] sm:$0xff]  ;;  %v423_v34 = vld [vmem:[#allocation6 + $0x150] sm:$0xff]  ;;  %v430_v36 = vld [vmem:[#allocation6 + $0x188] sm:$0xff] }
  0x39   : > { %1648 = vmatpush1.bf16.msra.mxu0 %v1647_v22  ;;  %v1651_v35 = vpack.c.bf16 %v421_v32, %v413_v30  ;;  %v438_v37 = vld [vmem:[#allocation6 + $0x1c8] sm:$0xff]  ;;  %v432_v38 = vld [vmem:[#allocation6 + $0x198] sm:$0xff]  ;;  %v1683_v39 = vpack.c.bf16 %v423_v34, %v415_v33  ;;  %v429_v42 = vld [vmem:[#allocation6 + $0x180] sm:$0xff]  ;;  %s2536_s11 = smov (!%p2049_p5, %s1629_s11), 63 }
  0x3a   : > { %1680 = vmatpush1.bf16.msra.mxu1 %v1679_v26  ;;  %1650 = vmatprep.subr.bf16.mxu0 %v1649_v27  ;;  %v1653_v40 = vpack.c.bf16 %v438_v37, %v430_v36  ;;  %v440_v41 = vld [vmem:[#allocation6 + $0x1d8] sm:$0xff]  ;;  %v437_v43 = vld [vmem:[#allocation6 + $0x1c0] sm:$0xff]  ;;  %v431_v45 = vld [vmem:[#allocation6 + $0x190] sm:$0xff]  ;;  %s1630_s9 = sshll.u32 %s2536_s11, 3 }
  0x3b   : > { %1682 = vmatprep.subr.bf16.mxu1 %v1681_v31  ;;  %v1685_v44 = vpack.c.bf16 %v440_v41, %v432_v38  ;;  %v439_v46 = vld [vmem:[#allocation6 + $0x1d0] sm:$0xff]  ;;  %v446_v47 = vld [vmem:[#allocation6 + $0x208] sm:$0xff]  ;;  %v448_v49 = vld [vmem:[#allocation6 + $0x218] sm:$0xff]  ;;  %v1655_v51 = vpack.c.bf16 %v437_v43, %v429_v42  ;;  %s2063_s16 = scalar_lea.vmem %s2412_s0, %s1630_s9 }
  0x3c   : > { %v454_v48 = vld [vmem:[#allocation6 + $0x248] sm:$0xff]  ;;  %v456_v50 = vld [vmem:[#allocation6 + $0x258] sm:$0xff]  ;;  %v1687_v52 = vpack.c.bf16 %v439_v46, %v431_v45  ;;  %v445_v54 = vld [vmem:[#allocation6 + $0x200] sm:$0xff] }
  0x3d   : > { %1652 = vmatpush1.bf16.msra.mxu0 %v1651_v35  ;;  %v1657_v53 = vpack.c.bf16 %v454_v48, %v446_v47  ;;  %v453_v55 = vld [vmem:[#allocation6 + $0x240] sm:$0xff]  ;;  %v447_v56 = vld [vmem:[#allocation6 + $0x210] sm:$0xff]  ;;  %v1689_v57 = vpack.c.bf16 %v456_v50, %v448_v49  ;;  %v462_v59 = vld [vmem:[#allocation6 + $0x288] sm:$0xff] }
  0x3e   : > { %1684 = vmatpush1.bf16.msra.mxu1 %v1683_v39  ;;  %1654 = vmatprep.subr.bf16.mxu0 %v1653_v40  ;;  %v455_v58 = vld [vmem:[#allocation6 + $0x250] sm:$0xff]  ;;  %v470_v60 = vld [vmem:[#allocation6 + $0x2c8] sm:$0xff]  ;;  %v464_v61 = vld [vmem:[#allocation6 + $0x298] sm:$0xff]  ;;  %v1659_v63 = vpack.c.bf16 %v453_v55, %v445_v54 }
  0x3f   : > { %1686 = vmatprep.subr.bf16.mxu1 %v1685_v44  ;;  %v472_v62 = vld [vmem:[#allocation6 + $0x2d8] sm:$0xff]  ;;  %v1691_v1 = vpack.c.bf16 %v455_v58, %v447_v56  ;;  %v1661_v2 = vpack.c.bf16 %v470_v60, %v462_v59  ;;  %v461_v3 = vld [vmem:[#allocation6 + $0x280] sm:$0xff]  ;;  %v463_v5 = vld [vmem:[#allocation6 + $0x290] sm:$0xff] }
  0x40   : > { %v469_v4 = vld [vmem:[#allocation6 + $0x2c0] sm:$0xff]  ;;  %v1693_v6 = vpack.c.bf16 %v472_v62, %v464_v61  ;;  %v471_v7 = vld [vmem:[#allocation6 + $0x2d0] sm:$0xff]  ;;  %v478_v8 = vld [vmem:[#allocation6 + $0x308] sm:$0xff] }
  0x41   : > { %1656 = vmatpush1.bf16.msra.mxu0 %v1655_v51  ;;  %v486_v9 = vld [vmem:[#allocation6 + $0x348] sm:$0xff]  ;;  %v480_v10 = vld [vmem:[#allocation6 + $0x318] sm:$0xff]  ;;  %v1663_v12 = vpack.c.bf16 %v469_v4, %v461_v3  ;;  %v477_v13 = vld [vmem:[#allocation6 + $0x300] sm:$0xff]  ;;  %v1695_v15 = vpack.c.bf16 %v471_v7, %v463_v5 }
  0x42   : > { %1688 = vmatpush1.bf16.msra.mxu1 %v1687_v52  ;;  %1658 = vmatprep.subr.bf16.mxu0 %v1657_v53  ;;  %v488_v11 = vld [vmem:[#allocation6 + $0x358] sm:$0xff]  ;;  %v485_v14 = vld [vmem:[#allocation6 + $0x340] sm:$0xff]  ;;  %v1665_v16 = vpack.c.bf16 %v486_v9, %v478_v8  ;;  %v479_v17 = vld [vmem:[#allocation6 + $0x310] sm:$0xff] }
  0x43   : > { %1690 = vmatprep.subr.bf16.mxu1 %v1689_v57  ;;  %v351_v18 = vld [vmem:[%s2063_s16] sm:$0xff]  ;;  %v1697_v20 = vpack.c.bf16 %v488_v11, %v480_v10  ;;  %v487_v21 = vld [vmem:[#allocation6 + $0x350] sm:$0xff]  ;;  %v494_v22 = vld [vmem:[#allocation6 + $0x388] sm:$0xff]  ;;  %v1667_v27 = vpack.c.bf16 %v485_v14, %v477_v13 }
  0x44   : > { %v2069_v19 = vld [vmem:[%s2413_s1] ss:$0 sm:$0xff]  ;;  %v502_v23 = vld [vmem:[#allocation6 + $0x3c8] sm:$0xff]  ;;  %v496_v24 = vld [vmem:[#allocation6 + $0x398] sm:$0xff]  ;;  %v1699_v29 = vpack.c.bf16 %v487_v21, %v479_v17 }
  0x45   : > { %1660 = vmatpush1.bf16.msra.mxu0 %v1659_v63  ;;  %v504_v25 = vld [vmem:[#allocation6 + $0x3d8] sm:$0xff]  ;;  %v362_v26 = vmul.f32 %v2069_v19, %v351_v18  ;;  %v2075_v28 = vld [vmem:[%s2414_s2] ss:$0 sm:$0xff]  ;;  %v1669_v30 = vpack.c.bf16 %v502_v23, %v494_v22  ;;  %v495_v33 = vld [vmem:[#allocation6 + $0x390] sm:$0xff] }
  0x46   : > { %1692 = vmatpush1.bf16.msra.mxu1 %v1691_v1  ;;  %1662 = vmatprep.subr.bf16.mxu0 %v1661_v2  ;;  %v493_v31 = vld [vmem:[#allocation6 + $0x380] sm:$0xff]  ;;  %v1701_v34 = vpack.c.bf16 %v504_v25, %v496_v24  ;;  %v503_v35 = vld [vmem:[#allocation6 + $0x3d0] sm:$0xff]  ;;  %v386_v36 = vld [vmem:[#allocation6 + $0x28] sm:$0xff] }
  0x47   : > { %1694 = vmatprep.subr.bf16.mxu1 %v1693_v6  ;;  %v501_v32 = vld [vmem:[#allocation6 + $0x3c0] sm:$0xff]  ;;  %v394_v37 = vld [vmem:[#allocation6 + $0x68] sm:$0xff]  ;;  %v373_v38 = vadd.f32 %v2075_v28, %v362_v26  ;;  %v388_v39 = vld [vmem:[#allocation6 + $0x38] sm:$0xff]  ;;  %v1703_v42 = vpack.c.bf16 %v503_v35, %v495_v33 }
  0x48   : > { %v396_v40 = vld [vmem:[#allocation6 + $0x78] sm:$0xff]  ;;  %v1671_v41 = vpack.c.bf16 %v501_v32, %v493_v31  ;;  %v1705_v43 = vpack.c.bf16 %v394_v37, %v386_v36  ;;  %v385_v44 = vld [vmem:[#allocation6 + $0x20] sm:$0xff]  ;;  %v387_v46 = vld [vmem:[#allocation6 + $0x30] sm:$0xff] }
  0x49   : > { %1664 = vmatpush1.bf16.msra.mxu0 %v1663_v12  ;;  %v393_v45 = vld [vmem:[#allocation6 + $0x60] sm:$0xff]  ;;  %v1737_v47 = vpack.c.bf16 %v396_v40, %v388_v39  ;;  %v395_v48 = vld [vmem:[#allocation6 + $0x70] sm:$0xff]  ;;  %v402_v49 = vld [vmem:[#allocation6 + $0xa8] sm:$0xff]  ;;  %v2078_v51 = vmax.f32 %v373_v38, 0.0 }
  0x4a   : > { %1696 = vmatpush1.bf16.msra.mxu1 %v1695_v15  ;;  %1666 = vmatprep.subr.bf16.mxu0 %v1665_v16  ;;  %v410_v50 = vld [vmem:[#allocation6 + $0xe8] sm:$0xff]  ;;  %v404_v52 = vld [vmem:[#allocation6 + $0xb8] sm:$0xff]  ;;  %v1707_v54 = vpack.c.bf16 %v393_v45, %v385_v44  ;;  %v1739_v55 = vpack.c.bf16 %v395_v48, %v387_v46  ;;  %v401_v57 = vld [vmem:[#allocation6 + $0xa0] sm:$0xff] }
  0x4b   : > { %1698 = vmatprep.subr.bf16.mxu1 %v1697_v20  ;;  %v412_v53 = vld [vmem:[#allocation6 + $0xf8] sm:$0xff]  ;;  %v1709_v56 = vpack.c.bf16 %v410_v50, %v402_v49  ;;  %v409_v58 = vld [vmem:[#allocation6 + $0xe0] sm:$0xff]  ;;  %v403_v59 = vld [vmem:[#allocation6 + $0xb0] sm:$0xff] }
  0x4c   : > { %v1741_v60 = vpack.c.bf16 %v412_v53, %v404_v52  ;;  %v411_v61 = vld [vmem:[#allocation6 + $0xf0] sm:$0xff]  ;;  %v418_v62 = vld [vmem:[#allocation6 + $0x128] sm:$0xff]  ;;  %v420_v1 = vld [vmem:[#allocation6 + $0x138] sm:$0xff]  ;;  %v1711_v4 = vpack.c.bf16 %v409_v58, %v401_v57 }
  0x4d   : > { %1668 = vmatpush1.bf16.msra.mxu0 %v1667_v27  ;;  %v426_v63 = vld [vmem:[#allocation6 + $0x168] sm:$0xff]  ;;  %v428_v2 = vld [vmem:[#allocation6 + $0x178] sm:$0xff]  ;;  %v417_v5 = vld [vmem:[#allocation6 + $0x120] sm:$0xff]  ;;  %v1743_v7 = vpack.c.bf16 %v411_v61, %v403_v59 }
  0x4e   : > { %1700 = vmatpush1.bf16.msra.mxu1 %v1699_v29  ;;  %1670 = vmatprep.subr.bf16.mxu0 %v1669_v30  ;;  %v352_v3 = vld [vmem:[%s2063_s16 + $0x8] sm:$0xff]  ;;  %v1713_v8 = vpack.c.bf16 %v426_v63, %v418_v62  ;;  %v425_v9 = vld [vmem:[#allocation6 + $0x160] sm:$0xff]  ;;  %v419_v10 = vld [vmem:[#allocation6 + $0x130] sm:$0xff]  ;;  %v1745_v12 = vpack.c.bf16 %v428_v2, %v420_v1 }
  0x4f   : > { %1702 = vmatprep.subr.bf16.mxu1 %v1701_v34  ;;  %v363_v6 = vmul.f32 %v2069_v19, %v352_v3  ;;  %v427_v11 = vld [vmem:[#allocation6 + $0x170] sm:$0xff]  ;;  %v434_v13 = vld [vmem:[#allocation6 + $0x1a8] sm:$0xff]  ;;  %v436_v17 = vld [vmem:[#allocation6 + $0x1b8] sm:$0xff]  ;;  %v1715_v21 = vpack.c.bf16 %v425_v9, %v417_v5 }
  0x50   : > { %v442_v14 = vld [vmem:[#allocation6 + $0x1e8] sm:$0xff]  ;;  %v353_v16 = vld [vmem:[%s2063_s16 + $0x10] sm:$0xff]  ;;  %v444_v18 = vld [vmem:[#allocation6 + $0x1f8] sm:$0xff]  ;;  %v1747_v24 = vpack.c.bf16 %v427_v11, %v419_v10 }
  0x51   : > { %1672 = vmatpush1.bf16.msra.mxu0 %v1671_v41  ;;  %v374_v15 = vadd.f32 %v2075_v28, %v363_v6  ;;  %v364_v20 = vmul.f32 %v2069_v19, %v353_v16  ;;  %v433_v22 = vld [vmem:[#allocation6 + $0x1a0] sm:$0xff]  ;;  %v1717_v25 = vpack.c.bf16 %v442_v14, %v434_v13  ;;  %v435_v27 = vld [vmem:[#allocation6 + $0x1b0] sm:$0xff]  ;;  %v354_v30 = vld [vmem:[%s2063_s16 + $0x18] sm:$0xff]  ;;  %v1749_v31 = vpack.c.bf16 %v444_v18, %v436_v17 }
  0x52   : > { %1704 = vmatpush1.bf16.msra.mxu1 %v1703_v42  ;;  %1706 = vmatprep.subr.bf16.mxu0 %v1705_v43  ;;  %v441_v26 = vld [vmem:[#allocation6 + $0x1e0] sm:$0xff]  ;;  %v443_v32 = vld [vmem:[#allocation6 + $0x1f0] sm:$0xff]  ;;  %v450_v33 = vld [vmem:[#allocation6 + $0x228] sm:$0xff]  ;;  %v365_v35 = vmul.f32 %v2069_v19, %v354_v30 }
  0x53   : > { %1738 = vmatprep.subr.bf16.mxu1 %v1737_v47  ;;  %v2089_v23 = vmax.f32 %v374_v15, 0.0  ;;  %v375_v29 = vadd.f32 %v2075_v28, %v364_v20  ;;  %v458_v34 = vld [vmem:[#allocation6 + $0x268] sm:$0xff]  ;;  %v452_v36 = vld [vmem:[#allocation6 + $0x238] sm:$0xff]  ;;  %v1719_v39 = vpack.c.bf16 %v441_v26, %v433_v22  ;;  %v1751_v41 = vpack.c.bf16 %v443_v32, %v435_v27  ;;  %v449_v43 = vld [vmem:[#allocation6 + $0x220] sm:$0xff] }
  0x54   : > { %574 = vmatmul.mubr.f32.vlgmr.msra.gmra.mrb[0].mxu0 %v2078_v51  ;;  %v460_v37 = vld [vmem:[#allocation6 + $0x278] sm:$0xff]  ;;  %v376_v40 = vadd.f32 %v2075_v28, %v365_v35  ;;  %v1721_v42 = vpack.c.bf16 %v458_v34, %v450_v33  ;;  %v457_v19 = vld [vmem:[#allocation6 + $0x260] sm:$0xff]  ;;  %v451_v44 = vld [vmem:[#allocation6 + $0x230] sm:$0xff] }
  0x55   : > { %663 = vmatmul.mubr.f32.vlgmr.msra.gmra.mrb[0].mxu1 %v2078_v51  ;;  %1708 = vmatpush1.bf16.msra.mxu0 %v1707_v54  ;;  %v2097_v38 = vmax.f32 %v375_v29, 0.0  ;;  %v1753_v45 = vpack.c.bf16 %v460_v37, %v452_v36  ;;  %v459_v46 = vld [vmem:[#allocation6 + $0x270] sm:$0xff]  ;;  %v466_v47 = vld [vmem:[#allocation6 + $0x2a8] sm:$0xff]  ;;  %v468_v50 = vld [vmem:[#allocation6 + $0x2b8] sm:$0xff]  ;;  %v1723_v28 = vpack.c.bf16 %v457_v19, %v449_v43 }
  0x56   : > { %1740 = vmatpush1.bf16.msra.mxu1 %v1739_v55  ;;  %1710 = vmatprep.subr.bf16.mxu0 %v1709_v56  ;;  %v474_v48 = vld [vmem:[#allocation6 + $0x2e8] sm:$0xff]  ;;  %v2102_v49 = vmax.f32 %v376_v40, 0.0  ;;  %v476_v52 = vld [vmem:[#allocation6 + $0x2f8] sm:$0xff]  ;;  %v1755_v53 = vpack.c.bf16 %v459_v46, %v451_v44  ;;  %v465_v55 = vld [vmem:[#allocation6 + $0x2a0] sm:$0xff] }
  0x57   : > { %1742 = vmatprep.subr.bf16.mxu1 %v1741_v60  ;;  %579 = vmatprep.mubr.f32.mxu0 %v1902_v0  ;;  %v1725_v54 = vpack.c.bf16 %v474_v48, %v466_v47  ;;  %v473_v56 = vld [vmem:[#allocation6 + $0x2e0] sm:$0xff]  ;;  %v467_v57 = vld [vmem:[#allocation6 + $0x2b0] sm:$0xff]  ;;  %v1757_v58 = vpack.c.bf16 %v476_v52, %v468_v50  ;;  %v482_v60 = vld [vmem:[#allocation6 + $0x328] sm:$0xff] }
  0x58   : > { %668 = vmatprep.mubr.f32.mxu1 %v1902_v0  ;;  %580 = vmatmul.mubr.f32.gmra.mrb[2].mxu0 %v2089_v23  ;;  %v475_v59 = vld [vmem:[#allocation6 + $0x2f0] sm:$0xff]  ;;  %v490_v61 = vld [vmem:[#allocation6 + $0x368] sm:$0xff]  ;;  %v484_v62 = vld [vmem:[#allocation6 + $0x338] sm:$0xff]  ;;  %v1727_v1 = vpack.c.bf16 %v473_v56, %v465_v55  ;;  %v1904_v55 = vmov (!%p1637_p7), -inf   ;;  %v1905_v56 = vmov (!%p1637_p7), inf  }
  0x59   : > { %1712 = vmatpush1.bf16.msra.mxu0 %v1711_v4  ;;  %669 = vmatmul.mubr.f32.gmra.mrb[2].mxu1 %v2089_v23  ;;  %v492_v63 = vld [vmem:[#allocation6 + $0x378] sm:$0xff]  ;;  %v1759_v2 = vpack.c.bf16 %v475_v59, %v467_v57  ;;  %v1729_v3 = vpack.c.bf16 %v490_v61, %v482_v60  ;;  %v481_v4 = vld [vmem:[#allocation6 + $0x320] sm:$0xff]  ;;  %v483_v6 = vld [vmem:[#allocation6 + $0x330] sm:$0xff]  ;;  %871 = vst [vmem:[#allocation4] sm:$0xff] (!%p1637_p7), %v1904_v55 }
  0x5a   : > { %1744 = vmatpush1.bf16.msra.mxu1 %v1743_v7  ;;  %1714 = vmatprep.subr.bf16.mxu0 %v1713_v8  ;;  %v489_v5 = vld [vmem:[#allocation6 + $0x360] sm:$0xff]  ;;  %v1761_v7 = vpack.c.bf16 %v492_v63, %v484_v62  ;;  %v491_v8 = vld [vmem:[#allocation6 + $0x370] sm:$0xff]  ;;  %v498_v9 = vld [vmem:[#allocation6 + $0x3a8] sm:$0xff]  ;;  %872 = vst [vmem:[#allocation5] sm:$0xff] (!%p1637_p7), %v1905_v56 }
  0x5b   : > { %1746 = vmatprep.subr.bf16.mxu1 %v1745_v12  ;;  %585 = vmatprep.mubr.f32.mxu0 %v1902_v0  ;;  %v506_v10 = vld [vmem:[#allocation6 + $0x3e8] sm:$0xff]  ;;  %v500_v11 = vld [vmem:[#allocation6 + $0x3b8] sm:$0xff]  ;;  %v1731_v13 = vpack.c.bf16 %v489_v5, %v481_v4  ;;  %v1763_v14 = vpack.c.bf16 %v491_v8, %v483_v6  ;;  %v497_v16 = vld [vmem:[#allocation6 + $0x3a0] sm:$0xff] }
  0x5c   : > { %674 = vmatprep.mubr.f32.mxu1 %v1902_v0  ;;  %586 = vmatmul.mubr.f32.gmra.mrb[4].mxu0 %v2097_v38  ;;  %v508_v12 = vld [vmem:[#allocation6 + $0x3f8] sm:$0xff]  ;;  %v1733_v15 = vpack.c.bf16 %v506_v10, %v498_v9  ;;  %v505_v17 = vld [vmem:[#allocation6 + $0x3e0] sm:$0xff]  ;;  %v499_v20 = vld [vmem:[#allocation6 + $0x3b0] sm:$0xff] }
  0x5d   : > { %1716 = vmatpush1.bf16.msra.mxu0 %v1715_v21  ;;  %675 = vmatmul.mubr.f32.gmra.mrb[4].mxu1 %v2097_v38  ;;  %v1765_v18 = vpack.c.bf16 %v508_v12, %v500_v11  ;;  %v507_v21 = vld [vmem:[#allocation6 + $0x3f0] sm:$0xff]  ;;  %v1735_v22 = vpack.c.bf16 %v505_v17, %v497_v16 }
  0x5e   : > { %1748 = vmatpush1.bf16.msra.mxu1 %v1747_v24  ;;  %1718 = vmatprep.subr.bf16.mxu0 %v1717_v25  ;;  %v1767_v24 = vpack.c.bf16 %v507_v21, %v499_v20 }
  0x5f   : > { %1750 = vmatprep.subr.bf16.mxu1 %v1749_v31  ;;  %591 = vmatprep.mubr.f32.mxu0 %v1902_v0 }
  0x60   : > { %680 = vmatprep.mubr.f32.mxu1 %v1902_v0  ;;  %592 = vmatmul.mubr.f32.gmra.mrb[6].mxu0 %v2102_v49 }
  0x61   : > { %1720 = vmatpush1.bf16.msra.mxu0 %v1719_v39  ;;  %681 = vmatmul.mubr.f32.gmra.mrb[6].mxu1 %v2102_v49 }
  0x62   : > { %1752 = vmatpush1.bf16.msra.mxu1 %v1751_v41  ;;  %1722 = vmatprep.subr.bf16.mxu0 %v1721_v42 }
  0x63   : > { %1754 = vmatprep.subr.bf16.mxu1 %v1753_v45  ;;  %751 = vmatprep.mubr.f32.mxu0 %v1902_v0 }
  0x64   : > { %840 = vmatprep.mubr.f32.mxu1 %v1902_v0 }
  0x65   : > { %1724 = vmatpush1.bf16.msra.mxu0 %v1723_v28 }
  0x66   : > { %1756 = vmatpush1.bf16.msra.mxu1 %v1755_v53  ;;  %1726 = vmatprep.subr.bf16.mxu0 %v1725_v54  ;;  %v1903_v54 = vmov (!%p1637_p7), 0.0  }
  0x67   : > { %1758 = vmatprep.subr.bf16.mxu1 %v1757_v58  ;;  %869 = vst [vmem:[#allocation2] sm:$0xff] (!%p1637_p7), %v1903_v54  ;;  %870 = vst [vmem:[#allocation3] sm:$0xff] (!%p1637_p7), %v1903_v54 }
  0x69   : > { %1728 = vmatpush1.bf16.msra.mxu0 %v1727_v1 }
  0x6a   : > { %1760 = vmatpush1.bf16.msra.mxu1 %v1759_v2  ;;  %1730 = vmatprep.subr.bf16.mxu0 %v1729_v3 }
  0x6b   : > { %1762 = vmatprep.subr.bf16.mxu1 %v1761_v7 }
  0x6d   : > { %1732 = vmatpush1.bf16.msra.mxu0 %v1731_v13 }
  0x6e   : > { %1764 = vmatpush1.bf16.msra.mxu1 %v1763_v14  ;;  %1734 = vmatprep.subr.bf16.mxu0 %v1733_v15 }
  0x6f   : > { %1766 = vmatprep.subr.bf16.mxu1 %v1765_v18 }
  0x71   : > { %1736 = vmatpush1.bf16.msra.mxu0 %v1735_v22 }
  0x72   : > { %1768 = vmatpush1.bf16.msra.mxu1 %v1767_v24 }
  0x74   : > { %752 = vmatmul.mubr.f32.vlgmr.msra.gmra.mrb[8].mxu0 %v2078_v51 }
  0x75   : > { %841 = vmatmul.mubr.f32.vlgmr.msra.gmra.mrb[8].mxu1 %v2078_v51  ;;  %757 = vmatprep.mubr.f32.mxu0 %v1902_v0 }
  0x76   : > { %846 = vmatprep.mubr.f32.mxu1 %v1902_v0 }
  0x78   : > { %758 = vmatmul.mubr.f32.gmra.mrb[10].mxu0 %v2089_v23 }
  0x79   : > { %847 = vmatmul.mubr.f32.gmra.mrb[10].mxu1 %v2089_v23  ;;  %763 = vmatprep.mubr.f32.mxu0 %v1902_v0 }
  0x7a   : > { %852 = vmatprep.mubr.f32.mxu1 %v1902_v0 }
  0x7c   : > { %764 = vmatmul.mubr.f32.gmra.mrb[12].mxu0 %v2097_v38 }
  0x7d   : > { %853 = vmatmul.mubr.f32.gmra.mrb[12].mxu1 %v2097_v38  ;;  %769 = vmatprep.mubr.f32.mxu0 %v1902_v0 }
  0x7e   : > { %858 = vmatprep.mubr.f32.mxu1 %v1902_v0 }
  0x80   : > { %770 = vmatmul.mubr.f32.gmra.mrb[14].mxu0 %v2102_v49 }
  0x81   : > { %859 = vmatmul.mubr.f32.gmra.mrb[14].mxu1 %v2102_v49 }
 0x127   : > { %v2125_v51 = vpop.f32.mrb[0].mxu0 }
 0x128   : > { %v2127_v25 = vpop.f32.mrb[0].mxu1  ;;  %v2129_v23 = vpop.f32.mrb[1].mxu0 }
 0x129   : > { %v2131_v26 = vpop.f32.mrb[1].mxu1 }
 0x12b   : > { %v2133_v27 = vpop.f32.mrb[2].mxu0 }
 0x12c   : > { %v2135_v29 = vpop.f32.mrb[2].mxu1  ;;  %v2137_v30 = vpop.f32.mrb[3].mxu0 }
 0x12d   : > { %v2139_v31 = vpop.f32.mrb[3].mxu1 }
 0x12f   : > { %v2141_v0 = vpop.f32.mrb[4].mxu0 }
 0x130   : > { %v2143_v32 = vpop.f32.mrb[4].mxu1  ;;  %v2145_v33 = vpop.f32.mrb[5].mxu0 }
 0x131   : > { %2475 = vst [vmem:[#allocation9_spill] sm:$0xff] %v2143_v32  ;;  %2476 = vst [vmem:[#allocation10_spill] sm:$0xff] %v2145_v33  ;;  %v2147_v34 = vpop.f32.mrb[5].mxu1 }
 0x132   : > { %2477 = vst [vmem:[#allocation11_spill] sm:$0xff] %v2147_v34 }
 0x133   : > { %v2149_v35 = vpop.f32.mrb[6].mxu0 }
 0x134   : > { %2478 = vst [vmem:[#allocation12_spill] sm:$0xff] %v2149_v35  ;;  %v2151_v36 = vpop.f32.mrb[6].mxu1  ;;  %v2153_v37 = vpop.f32.mrb[7].mxu0 }
 0x135   : > { %2479 = vst [vmem:[#allocation13_spill] sm:$0xff] %v2151_v36  ;;  %2480 = vst [vmem:[#allocation14_spill] sm:$0xff] %v2153_v37  ;;  %v2155_v38 = vpop.f32.mrb[7].mxu1 }
 0x136   : > { %2481 = vst [vmem:[#allocation15_spill] sm:$0xff] %v2155_v38 }
 0x147   : > { %v2157_v39 = vpop.f32.mrb[8].mxu0 }
 0x148   : > { %2482 = vst [vmem:[#allocation16_spill] sm:$0xff] %v2157_v39  ;;  %v2159_v40 = vpop.f32.mrb[8].mxu1  ;;  %v2161_v41 = vpop.f32.mrb[9].mxu0 }
 0x149   : > { %2483 = vst [vmem:[#allocation17_spill] sm:$0xff] %v2159_v40  ;;  %2484 = vst [vmem:[#allocation18_spill] sm:$0xff] %v2161_v41  ;;  %v2163_v42 = vpop.f32.mrb[9].mxu1 }
 0x14a   : > { %2485 = vst [vmem:[#allocation19_spill] sm:$0xff] %v2163_v42 }
 0x14b   : > { %v2165_v43 = vpop.f32.mrb[10].mxu0 }
 0x14c   : > { %2486 = vst [vmem:[#allocation20_spill] sm:$0xff] %v2165_v43  ;;  %v2167_v19 = vpop.f32.mrb[10].mxu1  ;;  %v2169_v44 = vpop.f32.mrb[11].mxu0 }
 0x14d   : > { %2487 = vst [vmem:[#allocation21_spill] sm:$0xff] %v2167_v19  ;;  %2488 = vst [vmem:[#allocation22_spill] sm:$0xff] %v2169_v44  ;;  %v2171_v45 = vpop.f32.mrb[11].mxu1 }
 0x14e   : > { %2489 = vst [vmem:[#allocation23_spill] sm:$0xff] %v2171_v45 }
 0x14f   : > { %v2173_v46 = vpop.f32.mrb[12].mxu0 }
 0x150   : > { %2490 = vst [vmem:[#allocation24_spill] sm:$0xff] %v2173_v46  ;;  %v2175_v47 = vpop.f32.mrb[12].mxu1  ;;  %v2177_v48 = vpop.f32.mrb[13].mxu0  ;;  %868 = sbr.rel (%p1637_p7) target bundleno = 343 (0x157), region = 44 }
 0x151   : > { %2491 = vst [vmem:[#allocation25_spill] sm:$0xff] %v2175_v47  ;;  %2492 = vst [vmem:[#allocation26_spill] sm:$0xff] %v2177_v48  ;;  %v2179_v49 = vpop.f32.mrb[13].mxu1 }
 0x152   : > { %2493 = vst [vmem:[#allocation27_spill] sm:$0xff] %v2179_v49 }
 0x153   : > { %v2181_v50 = vpop.f32.mrb[14].mxu0 }
 0x154   : > { %2494 = vst [vmem:[#allocation28_spill] sm:$0xff] %v2181_v50  ;;  %v2183_v52 = vpop.f32.mrb[14].mxu1  ;;  %v2185_v28 = vpop.f32.mrb[15].mxu0 }
 0x155   : > { %2495 = vst [vmem:[#allocation29_spill] sm:$0xff] %v2183_v52  ;;  %2496 = vst [vmem:[#allocation30_spill] sm:$0xff] %v2185_v28  ;;  %v2187_v53 = vpop.f32.mrb[15].mxu1 }
 0x156   : > { %2497 = vst [vmem:[#allocation31_spill] sm:$0xff] %v2187_v53 }
 0x157 PF: > { %v874_v57 = vadd.f32 %v2133_v27, %v2125_v51  ;;  %v883_v58 = vadd.f32 %v2137_v30, %v2129_v23  ;;  %v892_v59 = vadd.f32 %v2135_v29, %v2127_v25  ;;  %v901_v60 = vadd.f32 %v2139_v31, %v2131_v26  ;;  %p1638_p9 = scmp.ne.s32.totalorder %s1881_s24, 1 }
 0x158   : > { %v910_v61 = vadd.f32 %v2165_v43, %v2157_v39  ;;  %v919_v62 = vadd.f32 %v2169_v44, %v2161_v41  ;;  %v928_v63 = vadd.f32 %v2167_v19, %v2159_v40  ;;  %v937_v1 = vadd.f32 %v2171_v45, %v2163_v42 }
 0x159   : > { %v875_v2 = vadd.f32 %v874_v57, %v2141_v0  ;;  %v884_v3 = vadd.f32 %v883_v58, %v2145_v33  ;;  %v893_v4 = vadd.f32 %v892_v59, %v2143_v32  ;;  %v902_v5 = vadd.f32 %v901_v60, %v2147_v34 }
 0x15a   : > { %v911_v6 = vadd.f32 %v910_v61, %v2173_v46  ;;  %v920_v7 = vadd.f32 %v919_v62, %v2177_v48  ;;  %v929_v8 = vadd.f32 %v928_v63, %v2175_v47  ;;  %v938_v9 = vadd.f32 %v937_v1, %v2179_v49 }
 0x15b   : > { %v876_v10 = vadd.f32 %v875_v2, %v2149_v35  ;;  %v885_v11 = vadd.f32 %v884_v3, %v2153_v37  ;;  %v894_v12 = vadd.f32 %v893_v4, %v2151_v36  ;;  %v903_v13 = vadd.f32 %v902_v5, %v2155_v38 }
 0x15c   : > { %v912_v14 = vadd.f32 %v911_v6, %v2181_v50  ;;  %v921_v15 = vadd.f32 %v920_v7, %v2185_v28  ;;  %v930_v16 = vadd.f32 %v929_v8, %v2183_v52  ;;  %v939_v17 = vadd.f32 %v938_v9, %v2187_v53 }
 0x15d   : > { %v877_v18 = vrot.slane %v876_v10, 4  ;;  %v886_v20 = vrot.slane %v885_v11, 4  ;;  %v895_v21 = vrot.slane %v894_v12, 4  ;;  %v904_v22 = vrot.slane %v903_v13, 4 }
 0x15e   : > { %v913_v24 = vrot.slane %v912_v14, 4  ;;  %v922_v54 = vrot.slane %v921_v15, 4  ;;  %v931_v55 = vrot.slane %v930_v16, 4  ;;  %v940_v56 = vrot.slane %v939_v17, 4 }
 0x15f   : > { %v878_v57 = vadd.f32 %v877_v18, %v876_v10  ;;  %v887_v58 = vadd.f32 %v886_v20, %v885_v11  ;;  %v896_v59 = vadd.f32 %v895_v21, %v894_v12  ;;  %v905_v60 = vadd.f32 %v904_v22, %v903_v13 }
 0x160   : > { %v914_v61 = vadd.f32 %v913_v24, %v912_v14  ;;  %v923_v62 = vadd.f32 %v922_v54, %v921_v15  ;;  %v932_v63 = vadd.f32 %v931_v55, %v930_v16  ;;  %v941_v1 = vadd.f32 %v940_v56, %v939_v17 }
 0x161   : > { %v879_v2 = vrot.slane %v878_v57, 2  ;;  %v888_v3 = vrot.slane %v887_v58, 2  ;;  %v897_v4 = vrot.slane %v896_v59, 2  ;;  %v906_v5 = vrot.slane %v905_v60, 2 }
 0x162   : > { %v915_v6 = vrot.slane %v914_v61, 2  ;;  %v924_v7 = vrot.slane %v923_v62, 2  ;;  %v933_v8 = vrot.slane %v932_v63, 2  ;;  %v942_v9 = vrot.slane %v941_v1, 2 }
 0x163   : > { %v880_v53 = vadd.f32 %v879_v2, %v878_v57  ;;  %v889_v52 = vadd.f32 %v888_v3, %v887_v58  ;;  %v898_v28 = vadd.f32 %v897_v4, %v896_v59  ;;  %v907_v50 = vadd.f32 %v906_v5, %v905_v60 }
 0x164   : > { %v916_v10 = vadd.f32 %v915_v6, %v914_v61  ;;  %v925_v11 = vadd.f32 %v924_v7, %v923_v62  ;;  %v934_v12 = vadd.f32 %v933_v8, %v932_v63  ;;  %v943_v13 = vadd.f32 %v942_v9, %v941_v1 }
 0x165   : > { %v881_v14 = vrot.slane %v880_v53, 1  ;;  %v890_v15 = vrot.slane %v889_v52, 1  ;;  %v899_v16 = vrot.slane %v898_v28, 1  ;;  %v908_v17 = vrot.slane %v907_v50, 1 }
 0x166   : > { %v917_v18 = vrot.slane %v916_v10, 1  ;;  %v926_v20 = vrot.slane %v925_v11, 1  ;;  %v935_v21 = vrot.slane %v934_v12, 1  ;;  %v944_v22 = vrot.slane %v943_v13, 1 }
 0x167   : > { %v882_v24 = vadd.f32 %v881_v14, %v880_v53  ;;  %v891_v54 = vadd.f32 %v890_v15, %v889_v52  ;;  %v900_v55 = vadd.f32 %v899_v16, %v898_v28  ;;  %v909_v56 = vadd.f32 %v908_v17, %v907_v50 }
 0x168   : > { %v918_v57 = vadd.f32 %v917_v18, %v916_v10  ;;  %v927_v58 = vadd.f32 %v926_v20, %v925_v11  ;;  %v936_v59 = vadd.f32 %v935_v21, %v934_v12  ;;  %v945_v60 = vadd.f32 %v944_v22, %v943_v13 }
 0x169   : > { %v954_v61 = vcombine.low %v882_v24, %v891_v54  ;;  %v955_v62 = vcombine.low %v900_v55, %v909_v56  ;;  %v961_v63 = vlaneseq  ;;  %v1906_v3 = vmov 1966171168  }
 0x16a   : > { %v956_v1 = vcombine.low %v918_v57, %v927_v58  ;;  %v957_v2 = vcombine.low %v936_v59, %v945_v60  ;;  %v959_v4 = vunpack.c.l.s4 %v1906_v3  ;;  %v1007_v5 = vmul.f32 %v2125_v51, %v2125_v51 }
 0x16b   : > { %v962_v6 = vshrl.u32 %v961_v63, 7  ;;  %v1008_v52 = vmul.f32 %v2129_v23, %v2129_v23  ;;  %v1009_v50 = vmul.f32 %v2127_v25, %v2127_v25  ;;  %v1010_v28 = vmul.f32 %v2131_v26, %v2131_v26 }
 0x16c   : > { %v960_v53 = vunpack.c.0.s8 %v959_v4  ;;  %v1011_v7 = vmul.f32 %v2157_v39, %v2157_v39  ;;  %v1012_v8 = vmul.f32 %v2161_v41, %v2161_v41  ;;  %v1013_v9 = vmul.f32 %v2159_v40, %v2159_v40  ;;  %v2501_v40 = vld [vmem:[#allocation31_spill] sm:$0xff] }
 0x16d   : > { %v1014_v10 = vmul.f32 %v2163_v42, %v2163_v42  ;;  %v1015_v11 = vmul.f32 %v2133_v27, %v2133_v27  ;;  %v1016_v12 = vmul.f32 %v2137_v30, %v2137_v30  ;;  %v1017_v13 = vmul.f32 %v2135_v29, %v2135_v29  ;;  %v873_v42 = vld [vmem:[#allocation2] sm:$0xff] }
 0x16e   : > { %v2244_v14 = vsub.s32 %v960_v53, %v962_v6  ;;  %v1018_v15 = vmul.f32 %v2139_v31, %v2139_v31  ;;  %v1019_v16 = vmul.f32 %v2165_v43, %v2165_v43  ;;  %v1020_v17 = vmul.f32 %v2169_v44, %v2169_v44 }
 0x16f   : > { %v1021_v18 = vmul.f32 %v2167_v19, %v2167_v19  ;;  %v1022_v20 = vmul.f32 %v2171_v45, %v2171_v45  ;;  %v1023_v21 = vmul.f32 %v2141_v0, %v2141_v0  ;;  %v1024_v22 = vmul.f32 %v2145_v33, %v2145_v33  ;;  %v2500_v45 = vld [vmem:[#allocation29_spill] sm:$0xff] }
 0x170   : > { %v964_v24 = vrot.slane %v954_v61, %v2244_v14  ;;  %v971_v54 = vrot.slane %v955_v62, %v2244_v14  ;;  %v978_v55 = vrot.slane %v956_v1, %v2244_v14  ;;  %v985_v56 = vrot.slane %v957_v2, %v2244_v14 }
 0x171   : > { %v1025_v57 = vmul.f32 %v2143_v32, %v2143_v32  ;;  %v1026_v58 = vmul.f32 %v2147_v34, %v2147_v34  ;;  %v1027_v59 = vmul.f32 %v2173_v46, %v2173_v46  ;;  %v1028_v60 = vmul.f32 %v2177_v48, %v2177_v48 }
 0x172   : > { %v986_v63 = vcombine.low %v964_v24, %v971_v54  ;;  %v987_v61 = vcombine.low %v978_v55, %v985_v56  ;;  %v1029_v62 = vmul.f32 %v2175_v47, %v2175_v47  ;;  %v1030_v1 = vmul.f32 %v2179_v49, %v2179_v49  ;;  %v2498_v54 = vld [vmem:[#allocation28_spill] sm:$0xff]  ;;  %v2499_v56 = vld [vmem:[#allocation30_spill] sm:$0xff] }
 0x173   : > { %v1031_v2 = vmul.f32 %v2149_v35, %v2149_v35  ;;  %v1032_v3 = vmul.f32 %v2153_v37, %v2153_v37  ;;  %v1033_v4 = vmul.f32 %v2151_v36, %v2151_v36  ;;  %v1034_v6 = vmul.f32 %v2155_v38, %v2155_v38 }
 0x174   : > { %v994_v53 = vrot.slane %v986_v63, %v2244_v14  ;;  %v1001_v24 = vrot.slane %v987_v61, %v2244_v14  ;;  %v1035_v55 = vmul.f32 %v2498_v54, %v2498_v54  ;;  %v1036_v49 = vmul.f32 %v2499_v56, %v2499_v56 }
 0x175   : > { %v1037_v47 = vmul.f32 %v2500_v45, %v2500_v45  ;;  %v1038_v19 = vmul.f32 %v2501_v40, %v2501_v40  ;;  %v1039_v48 = vadd.f32 %v1015_v11, %v1007_v5  ;;  %v1048_v41 = vadd.f32 %v1016_v12, %v1008_v52 }
 0x176   : > { %v1002_v44 = vcombine.low %v994_v53, %v1001_v24  ;;  %v1057_v46 = vadd.f32 %v1017_v13, %v1009_v50  ;;  %v1066_v63 = vadd.f32 %v1018_v15, %v1010_v28  ;;  %v1075_v38 = vadd.f32 %v1019_v16, %v1011_v7 }
 0x177   : > { %v1040_v61 = vadd.f32 %v1039_v48, %v1023_v21  ;;  %v1049_v36 = vadd.f32 %v1048_v41, %v1024_v22  ;;  %v1084_v37 = vadd.f32 %v1020_v17, %v1012_v8  ;;  %v1093_v54 = vadd.f32 %v1021_v18, %v1013_v9 }
 0x178   : > { %v1004_v39 = vadd.f32 %v1002_v44, %v873_v42  ;;  %v1058_v43 = vadd.f32 %v1057_v46, %v1025_v57  ;;  %v1067_v56 = vadd.f32 %v1066_v63, %v1026_v58  ;;  %v1076_v34 = vadd.f32 %v1075_v38, %v1027_v59 }
 0x179   : > { %v1041_v35 = vadd.f32 %v1040_v61, %v1031_v2  ;;  %v1050_v32 = vadd.f32 %v1049_v36, %v1032_v3  ;;  %v1085_v45 = vadd.f32 %v1084_v37, %v1028_v60  ;;  %v1094_v33 = vadd.f32 %v1093_v54, %v1029_v62 }
 0x17a   : > { %1005 = vst [vmem:[#allocation2] sm:$0xff] %v1004_v39  ;;  %v1059_v40 = vadd.f32 %v1058_v43, %v1033_v4  ;;  %v1068_v5 = vadd.f32 %v1067_v56, %v1034_v6  ;;  %v1077_v52 = vadd.f32 %v1076_v34, %v1035_v55  ;;  %v1102_v11 = vadd.f32 %v1022_v20, %v1014_v10 }
 0x17b   : > { %v1042_v50 = vrot.slane %v1041_v35, 4  ;;  %v1051_v28 = vrot.slane %v1050_v32, 4  ;;  %v1086_v7 = vadd.f32 %v1085_v45, %v1036_v49  ;;  %v1095_v48 = vadd.f32 %v1094_v33, %v1037_v47 }
 0x17c   : > { %v1060_v41 = vrot.slane %v1059_v40, 4  ;;  %v1069_v8 = vrot.slane %v1068_v5, 4  ;;  %v1078_v9 = vrot.slane %v1077_v52, 4  ;;  %v1103_v42 = vadd.f32 %v1102_v11, %v1030_v1 }
 0x17d   : > { %v1043_v44 = vadd.f32 %v1042_v50, %v1041_v35  ;;  %v1052_v46 = vadd.f32 %v1051_v28, %v1050_v32  ;;  %v1087_v38 = vrot.slane %v1086_v7, 4  ;;  %v1096_v12 = vrot.slane %v1095_v48, 4 }
 0x17e   : > { %v1061_v36 = vadd.f32 %v1060_v41, %v1059_v40  ;;  %v1070_v37 = vadd.f32 %v1069_v8, %v1068_v5  ;;  %v1079_v13 = vadd.f32 %v1078_v9, %v1077_v52  ;;  %v1104_v39 = vadd.f32 %v1103_v42, %v1038_v19 }
 0x17f   : > { %v1044_v43 = vrot.slane %v1043_v44, 2  ;;  %v1053_v15 = vrot.slane %v1052_v46, 2  ;;  %v1088_v34 = vadd.f32 %v1087_v38, %v1086_v7  ;;  %v1097_v10 = vadd.f32 %v1096_v12, %v1095_v48  ;;  %v2503_v38 = vld [vmem:[#allocation9_spill] sm:$0xff] }
 0x180   : > { %v1062_v16 = vrot.slane %v1061_v36, 2  ;;  %v1071_v17 = vrot.slane %v1070_v37, 2  ;;  %v1080_v45 = vrot.slane %v1079_v13, 2  ;;  %v1105_v33 = vrot.slane %v1104_v39, 4 }
 0x181   : > { %v1045_v47 = vadd.f32 %v1044_v43, %v1043_v44  ;;  %v1054_v49 = vadd.f32 %v1053_v15, %v1052_v46  ;;  %v1089_v18 = vrot.slane %v1088_v34, 2  ;;  %v1098_v20 = vrot.slane %v1097_v10, 2  ;;  %v2502_v44 = vld [vmem:[#allocation10_spill] sm:$0xff]  ;;  %v2506_v15 = vld [vmem:[#allocation20_spill] sm:$0xff] }
 0x182   : > { %v1063_v35 = vadd.f32 %v1062_v16, %v1061_v36  ;;  %v1072_v32 = vadd.f32 %v1071_v17, %v1070_v37  ;;  %v1081_v21 = vadd.f32 %v1080_v45, %v1079_v13  ;;  %v1106_v22 = vadd.f32 %v1105_v33, %v1104_v39  ;;  %v2504_v37 = vld [vmem:[#allocation12_spill] sm:$0xff]  ;;  %v2505_v39 = vld [vmem:[#allocation11_spill] sm:$0xff]  ;;  %v2508_v45 = vld [vmem:[#allocation14_spill] sm:$0xff] }
 0x183   : > { %v1046_v40 = vrot.slane %v1045_v47, 1  ;;  %v1055_v57 = vrot.slane %v1054_v49, 1  ;;  %v1090_v58 = vadd.f32 %v1089_v18, %v1088_v34  ;;  %v1099_v19 = vadd.f32 %v1098_v20, %v1097_v10  ;;  %v2507_v34 = vld [vmem:[#allocation16_spill] sm:$0xff]  ;;  %v2510_v20 = vld [vmem:[#allocation15_spill] sm:$0xff] }
 0x184   : > { %v1064_v59 = vrot.slane %v1063_v35, 1  ;;  %v1073_v60 = vrot.slane %v1072_v32, 1  ;;  %v1082_v62 = vrot.slane %v1081_v21, 1  ;;  %v1107_v1 = vrot.slane %v1106_v22, 2 }
 0x185   : > { %v1047_v2 = vadd.f32 %v1046_v40, %v1045_v47  ;;  %v1056_v3 = vadd.f32 %v1055_v57, %v1054_v49  ;;  %v1091_v4 = vrot.slane %v1090_v58, 1  ;;  %v1100_v6 = vrot.slane %v1099_v19, 1  ;;  %v2509_v47 = vld [vmem:[#allocation13_spill] sm:$0xff]  ;;  %v2513_v40 = vld [vmem:[#allocation18_spill] sm:$0xff] }
 0x186   : > { %v1065_v53 = vadd.f32 %v1064_v59, %v1063_v35  ;;  %v1074_v24 = vadd.f32 %v1073_v60, %v1072_v32  ;;  %v1083_v54 = vadd.f32 %v1082_v62, %v1081_v21  ;;  %v1108_v55 = vadd.f32 %v1107_v1, %v1106_v22  ;;  %v2511_v32 = vld [vmem:[#allocation24_spill] sm:$0xff]  ;;  %v2512_v22 = vld [vmem:[#allocation22_spill] sm:$0xff] }
 0x187   : > { %v1092_v56 = vadd.f32 %v1091_v4, %v1090_v58  ;;  %v1101_v63 = vadd.f32 %v1100_v6, %v1099_v19  ;;  %v1119_v61 = vcombine.low %v1047_v2, %v1056_v3  ;;  %v1172_v5 = vmax.f32 %v2125_v51, %v2133_v27  ;;  %v2514_v2 = vld [vmem:[#allocation28_spill] sm:$0xff]  ;;  %v2515_v4 = vld [vmem:[#allocation26_spill] sm:$0xff] }
 0x188   : > { %v1109_v52 = vrot.slane %v1108_v55, 1  ;;  %v1120_v11 = vcombine.low %v1065_v53, %v1074_v24  ;;  %v1181_v50 = vmax.f32 %v2129_v23, %v2137_v30  ;;  %v1190_v28 = vmax.f32 %v2127_v25, %v2135_v29 }
 0x189   : > { %v1121_v7 = vcombine.low %v1083_v54, %v1092_v56  ;;  %v1129_v48 = vrot.slane %v1119_v61, %v2244_v14  ;;  %v1173_v41 = vmax.f32 %v1172_v5, %v2141_v0  ;;  %v1199_v8 = vmax.f32 %v2131_v26, %v2139_v31  ;;  %v2517_v56 = vld [vmem:[#allocation17_spill] sm:$0xff] }
 0x18a   : > { %v1110_v9 = vadd.f32 %v1109_v52, %v1108_v55  ;;  %v1136_v42 = vrot.slane %v1120_v11, %v2244_v14  ;;  %v1182_v46 = vmax.f32 %v1181_v50, %v2502_v44  ;;  %v1191_v12 = vmax.f32 %v1190_v28, %v2503_v38  ;;  %v2516_v55 = vld [vmem:[#allocation21_spill] sm:$0xff]  ;;  %v2518_v11 = vld [vmem:[#allocation30_spill] sm:$0xff] }
 0x18b   : > { %v1143_v36 = vrot.slane %v1121_v7, %v2244_v14  ;;  %v1174_v13 = vmax.f32 %v1173_v41, %v2504_v37  ;;  %v1200_v43 = vmax.f32 %v1199_v8, %v2505_v39  ;;  %v1208_v10 = vmax.f32 %v2507_v34, %v2506_v15  ;;  %v2519_v41 = vld [vmem:[#allocation25_spill] sm:$0xff] }
 0x18c   : > { %v1122_v16 = vcombine.low %v1101_v63, %v1110_v9  ;;  %v1151_v17 = vcombine.low %v1129_v48, %v1136_v42  ;;  %v1183_v33 = vmax.f32 %v1182_v46, %v2508_v45  ;;  %v1192_v49 = vmax.f32 %v1191_v12, %v2509_v47  ;;  %v1006_v9 = vld [vmem:[#allocation3] sm:$0xff] }
 0x18d   : > { %v1175_v18 = vrot.slane %v1174_v13, 4  ;;  %v1201_v35 = vmax.f32 %v1200_v43, %v2510_v20  ;;  %v1209_v21 = vmax.f32 %v1208_v10, %v2511_v32  ;;  %v1217_v57 = vmax.f32 %v2513_v40, %v2512_v22 }
 0x18e   : > { %v1150_v58 = vrot.slane %v1122_v16, %v2244_v14  ;;  %v1159_v19 = vrot.slane %v1151_v17, %v2244_v14  ;;  %v1184_v59 = vrot.slane %v1183_v33, 4  ;;  %v1193_v60 = vrot.slane %v1192_v49, 4  ;;  %v2520_v16 = vld [vmem:[#allocation29_spill] sm:$0xff] }
 0x18f   : > { %v1176_v62 = vmax.f32 %v1174_v13, %v1175_v18  ;;  %v1202_v1 = vrot.slane %v1201_v35, 4  ;;  %v1210_v3 = vmax.f32 %v1209_v21, %v2514_v2  ;;  %v1218_v6 = vmax.f32 %v1217_v57, %v2515_v4 }
 0x190   : > { %v1152_v53 = vcombine.low %v1143_v36, %v1150_v58  ;;  %v1185_v24 = vmax.f32 %v1183_v33, %v1184_v59  ;;  %v1194_v54 = vmax.f32 %v1192_v49, %v1193_v60  ;;  %v1226_v63 = vmax.f32 %v2517_v56, %v2516_v55 }
 0x191   : > { %v1177_v61 = vrot.slane %v1176_v62, 2  ;;  %v1203_v5 = vmax.f32 %v1201_v35, %v1202_v1  ;;  %v1211_v52 = vrot.slane %v1210_v3, 4  ;;  %v1219_v50 = vmax.f32 %v1218_v6, %v2518_v11 }
 0x192   : > { %v1166_v28 = vrot.slane %v1152_v53, %v2244_v14  ;;  %v1186_v7 = vrot.slane %v1185_v24, 2  ;;  %v1195_v48 = vrot.slane %v1194_v54, 2  ;;  %v1227_v8 = vmax.f32 %v1226_v63, %v2519_v41 }
 0x193   : > { %v1178_v42 = vmax.f32 %v1176_v62, %v1177_v61  ;;  %v1204_v46 = vrot.slane %v1203_v5, 2  ;;  %v1212_v12 = vmax.f32 %v1210_v3, %v1211_v52  ;;  %v1220_v36 = vrot.slane %v1219_v50, 4 }
 0x194   : > { %v1167_v13 = vcombine.low %v1159_v19, %v1166_v28  ;;  %v1187_v43 = vmax.f32 %v1185_v24, %v1186_v7  ;;  %v1196_v10 = vmax.f32 %v1194_v54, %v1195_v48  ;;  %v1228_v17 = vmax.f32 %v1227_v8, %v2520_v16  ;;  %v2521_v24 = vld [vmem:[#allocation23_spill] sm:$0xff] }
 0x195   : > { %v1179_v33 = vrot.slane %v1178_v42, 1  ;;  %v1205_v49 = vmax.f32 %v1203_v5, %v1204_v46  ;;  %v1213_v18 = vrot.slane %v1212_v12, 2  ;;  %v1221_v35 = vmax.f32 %v1219_v50, %v1220_v36  ;;  %v2522_v54 = vld [vmem:[#allocation19_spill] sm:$0xff] }
 0x196   : > { %v1169_v21 = vadd.f32 %v1167_v13, %v1006_v9  ;;  %v1188_v57 = vrot.slane %v1187_v43, 1  ;;  %v1197_v58 = vrot.slane %v1196_v10, 1  ;;  %v1229_v59 = vrot.slane %v1228_v17, 4  ;;  %v2523_v7 = vld [vmem:[#allocation27_spill] sm:$0xff] }
 0x197   : > { %v1180_v60 = vmax.f32 %v1178_v42, %v1179_v33  ;;  %v1206_v1 = vrot.slane %v1205_v49, 1  ;;  %v1214_v6 = vmax.f32 %v1212_v12, %v1213_v18  ;;  %v1222_v62 = vrot.slane %v1221_v35, 2  ;;  %v2524_v36 = vld [vmem:[#allocation31_spill] sm:$0xff] }
 0x198   : > { %1170 = vst [vmem:[#allocation3] sm:$0xff] %v1169_v21  ;;  %v1189_v3 = vmax.f32 %v1187_v43, %v1188_v57  ;;  %v1198_v53 = vmax.f32 %v1196_v10, %v1197_v58  ;;  %v1230_v19 = vmax.f32 %v1228_v17, %v1229_v59  ;;  %v1235_v63 = vmax.f32 %v2522_v54, %v2521_v24 }
 0x199   : > { %v1207_v61 = vmax.f32 %v1205_v49, %v1206_v1  ;;  %v1215_v52 = vrot.slane %v1214_v6, 1  ;;  %v1223_v5 = vmax.f32 %v1221_v35, %v1222_v62  ;;  %v1305_v50 = vmin.f32 %v2125_v51, %v2133_v27 }
 0x19a   : > { %v1231_v28 = vrot.slane %v1230_v19, 2  ;;  %v1236_v48 = vmax.f32 %v1235_v63, %v2523_v7  ;;  %v1314_v8 = vmin.f32 %v2129_v23, %v2137_v30  ;;  %v1252_v42 = vcombine.low %v1180_v60, %v1189_v3 }
 0x19b   : > { %v1224_v9 = vrot.slane %v1223_v5, 1  ;;  %v1306_v46 = vmin.f32 %v1305_v50, %v2141_v0  ;;  %v1216_v12 = vmax.f32 %v1214_v6, %v1215_v52  ;;  %v1253_v43 = vcombine.low %v1198_v53, %v1207_v61 }
 0x19c   : > { %v1237_v13 = vmax.f32 %v1236_v48, %v2524_v36  ;;  %v1315_v10 = vmin.f32 %v1314_v8, %v2502_v44  ;;  %v1232_v33 = vmax.f32 %v1230_v19, %v1231_v28  ;;  %v1323_v27 = vmin.f32 %v2127_v25, %v2135_v29 }
 0x19d   : > { %v1225_v17 = vmax.f32 %v1223_v5, %v1224_v9  ;;  %v1307_v51 = vmin.f32 %v1306_v46, %v2504_v37  ;;  %v1332_v30 = vmin.f32 %v2131_v26, %v2139_v31  ;;  %v1262_v0 = vrot.slane %v1252_v42, %v2244_v14 }
 0x19e   : > { %v1238_v49 = vrot.slane %v1237_v13, 4  ;;  %v1316_v23 = vmin.f32 %v1315_v10, %v2508_v45  ;;  %v1324_v35 = vmin.f32 %v1323_v27, %v2503_v38  ;;  %v1269_v44 = vrot.slane %v1253_v43, %v2244_v14 }
 0x19f   : > { %v1308_v18 = vrot.slane %v1307_v51, 4  ;;  %v1333_v37 = vmin.f32 %v1332_v30, %v2505_v39  ;;  %v1233_v58 = vrot.slane %v1232_v33, 1  ;;  %v1254_v59 = vcombine.low %v1216_v12, %v1225_v17 }
 0x1a0   : > { %v1239_v21 = vmax.f32 %v1237_v13, %v1238_v49  ;;  %v1317_v57 = vrot.slane %v1316_v23, 4  ;;  %v1325_v29 = vmin.f32 %v1324_v35, %v2509_v47  ;;  %v1341_v31 = vmin.f32 %v2507_v34, %v2506_v15 }
 0x1a1   : > { %v1309_v25 = vmin.f32 %v1307_v51, %v1308_v18  ;;  %v1334_v26 = vmin.f32 %v1333_v37, %v2510_v20  ;;  %v1350_v6 = vmin.f32 %v2513_v40, %v2512_v22  ;;  %v1359_v39 = vmin.f32 %v2517_v56, %v2516_v55 }
 0x1a2   : > { %v1240_v45 = vrot.slane %v1239_v21, 2  ;;  %v1318_v60 = vmin.f32 %v1316_v23, %v1317_v57  ;;  %v1326_v38 = vrot.slane %v1325_v29, 4  ;;  %v1342_v47 = vmin.f32 %v1341_v31, %v2511_v32 }
 0x1a3   : > { %v1310_v1 = vrot.slane %v1309_v25, 2  ;;  %v1335_v53 = vrot.slane %v1334_v26, 4  ;;  %v1234_v19 = vmax.f32 %v1232_v33, %v1233_v58  ;;  %v1351_v20 = vmin.f32 %v1350_v6, %v2515_v4  ;;  %v1171_v58 = vld [vmem:[#allocation4] sm:$0xff] }
 0x1a4   : > { %v1241_v62 = vmax.f32 %v1239_v21, %v1240_v45  ;;  %v1319_v3 = vrot.slane %v1318_v60, 2  ;;  %v1327_v63 = vmin.f32 %v1325_v29, %v1326_v38  ;;  %v1360_v61 = vmin.f32 %v1359_v39, %v2519_v41 }
 0x1a5   : > { %v1311_v34 = vmin.f32 %v1309_v25, %v1310_v1  ;;  %v1336_v52 = vmin.f32 %v1334_v26, %v1335_v53  ;;  %v1343_v5 = vmin.f32 %v1342_v47, %v2514_v2  ;;  %v1352_v55 = vmin.f32 %v1351_v20, %v2518_v11 }
 0x1a6   : > { %v1242_v15 = vrot.slane %v1241_v62, 1  ;;  %v1320_v22 = vmin.f32 %v1318_v60, %v1319_v3  ;;  %v1328_v40 = vrot.slane %v1327_v63, 2  ;;  %v1361_v56 = vmin.f32 %v1360_v61, %v2520_v16 }
 0x1a7   : > { %v1284_v28 = vcombine.low %v1262_v0, %v1269_v44  ;;  %v1337_v32 = vrot.slane %v1336_v52, 2  ;;  %v1344_v48 = vrot.slane %v1343_v5, 4  ;;  %v1276_v8 = vrot.slane %v1254_v59, %v2244_v14 }
 0x1a8   : > { %v1243_v50 = vmax.f32 %v1241_v62, %v1242_v15  ;;  %v1329_v4 = vmin.f32 %v1327_v63, %v1328_v40  ;;  %v1353_v9 = vrot.slane %v1352_v55, 4  ;;  %v1362_v41 = vrot.slane %v1361_v56, 4 }
 0x1a9   : > { %v1312_v46 = vrot.slane %v1311_v34, 1  ;;  %v1338_v12 = vmin.f32 %v1336_v52, %v1337_v32  ;;  %v1345_v13 = vmin.f32 %v1343_v5, %v1344_v48  ;;  %v1321_v2 = vrot.slane %v1320_v22, 1  ;;  %v1443_v32 = vld [vmem:[#allocation3] sm:$0xff] (!%p1638_p9) }
 0x1aa   : > { %v1255_v42 = vcombine.low %v1234_v19, %v1243_v50  ;;  %v1354_v43 = vmin.f32 %v1352_v55, %v1353_v9  ;;  %v1363_v10 = vmin.f32 %v1361_v56, %v1362_v41  ;;  %v1368_v11 = vmin.f32 %v2522_v54, %v2521_v24  ;;  %v1304_v55 = vld [vmem:[#allocation5] sm:$0xff]  ;;  %1444 = vst [vmem:[%s342_s18] sm:$0xff] (!%p1638_p9), %v1443_v32 }
 0x1ab   : > { %v1330_v17 = vrot.slane %v1329_v4, 1  ;;  %v1339_v33 = vrot.slane %v1338_v12, 1  ;;  %v1346_v51 = vrot.slane %v1345_v13, 2  ;;  %v1292_v0 = vrot.slane %v1284_v28, %v2244_v14  ;;  %v1441_v28 = vld [vmem:[#allocation2] sm:$0xff] (!%p1638_p9) }
 0x1ac   : > { %v1283_v16 = vrot.slane %v1255_v42, %v2244_v14  ;;  %v1355_v27 = vrot.slane %v1354_v43, 2  ;;  %v1364_v49 = vrot.slane %v1363_v10, 2  ;;  %v1369_v23 = vmin.f32 %v1368_v11, %v2523_v7  ;;  %1442 = vst [vmem:[%s338_s15] sm:$0xff] (!%p1638_p9), %v1441_v28 }
 0x1ad   : > { %v1347_v18 = vmin.f32 %v1345_v13, %v1346_v51  ;;  %v1313_v35 = vmin.f32 %v1311_v34, %v1312_v46  ;;  %v1322_v24 = vmin.f32 %v1320_v22, %v1321_v2  ;;  %v1331_v54 = vmin.f32 %v1329_v4, %v1330_v17 }
 0x1ae   : > { %v1285_v30 = vcombine.low %v1276_v8, %v1283_v16  ;;  %v1356_v21 = vmin.f32 %v1354_v43, %v1355_v27  ;;  %v1370_v44 = vmin.f32 %v1369_v23, %v2524_v36  ;;  %v1340_v37 = vmin.f32 %v1338_v12, %v1339_v33 }
 0x1af   : > { %v1348_v59 = vrot.slane %v1347_v18, 1  ;;  %v1365_v29 = vmin.f32 %v1363_v10, %v1364_v49  ;;  %v1385_v31 = vcombine.low %v1313_v35, %v1322_v24 }
 0x1b0   : > { %v1299_v57 = vrot.slane %v1285_v30, %v2244_v14  ;;  %v1357_v25 = vrot.slane %v1356_v21, 1  ;;  %v1371_v45 = vrot.slane %v1370_v44, 4  ;;  %v1386_v1 = vcombine.low %v1331_v54, %v1340_v37 }
 0x1b1   : > { %v1349_v38 = vmin.f32 %v1347_v18, %v1348_v59  ;;  %v1366_v39 = vrot.slane %v1365_v29, 1  ;;  %v1395_v3 = vrot.slane %v1385_v31, %v2244_v14 }
 0x1b2   : > { %v1300_v60 = vcombine.low %v1292_v0, %v1299_v57  ;;  %v1372_v7 = vmin.f32 %v1370_v44, %v1371_v45  ;;  %v1358_v6 = vmin.f32 %v1356_v21, %v1357_v25  ;;  %v1402_v63 = vrot.slane %v1386_v1, %v2244_v14 }
 0x1b3   : > { %v1367_v53 = vmin.f32 %v1365_v29, %v1366_v39 }
 0x1b4   : > { %v1302_v26 = vmax.f32 %v1171_v58, %v1300_v60  ;;  %v1373_v62 = vrot.slane %v1372_v7, 2  ;;  %v1387_v19 = vcombine.low %v1349_v38, %v1358_v6  ;;  %v1417_v34 = vcombine.low %v1395_v3, %v1402_v63 }
 0x1b6   : > { %1303 = vst [vmem:[#allocation4] sm:$0xff] %v1302_v26  ;;  %v1374_v36 = vmin.f32 %v1372_v7, %v1373_v62  ;;  %v1409_v15 = vrot.slane %v1387_v19, %v2244_v14  ;;  %v1425_v22 = vrot.slane %v1417_v34, %v2244_v14 }
 0x1b8   : > { %v1375_v47 = vrot.slane %v1374_v36, 1 }
 0x1ba   : > { %v1376_v20 = vmin.f32 %v1374_v36, %v1375_v47 }
 0x1bc   : > { %v1388_v61 = vcombine.low %v1367_v53, %v1376_v20 }
 0x1bd   : > { %v1445_v48 = vld [vmem:[#allocation4] sm:$0xff] (!%p1638_p9) }
 0x1be   : > { %v1416_v52 = vrot.slane %v1388_v61, %v2244_v14  ;;  %1446 = vst [vmem:[%s346_s21] sm:$0xff] (!%p1638_p9), %v1445_v48 }
 0x1c0   : > { %v1418_v5 = vcombine.low %v1409_v15, %v1416_v52 }
 0x1c2   : > { %v1432_v40 = vrot.slane %v1418_v5, %v2244_v14  ;;  %1440 = sbr.rel (%p1638_p9) target bundleno = 465 (0x1d1), region = 48 }
 0x1c4   : > { %v1433_v56 = vcombine.low %v1425_v22, %v1432_v40 }
 0x1c6   : > { %v1435_v50 = vmin.f32 %v1304_v55, %v1433_v56 }
 0x1c8   : > { %1436 = vst [vmem:[#allocation5] sm:$0xff] %v1435_v50 }
 0x1cf   : > { %v1447_v14 = vld [vmem:[#allocation5] sm:$0xff] }
 0x1d0   : > { %1448 = vst [vmem:[%s350_s29] sm:$0xff] %v1447_v14 }
 0x1d1 PF: > { %s19_s28 = sadd.s32 1, %s1897_s28   ;;  %s2525_s24 = smov %s1889_s26 }
 0x1d2   : > { %p16_p11 = scmp.ge.s32.totalorder %s19_s28, 18   ;;  %s2526_s25 = smov %s1893_s27 }
 0x1d3   : > { %s2527_s26 = smov %s2530_s30  ;;  %s2528_s27 = smov %s2534_s8 }
 0x1d4   :  { %18 = sbr.rel (!%p16_p11) target bundleno = 3 (0x3), region = 115 }
 0x1db   :  { %1510 = vsyncpa [#allocation7], 1 }
 0x1dc   :  { %1512 = vsyncpa [#allocation7 + $0x1], 1 }

// kernel: tnet_forward.7
= control target key start
LH: loop header
LB: loop body
LE: loop exit
PB: predicated region body
PF: predicated region fallthrough
CT: control target
= control target key end

     0   :  { %17 = vsyncpa [#allocation3], 0  ;;  %s3876_s0 = inlined_call_operand.vmem [shape: f32[8,1024], index: 0, kind: input, shape index: {}]   ;;  %s3877_s1 = inlined_call_operand.vmem [shape: f32[8,1024], index: 1, kind: input, shape index: {}]   ;;  %s3878_s2 = inlined_call_operand.vmem [shape: f32[1,1024], index: 2, kind: input, shape index: {}]   ;;  %s3879_s3 = inlined_call_operand.vmem [shape: f32[1,1024], index: 3, kind: input, shape index: {}]   ;;  %s3880_s4 = inlined_call_operand.hbm [shape: f32[1024,512], index: 4, kind: input, shape index: {}]   ;;  %s3881_s5 = inlined_call_operand.hbm [shape: f32[1,512], index: 5, kind: input, shape index: {}]   ;;  %s3882_s6 = inlined_call_operand.hbm [shape: f32[1,512], index: 6, kind: input, shape index: {}]   ;;  %s3883_s7 = inlined_call_operand.vmem [shape: f32[512,256], index: 7, kind: input, shape index: {}]   ;;  %s3884_s8 = inlined_call_operand.hbm [shape: f32[1,256], index: 8, kind: input, shape index: {}]   ;;  %s3885_s9 = inlined_call_operand.hbm [shape: f32[1,256], index: 9, kind: input, shape index: {}]   ;;  %s3886_s10 = inlined_call_operand.vmem [shape: f32[256,9], index: 10, kind: input, shape index: {}]   ;;  %s3887_s11 = inlined_call_operand.hbm [shape: f32[1,9], index: 11, kind: input, shape index: {}]   ;;  %s3888_s12 = inlined_call_operand.vmem [shape: f32[8,9], index: 12, kind: output, shape index: {}]  }
   0x1   :  { %18 = vsyncpa [#allocation5], 0 }
   0x2   :  { %19 = vsyncpa [#allocation8], 0 }
   0x3   :  { %20 = vsyncpa [#allocation11], 0  ;;  %s2947_s21 = smov [#allocation4]   ;;  %s2948_s23 = smov [#allocation7]  }
   0x4   :  { %s47_s22 = sshll.u32 %s2947_s21, 4  ;;  %s69_s24 = sshll.u32 %s2948_s23, 4  ;;  %s48_s22 = int_to_ptr.vmem [resolvable:$true] %s47_s22  ;;  %s70_s24 = int_to_ptr.vmem [resolvable:$true] %s69_s24 }
   0x5   :  { %s2807_s27 = scalar_lea.hbm %s3881_s5, 64 }
   0x6   :  { %p2808_p0 = scmp.ne.s32.totalorder %s3881_s5, %s2807_s27  ;;  %p2811_p1 = scmp.lt.u32.totalorder %s2807_s27, %s3881_s5 }
   0x8   :  { %p2813_p2 = pnand %p2811_p1, %p2808_p0 }
   0xa   :  { %2816 = shalt.err (!%p2813_p2)
}
   0xb   :  { %s2817_s14 = scalar_lea.vmem %s48_s22, 64  ;;  %p2822_p4 = scmp.lt.s32.totalorder %s48_s22, %s48_s22 }
   0xc   :  { %p2818_p3 = scmp.ne.s32.totalorder %s48_s22, %s2817_s14  ;;  %p2823_p5 = scmp.lt.s32.totalorder %s2817_s14, %s2817_s14 }
   0xe   :  { %p2824_p6 = por %p2823_p5, %p2822_p4 }
  0x10   :  { %p2825_p7 = pnand %p2824_p6, %p2818_p3 }
  0x12   :  { %2828 = shalt.err (!%p2825_p7)
}
  0x13   :  { %50 = dma.hbm_to_vmem [thread:$0]  %s3881_s5, 64, %s48_s22, [#allocation5]  }
  0x14   :  { %s2829_s19 = scalar_lea.hbm %s3884_s8, 32 }
  0x15   :  { %p2830_p8 = scmp.ne.s32.totalorder %s3884_s8, %s2829_s19  ;;  %p2833_p9 = scmp.lt.u32.totalorder %s2829_s19, %s3884_s8 }
  0x17   :  { %p2835_p10 = pnand %p2833_p9, %p2830_p8 }
  0x19   :  { %2838 = shalt.err (!%p2835_p10)
}
  0x1a   :  { %s2839_s26 = scalar_lea.vmem %s70_s24, 32  ;;  %p2844_p12 = scmp.lt.s32.totalorder %s70_s24, %s70_s24 }
  0x1b   :  { %p2840_p11 = scmp.ne.s32.totalorder %s70_s24, %s2839_s26  ;;  %p2845_p13 = scmp.lt.s32.totalorder %s2839_s26, %s2839_s26 }
  0x1d   :  { %p2846_p0 = por %p2845_p13, %p2844_p12 }
  0x1f   :  { %p2847_p1 = pnand %p2846_p0, %p2840_p11 }
  0x21   :  { %2850 = shalt.err (!%p2847_p1)
}
  0x22   :  { %72 = dma.hbm_to_vmem [thread:$0]  %s3884_s8, 32, %s70_s24, [#allocation8]  }
  0x23   :  { %s2949_s27 = smov [#allocation2]   ;;  %s2851_s13 = scalar_lea.hbm %s3880_s4, 65536 }
  0x24   :  { %s34_s28 = sshll.u32 %s2949_s27, 4  ;;  %p2852_p2 = scmp.ne.s32.totalorder %s3880_s4, %s2851_s13  ;;  %s35_s28 = int_to_ptr.vmem [resolvable:$true] %s34_s28 }
  0x25   :  { %p2855_p3 = scmp.lt.u32.totalorder %s2851_s13, %s3880_s4 }
  0x27   :  { %p2857_p4 = pnand %p2855_p3, %p2852_p2 }
  0x29   :  { %2860 = shalt.err (!%p2857_p4)
}
  0x2a   :  { %s2861_s18 = scalar_lea.vmem %s35_s28, 65536  ;;  %p2866_p6 = scmp.lt.s32.totalorder %s35_s28, %s35_s28 }
  0x2b   :  { %p2862_p5 = scmp.ne.s32.totalorder %s35_s28, %s2861_s18  ;;  %p2867_p7 = scmp.lt.s32.totalorder %s2861_s18, %s2861_s18 }
  0x2d   :  { %p2868_p8 = por %p2867_p7, %p2866_p6 }
  0x2f   :  { %p2869_p9 = pnand %p2868_p8, %p2862_p5 }
  0x31   :  { %2872 = shalt.err (!%p2869_p9)
}
  0x32   :  { %s2950_s8 = smov 512   ;;  %s2951_s24 = smov 32  }
  0x33   :  { %40 = dma.hbm_to_vmem [thread:$0]  %s3880_s4, 65536, %s35_s28, [#allocation3], %s2950_s8, %s2950_s8, %s2951_s24  }
  0x34   :  { %s2952_s21 = smov [#allocation6]   ;;  %s2953_s25 = smov [#allocation9]  }
  0x35   :  { %s57_s23 = sshll.u32 %s2952_s21, 4  ;;  %s79_s26 = sshll.u32 %s2953_s25, 4  ;;  %s58_s23 = int_to_ptr.vmem [resolvable:$true] %s57_s23  ;;  %s80_s26 = int_to_ptr.vmem [resolvable:$true] %s79_s26 }
  0x36   :  { %s2873_s27 = scalar_lea.hbm %s3882_s6, 64 }
  0x37   :  { %p2874_p10 = scmp.ne.s32.totalorder %s3882_s6, %s2873_s27  ;;  %p2877_p11 = scmp.lt.u32.totalorder %s2873_s27, %s3882_s6 }
  0x39   :  { %p2879_p12 = pnand %p2877_p11, %p2874_p10 }
  0x3b   :  { %2882 = shalt.err (!%p2879_p12)
}
  0x3c   :  { %s2883_s4 = scalar_lea.vmem %s58_s23, 64  ;;  %p2888_p0 = scmp.lt.s32.totalorder %s58_s23, %s58_s23 }
  0x3d   :  { %p2884_p13 = scmp.ne.s32.totalorder %s58_s23, %s2883_s4  ;;  %p2889_p1 = scmp.lt.s32.totalorder %s2883_s4, %s2883_s4 }
  0x3f   :  { %p2890_p2 = por %p2889_p1, %p2888_p0 }
  0x41   :  { %p2891_p3 = pnand %p2890_p2, %p2884_p13 }
  0x43   :  { %2894 = shalt.err (!%p2891_p3)
}
  0x44   :  { %60 = dma.hbm_to_vmem [thread:$0]  %s3882_s6, 64, %s58_s23, [#allocation5]  }
  0x45   :  { %s2895_s18 = scalar_lea.hbm %s3885_s9, 32 }
  0x46   :  { %p2896_p4 = scmp.ne.s32.totalorder %s3885_s9, %s2895_s18  ;;  %p2899_p5 = scmp.lt.u32.totalorder %s2895_s18, %s3885_s9 }
  0x48   :  { %p2901_p6 = pnand %p2899_p5, %p2896_p4 }
  0x4a   :  { %2904 = shalt.err (!%p2901_p6)
}
  0x4b   :  { %s2905_s21 = scalar_lea.vmem %s80_s26, 32  ;;  %p2910_p8 = scmp.lt.s32.totalorder %s80_s26, %s80_s26 }
  0x4c   :  { %p2906_p7 = scmp.ne.s32.totalorder %s80_s26, %s2905_s21  ;;  %p2911_p9 = scmp.lt.s32.totalorder %s2905_s21, %s2905_s21 }
  0x4e   :  { %p2912_p10 = por %p2911_p9, %p2910_p8 }
  0x50   :  { %p2913_p11 = pnand %p2912_p10, %p2906_p7 }
  0x52   :  { %2916 = shalt.err (!%p2913_p11)
}
  0x53   :  { %82 = dma.hbm_to_vmem [thread:$0]  %s3885_s9, 32, %s80_s26, [#allocation8]  }
  0x54   :  { %s2954_s25 = smov [#allocation10]   ;;  %s2917_s29 = scalar_lea.hbm %s3887_s11, 16 }
  0x55   :  { %s91_s5 = sshll.u32 %s2954_s25, 4  ;;  %p2918_p12 = scmp.ne.s32.totalorder %s3887_s11, %s2917_s29  ;;  %s92_s5 = int_to_ptr.vmem [resolvable:$true] %s91_s5 }
  0x56   :  { %p2921_p13 = scmp.lt.u32.totalorder %s2917_s29, %s3887_s11 }
  0x58   :  { %p2923_p0 = pnand %p2921_p13, %p2918_p12 }
  0x5a   :  { %2926 = shalt.err (!%p2923_p0)
}
  0x5b   :  { %s2927_s28 = scalar_lea.vmem %s92_s5, 16  ;;  %s2931_s9 = scalar_lea.vmem %s92_s5, 32 }
  0x5c   :  { %p2928_p1 = scmp.ne.s32.totalorder %s92_s5, %s2927_s28  ;;  %p2932_p2 = scmp.lt.s32.totalorder %s92_s5, %s92_s5 }
  0x5d   :  { %p2933_p3 = scmp.lt.s32.totalorder %s2931_s9, %s2927_s28 }
  0x5f   :  { %p2934_p4 = por %p2933_p3, %p2932_p2 }
  0x61   :  { %p2935_p5 = pnand %p2934_p4, %p2928_p1 }
  0x63   :  { %2938 = shalt.err (!%p2935_p5)
}
  0x64   :  { %94 = dma.hbm_to_vmem [thread:$0]  %s3887_s11, 16, %s92_s5, [#allocation11]  }
  0x65   :  { %2939 = dma.done.wait [#allocation3], 65536  }
  0x66   :  { %2940 = vsyncadd [#allocation3], 4294901760 }
  0x67   :  { %2941 = dma.done.wait [#allocation5], 128  }
  0x68   :  { %2942 = vsyncadd [#allocation5], 4294967168 }
  0x69   :  { %2943 = dma.done.wait [#allocation8], 64  }
  0x6a   :  { %2944 = vsyncadd [#allocation8], 4294967232 }
  0x6b   :  { %2945 = dma.done.wait [#allocation11], 16  }
  0x6c   :  { %2946 = vsyncadd [#allocation11], 4294967280  ;;  %v296_v0 = vld [vmem:[#allocation2 + $0x8] sm:$0xff]  ;;  %v295_v5 = vld [vmem:[#allocation2] sm:$0xff]  ;;  %vm2053_vm9 = vcmask 72704  }
  0x6d   :  { %v300_v1 = vld [vmem:[#allocation2 + $0x28] sm:$0xff]  ;;  %v299_v6 = vld [vmem:[#allocation2 + $0x20] sm:$0xff] }
  0x6e   :  { %v424_v2 = vld [vmem:[#allocation2 + $0x408] sm:$0xff]  ;;  %v2099_v3 = vpack.c.bf16 %v300_v1, %v296_v0  ;;  %v2101_v8 = vpack.c.bf16 %v299_v6, %v295_v5  ;;  %v423_v9 = vld [vmem:[#allocation2 + $0x400] sm:$0xff] }
  0x6f   :  { %v428_v4 = vld [vmem:[#allocation2 + $0x428] sm:$0xff]  ;;  %v427_v10 = vld [vmem:[#allocation2 + $0x420] sm:$0xff] }
  0x70   :  { %v2163_v7 = vpack.c.bf16 %v428_v4, %v424_v2  ;;  %v304_v11 = vld [vmem:[#allocation2 + $0x48] sm:$0xff]  ;;  %2100 = vmatprep.subr.bf16.mxu1 %v2099_v3  ;;  %v2165_v12 = vpack.c.bf16 %v427_v10, %v423_v9  ;;  %v303_v18 = vld [vmem:[#allocation2 + $0x40] sm:$0xff] }
  0x71   :  { %v308_v13 = vld [vmem:[#allocation2 + $0x68] sm:$0xff]  ;;  %2102 = vmatpush1.bf16.msra.mxu1 %v2101_v8  ;;  %v307_v19 = vld [vmem:[#allocation2 + $0x60] sm:$0xff] }
  0x72   :  { %v432_v14 = vld [vmem:[#allocation2 + $0x448] sm:$0xff]  ;;  %2164 = vmatprep.subr.bf16.mxu0 %v2163_v7  ;;  %v2103_v16 = vpack.c.bf16 %v308_v13, %v304_v11  ;;  %v431_v20 = vld [vmem:[#allocation2 + $0x440] sm:$0xff]  ;;  %v2105_v21 = vpack.c.bf16 %v307_v19, %v303_v18 }
  0x73   :  { %v436_v15 = vld [vmem:[#allocation2 + $0x468] sm:$0xff]  ;;  %2166 = vmatpush1.bf16.msra.mxu0 %v2165_v12  ;;  %v435_v22 = vld [vmem:[#allocation2 + $0x460] sm:$0xff] }
  0x74   :  { %v2167_v17 = vpack.c.bf16 %v436_v15, %v432_v14  ;;  %v312_v23 = vld [vmem:[#allocation2 + $0x88] sm:$0xff]  ;;  %2104 = vmatprep.subr.bf16.mxu1 %v2103_v16  ;;  %v2169_v25 = vpack.c.bf16 %v435_v22, %v431_v20  ;;  %v311_v29 = vld [vmem:[#allocation2 + $0x80] sm:$0xff] }
  0x75   :  { %v316_v24 = vld [vmem:[#allocation2 + $0xa8] sm:$0xff]  ;;  %v315_v31 = vld [vmem:[#allocation2 + $0xa0] sm:$0xff]  ;;  %2106 = vmatpush1.bf16.msra.mxu1 %v2105_v21 }
  0x76   :  { %2168 = vmatprep.subr.bf16.mxu0 %v2167_v17  ;;  %v2107_v26 = vpack.c.bf16 %v316_v24, %v312_v23  ;;  %v440_v27 = vld [vmem:[#allocation2 + $0x488] sm:$0xff]  ;;  %v439_v32 = vld [vmem:[#allocation2 + $0x480] sm:$0xff]  ;;  %v2109_v34 = vpack.c.bf16 %v315_v31, %v311_v29 }
  0x77   :  { %v444_v28 = vld [vmem:[#allocation2 + $0x4a8] sm:$0xff]  ;;  %v443_v33 = vld [vmem:[#allocation2 + $0x4a0] sm:$0xff]  ;;  %2170 = vmatpush1.bf16.msra.mxu0 %v2169_v25 }
  0x78   :  { %v2171_v30 = vpack.c.bf16 %v444_v28, %v440_v27  ;;  %v320_v35 = vld [vmem:[#allocation2 + $0xc8] sm:$0xff]  ;;  %2108 = vmatprep.subr.bf16.mxu1 %v2107_v26  ;;  %v2173_v38 = vpack.c.bf16 %v443_v33, %v439_v32  ;;  %v319_v41 = vld [vmem:[#allocation2 + $0xc0] sm:$0xff] }
  0x79   :  { %v324_v36 = vld [vmem:[#allocation2 + $0xe8] sm:$0xff]  ;;  %v323_v42 = vld [vmem:[#allocation2 + $0xe0] sm:$0xff]  ;;  %2110 = vmatpush1.bf16.msra.mxu1 %v2109_v34 }
  0x7a   :  { %v448_v37 = vld [vmem:[#allocation2 + $0x4c8] sm:$0xff]  ;;  %v2111_v39 = vpack.c.bf16 %v324_v36, %v320_v35  ;;  %2172 = vmatprep.subr.bf16.mxu0 %v2171_v30  ;;  %v447_v44 = vld [vmem:[#allocation2 + $0x4c0] sm:$0xff]  ;;  %v2113_v50 = vpack.c.bf16 %v323_v42, %v319_v41 }
  0x7b   :  { %v452_v40 = vld [vmem:[#allocation2 + $0x4e8] sm:$0xff]  ;;  %v451_v45 = vld [vmem:[#allocation2 + $0x4e0] sm:$0xff]  ;;  %2174 = vmatpush1.bf16.msra.mxu0 %v2173_v38 }
  0x7c   :  { %v2175_v43 = vpack.c.bf16 %v452_v40, %v448_v37  ;;  %v328_v46 = vld [vmem:[#allocation2 + $0x108] sm:$0xff]  ;;  %2112 = vmatprep.subr.bf16.mxu1 %v2111_v39  ;;  %v2177_v51 = vpack.c.bf16 %v451_v45, %v447_v44  ;;  %v327_v53 = vld [vmem:[#allocation2 + $0x100] sm:$0xff] }
  0x7d   :  { %v332_v47 = vld [vmem:[#allocation2 + $0x128] sm:$0xff]  ;;  %v331_v54 = vld [vmem:[#allocation2 + $0x120] sm:$0xff]  ;;  %2114 = vmatpush1.bf16.msra.mxu1 %v2113_v50 }
  0x7e   :  { %v456_v48 = vld [vmem:[#allocation2 + $0x508] sm:$0xff]  ;;  %v2115_v52 = vpack.c.bf16 %v332_v47, %v328_v46  ;;  %v455_v55 = vld [vmem:[#allocation2 + $0x500] sm:$0xff]  ;;  %2176 = vmatprep.subr.bf16.mxu0 %v2175_v43  ;;  %v2117_v62 = vpack.c.bf16 %v331_v54, %v327_v53  ;;  %v124_v46 = vlaneseq }
  0x7f   :  { %v460_v49 = vld [vmem:[#allocation2 + $0x528] sm:$0xff]  ;;  %v459_v57 = vld [vmem:[#allocation2 + $0x520] sm:$0xff]  ;;  %2178 = vmatpush1.bf16.msra.mxu0 %v2177_v51 }
  0x80   :  { %v2179_v56 = vpack.c.bf16 %v460_v49, %v456_v48  ;;  %v336_v58 = vld [vmem:[#allocation2 + $0x148] sm:$0xff]  ;;  %2116 = vmatprep.subr.bf16.mxu1 %v2115_v52  ;;  %v2181_v63 = vpack.c.bf16 %v459_v57, %v455_v55  ;;  %v335_v1 = vld [vmem:[#allocation2 + $0x140] sm:$0xff] }
  0x81   :  { %v340_v59 = vld [vmem:[#allocation2 + $0x168] sm:$0xff]  ;;  %v339_v2 = vld [vmem:[#allocation2 + $0x160] sm:$0xff]  ;;  %2118 = vmatpush1.bf16.msra.mxu1 %v2117_v62 }
  0x82   :  { %v464_v60 = vld [vmem:[#allocation2 + $0x548] sm:$0xff]  ;;  %v2119_v0 = vpack.c.bf16 %v340_v59, %v336_v58  ;;  %v463_v3 = vld [vmem:[#allocation2 + $0x540] sm:$0xff]  ;;  %2180 = vmatprep.subr.bf16.mxu0 %v2179_v56  ;;  %v2121_v10 = vpack.c.bf16 %v339_v2, %v335_v1  ;;  %v3094_v59 = vshrl.u32 %v124_v46, 7 }
  0x83   :  { %v468_v61 = vld [vmem:[#allocation2 + $0x568] sm:$0xff]  ;;  %v467_v5 = vld [vmem:[#allocation2 + $0x560] sm:$0xff]  ;;  %2182 = vmatpush1.bf16.msra.mxu0 %v2181_v63 }
  0x84   :  { %v2183_v4 = vpack.c.bf16 %v468_v61, %v464_v60  ;;  %v344_v6 = vld [vmem:[#allocation2 + $0x188] sm:$0xff]  ;;  %2120 = vmatprep.subr.bf16.mxu1 %v2119_v0  ;;  %v2185_v11 = vpack.c.bf16 %v467_v5, %v463_v3  ;;  %v343_v13 = vld [vmem:[#allocation2 + $0x180] sm:$0xff]  ;;  %v3143_v46 = vsub.s32 2, %v3094_v59 }
  0x85   :  { %v348_v7 = vld [vmem:[#allocation2 + $0x1a8] sm:$0xff]  ;;  %v347_v14 = vld [vmem:[#allocation2 + $0x1a0] sm:$0xff]  ;;  %2122 = vmatpush1.bf16.msra.mxu1 %v2121_v10  ;;  %v3097_v10 = vsub.s32 1, %v3094_v59 }
  0x86   :  { %v472_v8 = vld [vmem:[#allocation2 + $0x588] sm:$0xff]  ;;  %v2123_v12 = vpack.c.bf16 %v348_v7, %v344_v6  ;;  %v471_v15 = vld [vmem:[#allocation2 + $0x580] sm:$0xff]  ;;  %2184 = vmatprep.subr.bf16.mxu0 %v2183_v4  ;;  %v2125_v22 = vpack.c.bf16 %v347_v14, %v343_v13 }
  0x87   :  { %v476_v9 = vld [vmem:[#allocation2 + $0x5a8] sm:$0xff]  ;;  %v475_v17 = vld [vmem:[#allocation2 + $0x5a0] sm:$0xff]  ;;  %2186 = vmatpush1.bf16.msra.mxu0 %v2185_v11 }
  0x88   :  { %v2187_v16 = vpack.c.bf16 %v476_v9, %v472_v8  ;;  %v352_v18 = vld [vmem:[#allocation2 + $0x1c8] sm:$0xff]  ;;  %2124 = vmatprep.subr.bf16.mxu1 %v2123_v12  ;;  %v2189_v23 = vpack.c.bf16 %v475_v17, %v471_v15  ;;  %v351_v25 = vld [vmem:[#allocation2 + $0x1c0] sm:$0xff]  ;;  %v3100_v15 = vsub.s32 3, %v3094_v59 }
  0x89   :  { %v356_v19 = vld [vmem:[#allocation2 + $0x1e8] sm:$0xff]  ;;  %v355_v26 = vld [vmem:[#allocation2 + $0x1e0] sm:$0xff]  ;;  %2126 = vmatpush1.bf16.msra.mxu1 %v2125_v22 }
  0x8a   :  { %v480_v20 = vld [vmem:[#allocation2 + $0x5c8] sm:$0xff]  ;;  %v2127_v24 = vpack.c.bf16 %v356_v19, %v352_v18  ;;  %v479_v27 = vld [vmem:[#allocation2 + $0x5c0] sm:$0xff]  ;;  %2188 = vmatprep.subr.bf16.mxu0 %v2187_v16  ;;  %v2129_v34 = vpack.c.bf16 %v355_v26, %v351_v25  ;;  %v3112_v25 = vsub.s32 0, %v3094_v59 }
  0x8b   :  { %v484_v21 = vld [vmem:[#allocation2 + $0x5e8] sm:$0xff]  ;;  %v483_v29 = vld [vmem:[#allocation2 + $0x5e0] sm:$0xff]  ;;  %2190 = vmatpush1.bf16.msra.mxu0 %v2189_v23 }
  0x8c   :  { %v2191_v28 = vpack.c.bf16 %v484_v21, %v480_v20  ;;  %v360_v30 = vld [vmem:[#allocation2 + $0x208] sm:$0xff]  ;;  %2128 = vmatprep.subr.bf16.mxu1 %v2127_v24  ;;  %v2193_v35 = vpack.c.bf16 %v483_v29, %v479_v27  ;;  %v359_v37 = vld [vmem:[#allocation2 + $0x200] sm:$0xff] }
  0x8d   :  { %v364_v31 = vld [vmem:[#allocation2 + $0x228] sm:$0xff]  ;;  %v363_v38 = vld [vmem:[#allocation2 + $0x220] sm:$0xff]  ;;  %2130 = vmatpush1.bf16.msra.mxu1 %v2129_v34 }
  0x8e   :  { %v488_v32 = vld [vmem:[#allocation2 + $0x608] sm:$0xff]  ;;  %v2131_v36 = vpack.c.bf16 %v364_v31, %v360_v30  ;;  %v487_v39 = vld [vmem:[#allocation2 + $0x600] sm:$0xff]  ;;  %2192 = vmatprep.subr.bf16.mxu0 %v2191_v28  ;;  %v2133_v47 = vpack.c.bf16 %v363_v38, %v359_v37  ;;  %v118_v38 = vld [vmem:[%s3876_s0 + $0x18] sm:$0xff] }
  0x8f   :  { %v492_v33 = vld [vmem:[#allocation2 + $0x628] sm:$0xff]  ;;  %v491_v41 = vld [vmem:[#allocation2 + $0x620] sm:$0xff]  ;;  %2194 = vmatpush1.bf16.msra.mxu0 %v2193_v35  ;;  %v2955_v35 = vmov 0  }
  0x90   :  { %v2195_v40 = vpack.c.bf16 %v492_v33, %v488_v32  ;;  %v368_v42 = vld [vmem:[#allocation2 + $0x248] sm:$0xff]  ;;  %2132 = vmatprep.subr.bf16.mxu1 %v2131_v36  ;;  %v2197_v48 = vpack.c.bf16 %v491_v41, %v487_v39  ;;  %v367_v50 = vld [vmem:[#allocation2 + $0x240] sm:$0xff] }
  0x91   :  { %v372_v43 = vld [vmem:[#allocation2 + $0x268] sm:$0xff]  ;;  %v371_v51 = vld [vmem:[#allocation2 + $0x260] sm:$0xff]  ;;  %2134 = vmatpush1.bf16.msra.mxu1 %v2133_v47 }
  0x92   :  { %v496_v44 = vld [vmem:[#allocation2 + $0x648] sm:$0xff]  ;;  %v2135_v49 = vpack.c.bf16 %v372_v43, %v368_v42  ;;  %v495_v52 = vld [vmem:[#allocation2 + $0x640] sm:$0xff]  ;;  %2196 = vmatprep.subr.bf16.mxu0 %v2195_v40  ;;  %v2137_v60 = vpack.c.bf16 %v371_v51, %v367_v50 }
  0x93   :  { %v500_v45 = vld [vmem:[#allocation2 + $0x668] sm:$0xff]  ;;  %v499_v54 = vld [vmem:[#allocation2 + $0x660] sm:$0xff]  ;;  %2198 = vmatpush1.bf16.msra.mxu0 %v2197_v48 }
  0x94   :  { %v2199_v53 = vpack.c.bf16 %v500_v45, %v496_v44  ;;  %v376_v55 = vld [vmem:[#allocation2 + $0x288] sm:$0xff]  ;;  %v375_v61 = vld [vmem:[#allocation2 + $0x280] sm:$0xff]  ;;  %2136 = vmatprep.subr.bf16.mxu1 %v2135_v49  ;;  %v2201_v62 = vpack.c.bf16 %v499_v54, %v495_v52  ;;  %v175_v45 = vld [vmem:[%s3877_s1 + $0x18] sm:$0xff] }
  0x95   :  { %v380_v56 = vld [vmem:[#allocation2 + $0x2a8] sm:$0xff]  ;;  %v379_v0 = vld [vmem:[#allocation2 + $0x2a0] sm:$0xff]  ;;  %2138 = vmatpush1.bf16.msra.mxu1 %v2137_v60 }
  0x96   :  { %v504_v57 = vld [vmem:[#allocation2 + $0x688] sm:$0xff]  ;;  %v2139_v63 = vpack.c.bf16 %v380_v56, %v376_v55  ;;  %v503_v1 = vld [vmem:[#allocation2 + $0x680] sm:$0xff]  ;;  %2200 = vmatprep.subr.bf16.mxu0 %v2199_v53  ;;  %v2141_v11 = vpack.c.bf16 %v379_v0, %v375_v61 }
  0x97   :  { %v508_v58 = vld [vmem:[#allocation2 + $0x6a8] sm:$0xff]  ;;  %v507_v2 = vld [vmem:[#allocation2 + $0x6a0] sm:$0xff]  ;;  %2202 = vmatpush1.bf16.msra.mxu0 %v2201_v62 }
  0x98   :  { %v2203_v3 = vpack.c.bf16 %v508_v58, %v504_v57  ;;  %v384_v4 = vld [vmem:[#allocation2 + $0x2c8] sm:$0xff]  ;;  %v383_v8 = vld [vmem:[#allocation2 + $0x2c0] sm:$0xff]  ;;  %2140 = vmatprep.subr.bf16.mxu1 %v2139_v63  ;;  %v2205_v16 = vpack.c.bf16 %v507_v2, %v503_v1 }
  0x99   :  { %v388_v5 = vld [vmem:[#allocation2 + $0x2e8] sm:$0xff]  ;;  %v387_v9 = vld [vmem:[#allocation2 + $0x2e0] sm:$0xff]  ;;  %2142 = vmatpush1.bf16.msra.mxu1 %v2141_v11  ;;  %v174_v11 = vld [vmem:[%s3877_s1 + $0x10] sm:$0xff] }
  0x9a   :  { %v512_v6 = vld [vmem:[#allocation2 + $0x6c8] sm:$0xff]  ;;  %v511_v12 = vld [vmem:[#allocation2 + $0x6c0] sm:$0xff]  ;;  %v2143_v17 = vpack.c.bf16 %v388_v5, %v384_v4  ;;  %2204 = vmatprep.subr.bf16.mxu0 %v2203_v3  ;;  %v2145_v26 = vpack.c.bf16 %v387_v9, %v383_v8  ;;  %v117_v9 = vld [vmem:[%s3876_s0 + $0x10] sm:$0xff] }
  0x9b   :  { %v516_v7 = vld [vmem:[#allocation2 + $0x6e8] sm:$0xff]  ;;  %v515_v13 = vld [vmem:[#allocation2 + $0x6e0] sm:$0xff]  ;;  %2206 = vmatpush1.bf16.msra.mxu0 %v2205_v16 }
  0x9c   :  { %v392_v14 = vld [vmem:[#allocation2 + $0x308] sm:$0xff]  ;;  %v2207_v21 = vpack.c.bf16 %v516_v7, %v512_v6  ;;  %v3102_v22 = vld [vmem:[#allocation2 + $0x300] sm:$0xff]  ;;  %v2209_v27 = vpack.c.bf16 %v515_v13, %v511_v12  ;;  %2144 = vmatprep.subr.bf16.mxu1 %v2143_v17 }
  0x9d   :  { %v396_v18 = vld [vmem:[#allocation2 + $0x328] sm:$0xff]  ;;  %v3104_v23 = vld [vmem:[#allocation2 + $0x320] sm:$0xff]  ;;  %2146 = vmatpush1.bf16.msra.mxu1 %v2145_v26 }
  0x9e   :  { %v520_v19 = vld [vmem:[#allocation2 + $0x708] sm:$0xff]  ;;  %v3109_v24 = vld [vmem:[%s3878_s2] sm:$0xff]  ;;  %v2147_v32 = vpack.c.bf16 %v396_v18, %v392_v14  ;;  %2208 = vmatprep.subr.bf16.mxu0 %v2207_v21  ;;  %v2149_v48 = vpack.c.bf16 %v3104_v23, %v3102_v22 }
  0x9f   :  { %v524_v20 = vld [vmem:[#allocation2 + $0x728] sm:$0xff]  ;;  %vm114_vm0 = vcmp.ge.f32.partialorder %v3109_v24, 0.0  ;;  %v131_v29 = vrot.slane %v3109_v24, %v3097_v10  ;;  %v3126_v31 = vld [vmem:[%s3879_s3] sm:$0xff]  ;;  %v139_v39 = vrot.slane %v3109_v24, %v3100_v15  ;;  %v127_v0 = vrot.slane %v3109_v24, %v3112_v25  ;;  %2210 = vmatpush1.bf16.msra.mxu0 %v2209_v27 }
  0xa0   :  { %v116_v28 = vld [vmem:[%s3876_s0 + $0x8] sm:$0xff]  ;;  %v519_v33 = vld [vmem:[#allocation2 + $0x700] sm:$0xff]  ;;  %v3128_v36 = vsel %vm114_vm0, 1, %v2955_v35  ;;  %v246_v37 = vrot.slane %v3126_v31, %v3097_v10  ;;  %v2211_v47 = vpack.c.bf16 %v524_v20, %v520_v19  ;;  %v254_v56 = vrot.slane %v3126_v31, %v3100_v15  ;;  %2148 = vmatprep.subr.bf16.mxu1 %v2147_v32 }
  0xa1   :  { %v173_v30 = vld [vmem:[%s3877_s1 + $0x8] sm:$0xff]  ;;  %v523_v34 = vld [vmem:[#allocation2 + $0x720] sm:$0xff]  ;;  %v165_v42 = vmul.f32 %v131_v29, %v116_v28  ;;  %v196_v44 = vrot.slane %v3128_v36, %v3097_v10  ;;  %v167_v50 = vmul.f32 %v139_v39, %v118_v38  ;;  %v183_v54 = vmul.f32 %v175_v45, %v139_v39  ;;  %2150 = vmatpush1.bf16.msra.mxu1 %v2149_v48  ;;  %v317_v38 = vld [vmem:[#allocation2 + $0xb0] sm:$0xff] }
  0xa2   :  { %v400_v40 = vld [vmem:[#allocation2 + $0x348] sm:$0xff]  ;;  %v181_v43 = vmul.f32 %v173_v30, %v131_v29  ;;  %v399_v52 = vld [vmem:[#allocation2 + $0x340] sm:$0xff]  ;;  %v204_v55 = vrot.slane %v3128_v36, %v3100_v15  ;;  %v2213_v57 = vpack.c.bf16 %v523_v34, %v519_v33  ;;  %v192_v5 = vrot.slane %v3128_v36, %v3112_v25  ;;  %2212 = vmatprep.subr.bf16.mxu0 %v2211_v47 }
  0xa3   :  { %v404_v41 = vld [vmem:[#allocation2 + $0x368] sm:$0xff]  ;;  %v403_v53 = vld [vmem:[#allocation2 + $0x360] sm:$0xff]  ;;  %vm222_vm1 = vcmp.eq.s32.totalorder %v196_v44, 1  ;;  %v135_v6 = vrot.slane %v3109_v24, %v3143_v46  ;;  %v200_v12 = vrot.slane %v3128_v36, %v3143_v46  ;;  %v250_v44 = vrot.slane %v3126_v31, %v3143_v46 }
  0xa4   :  { %v528_v49 = vld [vmem:[#allocation2 + $0x748] sm:$0xff]  ;;  %v2151_v58 = vpack.c.bf16 %v404_v41, %v400_v40  ;;  %v527_v60 = vld [vmem:[#allocation2 + $0x740] sm:$0xff]  ;;  %v230_v63 = vsel %vm222_vm1, %v165_v42, %v181_v43  ;;  %vm224_vm2 = vcmp.eq.s32.totalorder %v204_v55, 1  ;;  %v2153_v13 = vpack.c.bf16 %v403_v53, %v399_v52  ;;  %2214 = vmatpush1.bf16.msra.mxu0 %v2213_v57  ;;  %v302_v55 = vld [vmem:[#allocation2 + $0x38] sm:$0xff] }
  0xa5   :  { %v532_v51 = vld [vmem:[#allocation2 + $0x768] sm:$0xff]  ;;  %v531_v61 = vld [vmem:[#allocation2 + $0x760] sm:$0xff]  ;;  %v3153_v2 = vadd.f32 %v246_v37, %v230_v63  ;;  %v232_v8 = vsel %vm224_vm2, %v167_v50, %v183_v54  ;;  %vm3176_vm3 = vcmp.eq.s32.totalorder %v192_v5, 1  ;;  %v166_v30 = vmul.f32 %v135_v6, %v117_v9  ;;  %v298_v54 = vld [vmem:[#allocation2 + $0x18] sm:$0xff] }
  0xa6   :  { %v408_v62 = vld [vmem:[#allocation2 + $0x388] sm:$0xff]  ;;  %v115_v3 = vld [vmem:[%s3876_s0] sm:$0xff]  ;;  %v2215_v7 = vpack.c.bf16 %v532_v51, %v528_v49  ;;  %v3174_v18 = vadd.f32 %v254_v56, %v232_v8  ;;  %v2217_v19 = vpack.c.bf16 %v531_v61, %v527_v60  ;;  %2152 = vmatprep.subr.bf16.mxu1 %v2151_v58  ;;  %v182_v32 = vmul.f32 %v174_v11, %v135_v6  ;;  %v306_v6 = vld [vmem:[#allocation2 + $0x58] sm:$0xff] }
  0xa7   :  { %v412_v1 = vld [vmem:[#allocation2 + $0x3a8] sm:$0xff]  ;;  %v172_v4 = vld [vmem:[%s3877_s1] sm:$0xff]  ;;  %v288_v17 = vmax.f32 %v3153_v2, 0.0  ;;  %v164_v21 = vmul.f32 %v127_v0, %v115_v3  ;;  %vm3183_vm4 = vcmp.eq.s32.totalorder %v200_v12, 1  ;;  %v242_v41 = vrot.slane %v3126_v31, %v3112_v25  ;;  %2154 = vmatpush1.bf16.msra.mxu1 %v2153_v13  ;;  %v301_v3 = vld [vmem:[#allocation2 + $0x30] sm:$0xff] }
  0xa8   :  { %v536_v14 = vld [vmem:[#allocation2 + $0x788] sm:$0xff]  ;;  %v2155_v20 = vpack.c.bf16 %v412_v1, %v408_v62  ;;  %v180_v22 = vmul.f32 %v172_v4, %v127_v0  ;;  %v407_v23 = vld [vmem:[#allocation2 + $0x380] sm:$0xff]  ;;  %v290_v29 = vmax.f32 %v3174_v18, 0.0  ;;  %2216 = vmatprep.subr.bf16.mxu0 %v2215_v7  ;;  %v231_v51 = vsel %vm3183_vm4, %v166_v30, %v182_v32  ;;  %v297_v1 = vld [vmem:[#allocation2 + $0x10] sm:$0xff] }
  0xa9   :  { %v540_v16 = vld [vmem:[#allocation2 + $0x7a8] sm:$0xff]  ;;  %v411_v26 = vld [vmem:[#allocation2 + $0x3a0] sm:$0xff]  ;;  %871 = vmatprep.mubr.f32.mxu1 %v288_v17  ;;  %2218 = vmatpush1.bf16.msra.mxu0 %v2217_v19  ;;  %v3199_v61 = vadd.f32 %v250_v44, %v231_v51  ;;  %v2355_v63 = vpack.c.bf16 %v302_v55, %v298_v54  ;;  %v310_v7 = vld [vmem:[#allocation2 + $0x78] sm:$0xff]  ;;  %v2357_v13 = vpack.c.bf16 %v301_v3, %v297_v1 }
  0xaa   :  { %v535_v27 = vld [vmem:[#allocation2 + $0x780] sm:$0xff]  ;;  %v2219_v33 = vpack.c.bf16 %v540_v16, %v536_v14  ;;  %v416_v35 = vld [vmem:[#allocation2 + $0x3c8] sm:$0xff]  ;;  %942 = vmatprep.mubr.f32.mxu0 %v290_v29  ;;  %v2157_v42 = vpack.c.bf16 %v411_v26, %v407_v23  ;;  %v229_v43 = vsel %vm3176_vm3, %v164_v21, %v180_v22  ;;  %2156 = vmatprep.subr.bf16.mxu1 %v2155_v20  ;;  %v305_v20 = vld [vmem:[#allocation2 + $0x50] sm:$0xff] }
  0xab   :  { %v539_v34 = vld [vmem:[#allocation2 + $0x7a0] sm:$0xff]  ;;  %v420_v37 = vld [vmem:[#allocation2 + $0x3e8] sm:$0xff]  ;;  %v3197_v56 = vadd.f32 %v242_v41, %v229_v43  ;;  %v289_v12 = vmax.f32 %v3199_v61, 0.0  ;;  %v2359_v16 = vpack.c.bf16 %v310_v7, %v306_v6  ;;  %v309_v21 = vld [vmem:[#allocation2 + $0x70] sm:$0xff] }
  0xac   :  { %v544_v39 = vld [vmem:[#allocation2 + $0x7c8] sm:$0xff]  ;;  %v2221_v45 = vpack.c.bf16 %v539_v34, %v535_v27  ;;  %v2159_v47 = vpack.c.bf16 %v420_v37, %v416_v35  ;;  %v415_v48 = vld [vmem:[#allocation2 + $0x3c0] sm:$0xff]  ;;  %2220 = vmatprep.subr.bf16.mxu0 %v2219_v33  ;;  %2158 = vmatpush1.bf16.msra.mxu1 %v2157_v42  ;;  %v314_v26 = vld [vmem:[#allocation2 + $0x98] sm:$0xff]  ;;  %v2361_v32 = vpack.c.bf16 %v309_v21, %v305_v20 }
  0xad   :  { %v548_v40 = vld [vmem:[#allocation2 + $0x7e8] sm:$0xff]  ;;  %v419_v49 = vld [vmem:[#allocation2 + $0x3e0] sm:$0xff]  ;;  %v287_v8 = vmax.f32 %v3197_v56, 0.0  ;;  %v318_v27 = vld [vmem:[#allocation2 + $0xb8] sm:$0xff] }
  0xae   :  { %v543_v50 = vld [vmem:[#allocation2 + $0x7c0] sm:$0xff]  ;;  %v2223_v52 = vpack.c.bf16 %v548_v40, %v544_v39  ;;  %v552_v57 = vld [vmem:[#allocation2 + $0x808] sm:$0xff]  ;;  %v2161_v60 = vpack.c.bf16 %v419_v49, %v415_v48  ;;  %2222 = vmatpush1.bf16.msra.mxu0 %v2221_v45  ;;  %2160 = vmatprep.subr.bf16.mxu1 %v2159_v47  ;;  %v2363_v34 = vpack.c.bf16 %v318_v27, %v314_v26  ;;  %v313_v37 = vld [vmem:[#allocation2 + $0x90] sm:$0xff] }
  0xaf   :  { %v547_v53 = vld [vmem:[#allocation2 + $0x7e0] sm:$0xff]  ;;  %v556_v58 = vld [vmem:[#allocation2 + $0x828] sm:$0xff]  ;;  %v322_v41 = vld [vmem:[#allocation2 + $0xd8] sm:$0xff]  ;;  %v2365_v45 = vpack.c.bf16 %v317_v38, %v313_v37 }
  0xb0   :  { %v2225_v62 = vpack.c.bf16 %v547_v53, %v543_v50  ;;  %v551_v0 = vld [vmem:[#allocation2 + $0x800] sm:$0xff]  ;;  %2224 = vmatprep.subr.bf16.mxu0 %v2223_v52  ;;  %v2227_v4 = vpack.c.bf16 %v556_v58, %v552_v57  ;;  %v560_v9 = vld [vmem:[#allocation2 + $0x848] sm:$0xff]  ;;  %2162 = vmatpush1.bf16.msra.mxu1 %v2161_v60  ;;  %v326_v42 = vld [vmem:[#allocation2 + $0xf8] sm:$0xff] }
  0xb1   :  { %v555_v5 = vld [vmem:[#allocation2 + $0x820] sm:$0xff]  ;;  %v564_v11 = vld [vmem:[#allocation2 + $0x868] sm:$0xff]  ;;  %2356 = vmatprep.subr.bf16.mxu1 %v2355_v63  ;;  %v2367_v48 = vpack.c.bf16 %v326_v42, %v322_v41  ;;  %v321_v50 = vld [vmem:[#allocation2 + $0xd0] sm:$0xff] }
  0xb2   :  { %2226 = vmatpush1.bf16.msra.mxu0 %v2225_v62  ;;  %v2229_v14 = vpack.c.bf16 %v555_v5, %v551_v0  ;;  %v559_v19 = vld [vmem:[#allocation2 + $0x840] sm:$0xff]  ;;  %v2231_v22 = vpack.c.bf16 %v564_v11, %v560_v9  ;;  %v568_v28 = vld [vmem:[#allocation2 + $0x888] sm:$0xff]  ;;  %v325_v51 = vld [vmem:[#allocation2 + $0xf0] sm:$0xff]  ;;  %v3210_v11 = vsub.s32 5, %v3094_v59 }
  0xb3   :  { %2228 = vmatprep.subr.bf16.mxu0 %v2227_v4  ;;  %v563_v23 = vld [vmem:[#allocation2 + $0x860] sm:$0xff]  ;;  %872 = vmatmul.mubr.f32.vlgmr.msra.gmra.mrb[0].mxu1 %v287_v8  ;;  %v572_v30 = vld [vmem:[#allocation2 + $0x8a8] sm:$0xff]  ;;  %v330_v54 = vld [vmem:[#allocation2 + $0x118] sm:$0xff]  ;;  %v2369_v2 = vpack.c.bf16 %v325_v51, %v321_v50 }
  0xb4   :  { %2358 = vmatpush1.bf16.msra.mxu1 %v2357_v13  ;;  %v2233_v33 = vpack.c.bf16 %v563_v23, %v559_v19  ;;  %v567_v35 = vld [vmem:[#allocation2 + $0x880] sm:$0xff]  ;;  %v2235_v39 = vpack.c.bf16 %v572_v30, %v568_v28  ;;  %1155 = vmatprep.mubr.f32.mxu1 %v288_v17  ;;  %v576_v43 = vld [vmem:[#allocation2 + $0x8c8] sm:$0xff]  ;;  %v334_v55 = vld [vmem:[#allocation2 + $0x138] sm:$0xff]  ;;  %v3213_v30 = vsub.s32 4, %v3094_v59 }
  0xb5   :  { %943 = vmatmul.mubr.f32.vlgmr.msra.gmra.mrb[0].mxu0 %v289_v12  ;;  %2360 = vmatprep.subr.bf16.mxu1 %v2359_v16  ;;  %v571_v40 = vld [vmem:[#allocation2 + $0x8a0] sm:$0xff]  ;;  %v580_v44 = vld [vmem:[#allocation2 + $0x8e8] sm:$0xff]  ;;  %v2371_v60 = vpack.c.bf16 %v334_v55, %v330_v54  ;;  %v329_v63 = vld [vmem:[#allocation2 + $0x110] sm:$0xff]  ;;  %v262_v54 = vrot.slane %v3126_v31, %v3210_v11 }
  0xb6   :  { %2230 = vmatpush1.bf16.msra.mxu0 %v2229_v14  ;;  %v2237_v47 = vpack.c.bf16 %v571_v40, %v567_v35  ;;  %v575_v49 = vld [vmem:[#allocation2 + $0x8c0] sm:$0xff]  ;;  %v2239_v52 = vpack.c.bf16 %v580_v44, %v576_v43  ;;  %v584_v57 = vld [vmem:[#allocation2 + $0x908] sm:$0xff]  ;;  %v333_v0 = vld [vmem:[#allocation2 + $0x130] sm:$0xff]  ;;  %v212_v40 = vrot.slane %v3128_v36, %v3210_v11 }
  0xb7   :  { %2232 = vmatprep.subr.bf16.mxu0 %v2231_v22  ;;  %v579_v53 = vld [vmem:[#allocation2 + $0x8e0] sm:$0xff]  ;;  %v588_v58 = vld [vmem:[#allocation2 + $0x928] sm:$0xff]  ;;  %v338_v4 = vld [vmem:[#allocation2 + $0x158] sm:$0xff]  ;;  %v2373_v9 = vpack.c.bf16 %v333_v0, %v329_v63 }
  0xb8   :  { %2362 = vmatpush1.bf16.msra.mxu1 %v2361_v32  ;;  %v2241_v17 = vpack.c.bf16 %v579_v53, %v575_v49  ;;  %v583_v62 = vld [vmem:[#allocation2 + $0x900] sm:$0xff]  ;;  %v2243_v1 = vpack.c.bf16 %v588_v58, %v584_v57  ;;  %v342_v5 = vld [vmem:[#allocation2 + $0x178] sm:$0xff]  ;;  %v592_v6 = vld [vmem:[#allocation2 + $0x948] sm:$0xff]  ;;  %v208_v49 = vrot.slane %v3128_v36, %v3213_v30  ;;  %vm3231_vm5 = vcmp.eq.s32.totalorder %v212_v40, 1 }
  0xb9   :  { %2364 = vmatprep.subr.bf16.mxu1 %v2363_v34  ;;  %v587_v3 = vld [vmem:[#allocation2 + $0x920] sm:$0xff]  ;;  %v596_v7 = vld [vmem:[#allocation2 + $0x968] sm:$0xff]  ;;  %v2375_v14 = vpack.c.bf16 %v342_v5, %v338_v4  ;;  %v337_v19 = vld [vmem:[#allocation2 + $0x150] sm:$0xff] }
  0xba   :  { %2234 = vmatpush1.bf16.msra.mxu0 %v2233_v33  ;;  %v2245_v13 = vpack.c.bf16 %v587_v3, %v583_v62  ;;  %v591_v16 = vld [vmem:[#allocation2 + $0x940] sm:$0xff]  ;;  %v341_v20 = vld [vmem:[#allocation2 + $0x170] sm:$0xff]  ;;  %v2247_v21 = vpack.c.bf16 %v596_v7, %v592_v6  ;;  %v346_v23 = vld [vmem:[#allocation2 + $0x198] sm:$0xff]  ;;  %v147_v33 = vrot.slane %v3109_v24, %v3210_v11  ;;  %vm3241_vm6 = vcmp.eq.s32.totalorder %v208_v49, 1 }
  0xbb   :  { %2236 = vmatprep.subr.bf16.mxu0 %v2235_v39  ;;  %v595_v22 = vld [vmem:[#allocation2 + $0x960] sm:$0xff]  ;;  %v350_v26 = vld [vmem:[#allocation2 + $0x1b8] sm:$0xff]  ;;  %v600_v27 = vld [vmem:[#allocation2 + $0x988] sm:$0xff]  ;;  %v2377_v32 = vpack.c.bf16 %v341_v20, %v337_v19 }
  0xbc   :  { %2366 = vmatpush1.bf16.msra.mxu1 %v2365_v45  ;;  %v604_v28 = vld [vmem:[#allocation2 + $0x9a8] sm:$0xff]  ;;  %v2249_v34 = vpack.c.bf16 %v595_v22, %v591_v16  ;;  %v2379_v35 = vpack.c.bf16 %v350_v26, %v346_v23  ;;  %v599_v37 = vld [vmem:[#allocation2 + $0x980] sm:$0xff]  ;;  %v345_v38 = vld [vmem:[#allocation2 + $0x190] sm:$0xff] }
  0xbd   :  { %2368 = vmatprep.subr.bf16.mxu1 %v2367_v48  ;;  %v349_v39 = vld [vmem:[#allocation2 + $0x1b0] sm:$0xff]  ;;  %v2251_v41 = vpack.c.bf16 %v604_v28, %v600_v27  ;;  %v603_v42 = vld [vmem:[#allocation2 + $0x9a0] sm:$0xff]  ;;  %v354_v43 = vld [vmem:[#allocation2 + $0x1d8] sm:$0xff]  ;;  %v143_v48 = vrot.slane %v3109_v24, %v3213_v30 }
  0xbe   :  { %2238 = vmatpush1.bf16.msra.mxu0 %v2237_v47  ;;  %v358_v44 = vld [vmem:[#allocation2 + $0x1f8] sm:$0xff]  ;;  %v608_v45 = vld [vmem:[#allocation2 + $0x9c8] sm:$0xff]  ;;  %v2381_v50 = vpack.c.bf16 %v349_v39, %v345_v38  ;;  %v607_v51 = vld [vmem:[#allocation2 + $0x9c0] sm:$0xff]  ;;  %v2253_v55 = vpack.c.bf16 %v603_v42, %v599_v37 }
  0xbf   :  { %2240 = vmatprep.subr.bf16.mxu0 %v2239_v52  ;;  %v612_v47 = vld [vmem:[#allocation2 + $0x9e8] sm:$0xff]  ;;  %v611_v52 = vld [vmem:[#allocation2 + $0x9e0] sm:$0xff]  ;;  %v2383_v57 = vpack.c.bf16 %v358_v44, %v354_v43  ;;  %v353_v58 = vld [vmem:[#allocation2 + $0x1d0] sm:$0xff] }
  0xc0   :  { %2370 = vmatpush1.bf16.msra.mxu1 %v2369_v2  ;;  %v120_v53 = vld [vmem:[%s3876_s0 + $0x28] sm:$0xff]  ;;  %v357_v2 = vld [vmem:[#allocation2 + $0x1f0] sm:$0xff]  ;;  %v2255_v63 = vpack.c.bf16 %v612_v47, %v608_v45  ;;  %v362_v0 = vld [vmem:[#allocation2 + $0x218] sm:$0xff]  ;;  %v2257_v20 = vpack.c.bf16 %v611_v52, %v607_v51 }
  0xc1   :  { %2372 = vmatprep.subr.bf16.mxu1 %v2371_v60  ;;  %v177_v60 = vld [vmem:[%s3877_s1 + $0x28] sm:$0xff]  ;;  %v119_v4 = vld [vmem:[%s3876_s0 + $0x20] sm:$0xff]  ;;  %v361_v23 = vld [vmem:[#allocation2 + $0x210] sm:$0xff] }
  0xc2   :  { %2242 = vmatpush1.bf16.msra.mxu0 %v2241_v17  ;;  %v169_v17 = vmul.f32 %v147_v33, %v120_v53  ;;  %v185_v3 = vmul.f32 %v177_v60, %v147_v33  ;;  %v616_v5 = vld [vmem:[#allocation2 + $0xa08] sm:$0xff]  ;;  %v168_v7 = vmul.f32 %v143_v48, %v119_v4  ;;  %v615_v22 = vld [vmem:[#allocation2 + $0xa00] sm:$0xff]  ;;  %v365_v26 = vld [vmem:[#allocation2 + $0x230] sm:$0xff] }
  0xc3   :  { %2244 = vmatprep.subr.bf16.mxu0 %v2243_v1  ;;  %v366_v1 = vld [vmem:[#allocation2 + $0x238] sm:$0xff]  ;;  %v620_v6 = vld [vmem:[#allocation2 + $0xa28] sm:$0xff]  ;;  %v2389_v40 = vpack.c.bf16 %v365_v26, %v361_v23  ;;  %v623_v43 = vld [vmem:[#allocation2 + $0xa40] sm:$0xff] }
  0xc4   :  { %2374 = vmatpush1.bf16.msra.mxu1 %v2373_v9  ;;  %v176_v9 = vld [vmem:[%s3877_s1 + $0x20] sm:$0xff]  ;;  %v234_v16 = vsel %vm3231_vm5, %v169_v17, %v185_v3  ;;  %v2259_v28 = vpack.c.bf16 %v620_v6, %v616_v5  ;;  %v370_v33 = vld [vmem:[#allocation2 + $0x258] sm:$0xff]  ;;  %v628_v37 = vld [vmem:[#allocation2 + $0xa68] sm:$0xff] }
  0xc5   :  { %2376 = vmatprep.subr.bf16.mxu1 %v2375_v14  ;;  %v2385_v14 = vpack.c.bf16 %v357_v2, %v353_v58  ;;  %v184_v19 = vmul.f32 %v176_v9, %v143_v48  ;;  %v3249_v27 = vadd.f32 %v262_v54, %v234_v16  ;;  %v369_v44 = vld [vmem:[#allocation2 + $0x250] sm:$0xff]  ;;  %v627_v48 = vld [vmem:[#allocation2 + $0xa60] sm:$0xff]  ;;  %v378_v49 = vld [vmem:[#allocation2 + $0x298] sm:$0xff] }
  0xc6   :  { %2246 = vmatpush1.bf16.msra.mxu0 %v2245_v13  ;;  %v258_v13 = vrot.slane %v3126_v31, %v3213_v30  ;;  %v374_v30 = vld [vmem:[#allocation2 + $0x278] sm:$0xff]  ;;  %v373_v45 = vld [vmem:[#allocation2 + $0x270] sm:$0xff]  ;;  %v632_v51 = vld [vmem:[#allocation2 + $0xa88] sm:$0xff]  ;;  %v2265_v54 = vpack.c.bf16 %v627_v48, %v623_v43 }
  0xc7   :  { %2248 = vmatprep.subr.bf16.mxu0 %v2247_v21  ;;  %v2387_v21 = vpack.c.bf16 %v366_v1, %v362_v0  ;;  %v292_v38 = vmax.f32 %v3249_v27, 0.0  ;;  %v2391_v42 = vpack.c.bf16 %v374_v30, %v370_v33  ;;  %v636_v52 = vld [vmem:[#allocation2 + $0xaa8] sm:$0xff]  ;;  %v2393_v53 = vpack.c.bf16 %v373_v45, %v369_v44  ;;  %v377_v58 = vld [vmem:[#allocation2 + $0x290] sm:$0xff]  ;;  %v635_v60 = vld [vmem:[#allocation2 + $0xaa0] sm:$0xff] }
  0xc8   :  { %2378 = vmatpush1.bf16.msra.mxu1 %v2377_v32  ;;  %v619_v32 = vld [vmem:[#allocation2 + $0xa20] sm:$0xff]  ;;  %v381_v2 = vld [vmem:[#allocation2 + $0x2b0] sm:$0xff]  ;;  %v2267_v17 = vpack.c.bf16 %v636_v52, %v632_v51  ;;  %v386_v62 = vld [vmem:[#allocation2 + $0x2d8] sm:$0xff] }
  0xc9   :  { %2380 = vmatprep.subr.bf16.mxu1 %v2379_v35  ;;  %v624_v35 = vld [vmem:[#allocation2 + $0xa48] sm:$0xff]  ;;  %1013 = vmatprep.mubr.f32.mxu0 %v292_v38  ;;  %v2397_v3 = vpack.c.bf16 %v381_v2, %v377_v58  ;;  %v639_v6 = vld [vmem:[#allocation2 + $0xac0] sm:$0xff]  ;;  %v389_v9 = vld [vmem:[#allocation2 + $0x2f0] sm:$0xff] }
  0xca   :  { %2250 = vmatpush1.bf16.msra.mxu0 %v2249_v34  ;;  %v233_v34 = vsel %vm3241_vm6, %v168_v7, %v184_v19  ;;  %v2263_v47 = vpack.c.bf16 %v628_v37, %v624_v35  ;;  %v640_v0 = vld [vmem:[#allocation2 + $0xac8] sm:$0xff]  ;;  %v385_v7 = vld [vmem:[#allocation2 + $0x2d0] sm:$0xff]  ;;  %v398_v16 = vld [vmem:[#allocation2 + $0x338] sm:$0xff] }
  0xcb   :  { %2252 = vmatprep.subr.bf16.mxu0 %v2251_v41  ;;  %v3254_v39 = vadd.f32 %v258_v13, %v233_v34  ;;  %v2261_v41 = vpack.c.bf16 %v619_v32, %v615_v22  ;;  %v644_v1 = vld [vmem:[#allocation2 + $0xae8] sm:$0xff]  ;;  %v643_v13 = vld [vmem:[#allocation2 + $0xae0] sm:$0xff]  ;;  %v397_v32 = vld [vmem:[#allocation2 + $0x330] sm:$0xff] }
  0xcc   :  { %2382 = vmatpush1.bf16.msra.mxu1 %v2381_v50  ;;  %v382_v50 = vld [vmem:[#allocation2 + $0x2b8] sm:$0xff]  ;;  %v2271_v11 = vpack.c.bf16 %v644_v1, %v640_v0  ;;  %v648_v19 = vld [vmem:[#allocation2 + $0xb08] sm:$0xff]  ;;  %v2273_v22 = vpack.c.bf16 %v643_v13, %v639_v6  ;;  %v647_v26 = vld [vmem:[#allocation2 + $0xb00] sm:$0xff] }
  0xcd   :  { %2384 = vmatprep.subr.bf16.mxu1 %v2383_v57  ;;  %v631_v57 = vld [vmem:[#allocation2 + $0xa80] sm:$0xff]  ;;  %v402_v34 = vld [vmem:[#allocation2 + $0x358] sm:$0xff]  ;;  %v656_v37 = vld [vmem:[#allocation2 + $0xb48] sm:$0xff] }
  0xce   :  { %2254 = vmatpush1.bf16.msra.mxu0 %v2253_v55  ;;  %v2395_v55 = vpack.c.bf16 %v382_v50, %v378_v49  ;;  %v2269_v4 = vpack.c.bf16 %v635_v60, %v631_v57  ;;  %v651_v30 = vld [vmem:[#allocation2 + $0xb20] sm:$0xff]  ;;  %v406_v35 = vld [vmem:[#allocation2 + $0x378] sm:$0xff]  ;;  %v401_v45 = vld [vmem:[#allocation2 + $0x350] sm:$0xff] }
  0xcf   :  { %2256 = vmatprep.subr.bf16.mxu0 %v2255_v63  ;;  %v390_v63 = vld [vmem:[#allocation2 + $0x2f8] sm:$0xff]  ;;  %v2407_v43 = vpack.c.bf16 %v406_v35, %v402_v34  ;;  %v655_v44 = vld [vmem:[#allocation2 + $0xb40] sm:$0xff]  ;;  %v664_v52 = vld [vmem:[#allocation2 + $0xb88] sm:$0xff]  ;;  %v3262_v34 = vsub.s32 6, %v3094_v59 }
  0xd0   :  { %2386 = vmatpush1.bf16.msra.mxu1 %v2385_v14  ;;  %v2399_v5 = vpack.c.bf16 %v390_v63, %v386_v62  ;;  %v394_v14 = vld [vmem:[#allocation2 + $0x318] sm:$0xff]  ;;  %v659_v49 = vld [vmem:[#allocation2 + $0xb60] sm:$0xff]  ;;  %v409_v2 = vld [vmem:[#allocation2 + $0x390] sm:$0xff] }
  0xd1   :  { %2388 = vmatprep.subr.bf16.mxu1 %v2387_v21  ;;  %v2401_v21 = vpack.c.bf16 %v389_v9, %v385_v7  ;;  %v2403_v23 = vpack.c.bf16 %v398_v16, %v394_v14  ;;  %v410_v50 = vld [vmem:[#allocation2 + $0x398] sm:$0xff]  ;;  %v663_v58 = vld [vmem:[#allocation2 + $0xb80] sm:$0xff]  ;;  %v672_v1 = vld [vmem:[#allocation2 + $0xbc8] sm:$0xff] }
  0xd2   :  { %2258 = vmatpush1.bf16.msra.mxu0 %v2257_v20  ;;  %v652_v20 = vld [vmem:[#allocation2 + $0xb28] sm:$0xff]  ;;  %v414_v51 = vld [vmem:[#allocation2 + $0x3b8] sm:$0xff]  ;;  %v667_v62 = vld [vmem:[#allocation2 + $0xba0] sm:$0xff] }
  0xd3   :  { %2260 = vmatprep.subr.bf16.mxu0 %v2259_v28  ;;  %v393_v28 = vld [vmem:[#allocation2 + $0x310] sm:$0xff]  ;;  %v2275_v33 = vpack.c.bf16 %v652_v20, %v648_v19  ;;  %v2411_v57 = vpack.c.bf16 %v414_v51, %v410_v50  ;;  %v418_v63 = vld [vmem:[#allocation2 + $0x3d8] sm:$0xff]  ;;  %v671_v7 = vld [vmem:[#allocation2 + $0xbc0] sm:$0xff] }
  0xd4   :  { %2390 = vmatpush1.bf16.msra.mxu1 %v2389_v40  ;;  %v660_v40 = vld [vmem:[#allocation2 + $0xb68] sm:$0xff]  ;;  %v422_v0 = vld [vmem:[#allocation2 + $0x3f8] sm:$0xff]  ;;  %v417_v9 = vld [vmem:[#allocation2 + $0x3d0] sm:$0xff] }
  0xd5   :  { %2392 = vmatprep.subr.bf16.mxu1 %v2391_v42  ;;  %v2277_v42 = vpack.c.bf16 %v651_v30, %v647_v26  ;;  %v2279_v48 = vpack.c.bf16 %v660_v40, %v656_v37  ;;  %v2415_v6 = vpack.c.bf16 %v422_v0, %v418_v63  ;;  %v675_v14 = vld [vmem:[#allocation2 + $0xbe0] sm:$0xff]  ;;  %v426_v16 = vld [vmem:[#allocation2 + $0x418] sm:$0xff]  ;;  %v680_v20 = vld [vmem:[#allocation2 + $0xc08] sm:$0xff] }
  0xd6   :  { %2262 = vmatpush1.bf16.msra.mxu0 %v2261_v41  ;;  %v2405_v41 = vpack.c.bf16 %v397_v32, %v393_v28  ;;  %v430_v19 = vld [vmem:[#allocation2 + $0x438] sm:$0xff]  ;;  %v2289_v26 = vpack.c.bf16 %v675_v14, %v671_v7  ;;  %v679_v32 = vld [vmem:[#allocation2 + $0xc00] sm:$0xff]  ;;  %v429_v30 = vld [vmem:[#allocation2 + $0x430] sm:$0xff] }
  0xd7   :  { %2264 = vmatprep.subr.bf16.mxu0 %v2263_v47  ;;  %v405_v47 = vld [vmem:[#allocation2 + $0x370] sm:$0xff]  ;;  %v2419_v28 = vpack.c.bf16 %v430_v19, %v426_v16  ;;  %v683_v37 = vld [vmem:[#allocation2 + $0xc20] sm:$0xff]  ;;  %v434_v40 = vld [vmem:[#allocation2 + $0x458] sm:$0xff] }
  0xd8   :  { %2394 = vmatpush1.bf16.msra.mxu1 %v2393_v53  ;;  %v668_v53 = vld [vmem:[#allocation2 + $0xba8] sm:$0xff]  ;;  %v2293_v51 = vpack.c.bf16 %v683_v37, %v679_v32  ;;  %v695_v63 = vld [vmem:[#allocation2 + $0xc80] sm:$0xff]  ;;  %v178_v14 = vld [vmem:[%s3877_s1 + $0x30] sm:$0xff] }
  0xd9   :  { %2396 = vmatprep.subr.bf16.mxu1 %v2395_v55  ;;  %v2281_v55 = vpack.c.bf16 %v659_v49, %v655_v44  ;;  %v2283_v60 = vpack.c.bf16 %v668_v53, %v664_v52  ;;  %v291_v44 = vmax.f32 %v3254_v39, 0.0  ;;  %v433_v53 = vld [vmem:[#allocation2 + $0x450] sm:$0xff]  ;;  %v699_v0 = vld [vmem:[#allocation2 + $0xca0] sm:$0xff]  ;;  %v454_v19 = vld [vmem:[#allocation2 + $0x4f8] sm:$0xff] }
  0xda   :  { %2266 = vmatpush1.bf16.msra.mxu0 %v2265_v54  ;;  %v2409_v54 = vpack.c.bf16 %v405_v47, %v401_v45  ;;  %v687_v47 = vld [vmem:[#allocation2 + $0xc40] sm:$0xff]  ;;  %v449_v37 = vld [vmem:[#allocation2 + $0x4d0] sm:$0xff]  ;;  %v474_v56 = vld [vmem:[#allocation2 + $0x598] sm:$0xff] }
  0xdb   :  { %2268 = vmatprep.subr.bf16.mxu0 %v2267_v17  ;;  %v413_v17 = vld [vmem:[#allocation2 + $0x3b0] sm:$0xff]  ;;  %v718_v39 = vld [vmem:[#allocation2 + $0xd38] sm:$0xff] }
  0xdc   :  { %2398 = vmatpush1.bf16.msra.mxu1 %v2397_v3  ;;  %v676_v3 = vld [vmem:[#allocation2 + $0xbe8] sm:$0xff]  ;;  %v473_v16 = vld [vmem:[#allocation2 + $0x590] sm:$0xff] }
  0xdd   :  { %2400 = vmatprep.subr.bf16.mxu1 %v2399_v5  ;;  %v2285_v5 = vpack.c.bf16 %v667_v62, %v663_v58  ;;  %v2287_v13 = vpack.c.bf16 %v676_v3, %v672_v1  ;;  %v151_v62 = vrot.slane %v3109_v24, %v3262_v34  ;;  %v577_v61 = vld [vmem:[#allocation2 + $0x8d0] sm:$0xff] }
  0xde   :  { %2270 = vmatpush1.bf16.msra.mxu0 %v2269_v4  ;;  %v2413_v4 = vpack.c.bf16 %v413_v17, %v409_v2  ;;  %v700_v2 = vld [vmem:[#allocation2 + $0xca8] sm:$0xff]  ;;  %v442_v17 = vld [vmem:[#allocation2 + $0x498] sm:$0xff] }
  0xdf   :  { %2272 = vmatprep.subr.bf16.mxu0 %v2271_v11  ;;  %v421_v11 = vld [vmem:[#allocation2 + $0x3f0] sm:$0xff] }
  0xe0   :  { %2402 = vmatpush1.bf16.msra.mxu1 %v2401_v21  ;;  %v684_v21 = vld [vmem:[#allocation2 + $0xc28] sm:$0xff] }
  0xe1   :  { %2404 = vmatprep.subr.bf16.mxu1 %v2403_v23  ;;  %v3259_v23 = vsub.s32 7, %v3094_v59  ;;  %v2291_v35 = vpack.c.bf16 %v684_v21, %v680_v20 }
  0xe2   :  { %2274 = vmatpush1.bf16.msra.mxu0 %v2273_v22  ;;  %v2417_v22 = vpack.c.bf16 %v421_v11, %v417_v9  ;;  %v179_v11 = vld [vmem:[%s3877_s1 + $0x38] sm:$0xff] }
  0xe3   :  { %2276 = vmatprep.subr.bf16.mxu0 %v2275_v33  ;;  %v425_v33 = vld [vmem:[#allocation2 + $0x410] sm:$0xff]  ;;  %v155_v49 = vrot.slane %v3109_v24, %v3259_v23  ;;  %v220_v50 = vrot.slane %v3128_v36, %v3259_v23  ;;  %v270_v1 = vrot.slane %v3126_v31, %v3259_v23  ;;  %v122_v24 = vld [vmem:[%s3876_s0 + $0x38] sm:$0xff]  ;;  %v704_v23 = vld [vmem:[#allocation2 + $0xcc8] sm:$0xff] }
  0xe4   :  { %2406 = vmatpush1.bf16.msra.mxu1 %v2405_v41  ;;  %v438_v41 = vld [vmem:[#allocation2 + $0x478] sm:$0xff]  ;;  %v2421_v45 = vpack.c.bf16 %v429_v30, %v425_v33 }
  0xe5   :  { %2408 = vmatprep.subr.bf16.mxu1 %v2407_v43  ;;  %v692_v43 = vld [vmem:[#allocation2 + $0xc68] sm:$0xff]  ;;  %v2423_v52 = vpack.c.bf16 %v438_v41, %v434_v40  ;;  %vm3282_vm7 = vcmp.eq.s32.totalorder %v220_v50, 1  ;;  %v171_v9 = vmul.f32 %v155_v49, %v122_v24  ;;  %v187_v20 = vmul.f32 %v179_v11, %v155_v49  ;;  %v453_v40 = vld [vmem:[#allocation2 + $0x4f0] sm:$0xff]  ;;  %v723_v24 = vld [vmem:[#allocation2 + $0xd60] sm:$0xff] }
  0xe6   :  { %2278 = vmatpush1.bf16.msra.mxu0 %v2277_v42  ;;  %v688_v42 = vld [vmem:[#allocation2 + $0xc48] sm:$0xff]  ;;  %v2433_v50 = vpack.c.bf16 %v453_v40, %v449_v37  ;;  %v739_v40 = vld [vmem:[#allocation2 + $0xde0] sm:$0xff] }
  0xe7   :  { %2280 = vmatprep.subr.bf16.mxu0 %v2279_v48  ;;  %v691_v48 = vld [vmem:[#allocation2 + $0xc60] sm:$0xff]  ;;  %v2295_v58 = vpack.c.bf16 %v692_v43, %v688_v42  ;;  %v236_v33 = vsel %vm3282_vm7, %v171_v9, %v187_v20  ;;  %v458_v43 = vld [vmem:[#allocation2 + $0x518] sm:$0xff] }
  0xe8   :  { %2410 = vmatpush1.bf16.msra.mxu1 %v2409_v54  ;;  %v437_v54 = vld [vmem:[#allocation2 + $0x470] sm:$0xff]  ;;  %v3307_v41 = vadd.f32 %v270_v1, %v236_v33  ;;  %v707_v42 = vld [vmem:[#allocation2 + $0xce0] sm:$0xff] }
  0xe9   :  { %2412 = vmatprep.subr.bf16.mxu1 %v2411_v57  ;;  %v216_v57 = vrot.slane %v3128_v36, %v3262_v34  ;;  %v2297_v36 = vpack.c.bf16 %v691_v48, %v687_v47  ;;  %v2425_v3 = vpack.c.bf16 %v437_v54, %v433_v53  ;;  %v712_v47 = vld [vmem:[#allocation2 + $0xd08] sm:$0xff]  ;;  %v711_v53 = vld [vmem:[#allocation2 + $0xd00] sm:$0xff]  ;;  %v457_v54 = vld [vmem:[#allocation2 + $0x510] sm:$0xff] }
  0xea   :  { %2282 = vmatpush1.bf16.msra.mxu0 %v2281_v55  ;;  %v696_v55 = vld [vmem:[#allocation2 + $0xc88] sm:$0xff]  ;;  %v294_v49 = vmax.f32 %v3307_v41, 0.0  ;;  %v731_v20 = vld [vmem:[#allocation2 + $0xda0] sm:$0xff]  ;;  %v713_v41 = vld [vmem:[#allocation2 + $0xd10] sm:$0xff] }
  0xeb   :  { %2284 = vmatprep.subr.bf16.mxu0 %v2283_v60  ;;  %v446_v60 = vld [vmem:[#allocation2 + $0x4b8] sm:$0xff]  ;;  %vm3297_vm8 = vcmp.eq.s32.totalorder %v216_v57, 1  ;;  %v716_v48 = vld [vmem:[#allocation2 + $0xd28] sm:$0xff] }
  0xec   :  { %2414 = vmatpush1.bf16.msra.mxu1 %v2413_v4  ;;  %v441_v4 = vld [vmem:[#allocation2 + $0x490] sm:$0xff]  ;;  %v2427_v7 = vpack.c.bf16 %v446_v60, %v442_v17  ;;  %v2307_v57 = vpack.c.bf16 %v716_v48, %v712_v47  ;;  %v470_v17 = vld [vmem:[#allocation2 + $0x578] sm:$0xff]  ;;  %v720_v60 = vld [vmem:[#allocation2 + $0xd48] sm:$0xff] }
  0xed   :  { %2416 = vmatprep.subr.bf16.mxu1 %v2415_v6  ;;  %v2299_v6 = vpack.c.bf16 %v700_v2, %v696_v55  ;;  %v461_v55 = vld [vmem:[#allocation2 + $0x530] sm:$0xff]  ;;  %v466_v2 = vld [vmem:[#allocation2 + $0x558] sm:$0xff] }
  0xee   :  { %2286 = vmatpush1.bf16.msra.mxu0 %v2285_v5  ;;  %v445_v5 = vld [vmem:[#allocation2 + $0x4b0] sm:$0xff]  ;;  %v2439_v1 = vpack.c.bf16 %v470_v17, %v466_v2  ;;  %v752_v2 = vld [vmem:[#allocation2 + $0xe48] sm:$0xff] }
  0xef   :  { %2288 = vmatprep.subr.bf16.mxu0 %v2287_v13  ;;  %v121_v13 = vld [vmem:[%s3876_s0 + $0x30] sm:$0xff]  ;;  %v2429_v32 = vpack.c.bf16 %v445_v5, %v441_v4  ;;  %v756_v17 = vld [vmem:[#allocation2 + $0xe68] sm:$0xff] }
  0xf0   :  { %2418 = vmatpush1.bf16.msra.mxu1 %v2417_v22  ;;  %v170_v21 = vmul.f32 %v151_v62, %v121_v13  ;;  %v186_v22 = vmul.f32 %v178_v14, %v151_v62  ;;  %v724_v62 = vld [vmem:[#allocation2 + $0xd68] sm:$0xff]  ;;  %v469_v4 = vld [vmem:[#allocation2 + $0x570] sm:$0xff]  ;;  %v727_v14 = vld [vmem:[#allocation2 + $0xd80] sm:$0xff] }
  0xf1   :  { %2420 = vmatprep.subr.bf16.mxu1 %v2419_v28  ;;  %v2301_v28 = vpack.c.bf16 %v699_v0, %v695_v63  ;;  %v2437_v63 = vpack.c.bf16 %v461_v55, %v457_v54  ;;  %v2311_v5 = vpack.c.bf16 %v724_v62, %v720_v60  ;;  %v747_v55 = vld [vmem:[#allocation2 + $0xe20] sm:$0xff] }
  0xf2   :  { %2290 = vmatpush1.bf16.msra.mxu0 %v2289_v26  ;;  %v708_v26 = vld [vmem:[#allocation2 + $0xce8] sm:$0xff]  ;;  %v235_v30 = vsel %vm3297_vm8, %v170_v21, %v186_v22  ;;  %v482_v21 = vld [vmem:[#allocation2 + $0x5d8] sm:$0xff] }
  0xf3   :  { %2292 = vmatprep.subr.bf16.mxu0 %v2291_v35  ;;  %1156 = vmatmul.mubr.f32.vlgmr.msra.gmra.mrb[2].mxu1 %v287_v8  ;;  %v266_v8 = vrot.slane %v3126_v31, %v3262_v34  ;;  %v450_v31 = vld [vmem:[#allocation2 + $0x4d8] sm:$0xff]  ;;  %v703_v35 = vld [vmem:[#allocation2 + $0xcc0] sm:$0xff] }
  0xf4   :  { %2422 = vmatpush1.bf16.msra.mxu1 %v2421_v45  ;;  %1226 = vmatprep.mubr.f32.mxu1 %v290_v29  ;;  %v2431_v34 = vpack.c.bf16 %v454_v19, %v450_v31  ;;  %v2303_v29 = vpack.c.bf16 %v708_v26, %v704_v23  ;;  %v462_v45 = vld [vmem:[#allocation2 + $0x538] sm:$0xff]  ;;  %v477_v31 = vld [vmem:[#allocation2 + $0x5b0] sm:$0xff]  ;;  %v736_v23 = vld [vmem:[#allocation2 + $0xdc8] sm:$0xff] }
  0xf5   :  { %1014 = vmatmul.mubr.f32.vlgmr.msra.gmra.mrb[0].mxu0 %v291_v44  ;;  %2424 = vmatprep.subr.bf16.mxu1 %v2423_v52  ;;  %v3309_v18 = vadd.f32 %v266_v8, %v235_v30  ;;  %v2435_v52 = vpack.c.bf16 %v462_v45, %v458_v43  ;;  %v478_v8 = vld [vmem:[#allocation2 + $0x5b8] sm:$0xff]  ;;  %v740_v26 = vld [vmem:[#allocation2 + $0xde8] sm:$0xff]  ;;  %v735_v30 = vld [vmem:[#allocation2 + $0xdc0] sm:$0xff] }
  0xf6   :  { %2294 = vmatpush1.bf16.msra.mxu0 %v2293_v51  ;;  %v2305_v51 = vpack.c.bf16 %v707_v42, %v703_v35  ;;  %1084 = vmatprep.mubr.f32.mxu0 %v294_v49  ;;  %v2443_v13 = vpack.c.bf16 %v478_v8, %v474_v56  ;;  %v486_v22 = vld [vmem:[#allocation2 + $0x5f8] sm:$0xff]  ;;  %v485_v35 = vld [vmem:[#allocation2 + $0x5f0] sm:$0xff]  ;;  %v2319_v37 = vpack.c.bf16 %v740_v26, %v736_v23  ;;  %v744_v43 = vld [vmem:[#allocation2 + $0xe08] sm:$0xff] }
  0xf7   :  { %2296 = vmatprep.subr.bf16.mxu0 %v2295_v58  ;;  %v715_v58 = vld [vmem:[#allocation2 + $0xd20] sm:$0xff]  ;;  %v2447_v33 = vpack.c.bf16 %v486_v22, %v482_v21  ;;  %v494_v42 = vld [vmem:[#allocation2 + $0x638] sm:$0xff]  ;;  %v748_v45 = vld [vmem:[#allocation2 + $0xe28] sm:$0xff]  ;;  %v2321_v48 = vpack.c.bf16 %v739_v40, %v735_v30 }
  0xf8   :  { %2426 = vmatpush1.bf16.msra.mxu1 %v2425_v3  ;;  %v2309_v0 = vpack.c.bf16 %v715_v58, %v711_v53  ;;  %v465_v3 = vld [vmem:[#allocation2 + $0x550] sm:$0xff]  ;;  %v2323_v54 = vpack.c.bf16 %v748_v45, %v744_v43  ;;  %v502_v58 = vld [vmem:[#allocation2 + $0x678] sm:$0xff]  ;;  %v760_v56 = vld [vmem:[#allocation2 + $0xe88] sm:$0xff] }
  0xf9   :  { %2428 = vmatprep.subr.bf16.mxu1 %v2427_v7  ;;  %v732_v7 = vld [vmem:[#allocation2 + $0xda8] sm:$0xff]  ;;  %v2441_v9 = vpack.c.bf16 %v469_v4, %v465_v3  ;;  %v493_v53 = vld [vmem:[#allocation2 + $0x630] sm:$0xff]  ;;  %v2327_v3 = vpack.c.bf16 %v756_v17, %v752_v2  ;;  %v755_v4 = vld [vmem:[#allocation2 + $0xe60] sm:$0xff] }
  0xfa   :  { %2298 = vmatpush1.bf16.msra.mxu0 %v2297_v36  ;;  %v719_v36 = vld [vmem:[#allocation2 + $0xd40] sm:$0xff]  ;;  %v764_v8 = vld [vmem:[#allocation2 + $0xea8] sm:$0xff]  ;;  %v517_v30 = vld [vmem:[#allocation2 + $0x6f0] sm:$0xff] }
  0xfb   :  { %2300 = vmatprep.subr.bf16.mxu0 %v2299_v6  ;;  %v728_v6 = vld [vmem:[#allocation2 + $0xd88] sm:$0xff]  ;;  %v2313_v11 = vpack.c.bf16 %v723_v24, %v719_v36  ;;  %v501_v36 = vld [vmem:[#allocation2 + $0x670] sm:$0xff]  ;;  %v510_v24 = vld [vmem:[#allocation2 + $0x6b8] sm:$0xff] }
  0xfc   :  { %2430 = vmatpush1.bf16.msra.mxu1 %v2429_v32  ;;  %v2315_v19 = vpack.c.bf16 %v732_v7, %v728_v6  ;;  %v2317_v32 = vpack.c.bf16 %v731_v20, %v727_v14  ;;  %v509_v14 = vld [vmem:[#allocation2 + $0x6b0] sm:$0xff]  ;;  %v518_v20 = vld [vmem:[#allocation2 + $0x6f8] sm:$0xff]  ;;  %v768_v21 = vld [vmem:[#allocation2 + $0xec8] sm:$0xff] }
  0xfd   :  { %2432 = vmatprep.subr.bf16.mxu1 %v2431_v34  ;;  %v481_v34 = vld [vmem:[#allocation2 + $0x5d0] sm:$0xff]  ;;  %v772_v22 = vld [vmem:[#allocation2 + $0xee8] sm:$0xff]  ;;  %v526_v40 = vld [vmem:[#allocation2 + $0x738] sm:$0xff] }
  0xfe   :  { %2302 = vmatpush1.bf16.msra.mxu0 %v2301_v28  ;;  %v2445_v28 = vpack.c.bf16 %v477_v31, %v473_v16  ;;  %v2449_v47 = vpack.c.bf16 %v485_v35, %v481_v34  ;;  %v2331_v16 = vpack.c.bf16 %v764_v8, %v760_v56  ;;  %v763_v31 = vld [vmem:[#allocation2 + $0xea0] sm:$0xff]  ;;  %v2335_v34 = vpack.c.bf16 %v772_v22, %v768_v21 }
  0xff   :  { %2304 = vmatprep.subr.bf16.mxu0 %v2303_v29  ;;  %v490_v29 = vld [vmem:[#allocation2 + $0x618] sm:$0xff]  ;;  %v771_v35 = vld [vmem:[#allocation2 + $0xee0] sm:$0xff] }
 0x100   :  { %2434 = vmatpush1.bf16.msra.mxu1 %v2433_v50  ;;  %v2451_v50 = vpack.c.bf16 %v494_v42, %v490_v29  ;;  %v776_v29 = vld [vmem:[#allocation2 + $0xf08] sm:$0xff] }
 0x101   :  { %2436 = vmatprep.subr.bf16.mxu1 %v2435_v52  ;;  %v489_v52 = vld [vmem:[#allocation2 + $0x610] sm:$0xff]  ;;  %v780_v42 = vld [vmem:[#allocation2 + $0xf28] sm:$0xff] }
 0x102   :  { %2306 = vmatpush1.bf16.msra.mxu0 %v2305_v51  ;;  %v743_v51 = vld [vmem:[#allocation2 + $0xe00] sm:$0xff]  ;;  %v2453_v60 = vpack.c.bf16 %v493_v53, %v489_v52  ;;  %v2339_v52 = vpack.c.bf16 %v780_v42, %v776_v29  ;;  %v553_v42 = vld [vmem:[#allocation2 + $0x810] sm:$0xff] }
 0x103   :  { %2308 = vmatprep.subr.bf16.mxu0 %v2307_v57  ;;  %v498_v57 = vld [vmem:[#allocation2 + $0x658] sm:$0xff]  ;;  %v2325_v62 = vpack.c.bf16 %v747_v55, %v743_v51  ;;  %v525_v51 = vld [vmem:[#allocation2 + $0x730] sm:$0xff]  ;;  %v779_v53 = vld [vmem:[#allocation2 + $0xf20] sm:$0xff] }
 0x104   :  { %2438 = vmatpush1.bf16.msra.mxu1 %v2437_v63  ;;  %v2455_v63 = vpack.c.bf16 %v502_v58, %v498_v57  ;;  %v534_v55 = vld [vmem:[#allocation2 + $0x778] sm:$0xff]  ;;  %v784_v57 = vld [vmem:[#allocation2 + $0xf48] sm:$0xff] }
 0x105   :  { %2440 = vmatprep.subr.bf16.mxu1 %v2439_v1  ;;  %v497_v1 = vld [vmem:[#allocation2 + $0x650] sm:$0xff]  ;;  %v788_v58 = vld [vmem:[#allocation2 + $0xf68] sm:$0xff] }
 0x106   :  { %2310 = vmatpush1.bf16.msra.mxu0 %v2309_v0  ;;  %v751_v0 = vld [vmem:[#allocation2 + $0xe40] sm:$0xff]  ;;  %v2457_v6 = vpack.c.bf16 %v501_v36, %v497_v1  ;;  %v2343_v1 = vpack.c.bf16 %v788_v58, %v784_v57 }
 0x107   :  { %2312 = vmatprep.subr.bf16.mxu0 %v2311_v5  ;;  %v506_v5 = vld [vmem:[#allocation2 + $0x698] sm:$0xff]  ;;  %v2329_v7 = vpack.c.bf16 %v755_v4, %v751_v0  ;;  %v533_v0 = vld [vmem:[#allocation2 + $0x770] sm:$0xff]  ;;  %v787_v36 = vld [vmem:[#allocation2 + $0xf60] sm:$0xff] }
 0x108   :  { %2442 = vmatpush1.bf16.msra.mxu1 %v2441_v9  ;;  %v2459_v9 = vpack.c.bf16 %v510_v24, %v506_v5  ;;  %v542_v4 = vld [vmem:[#allocation2 + $0x7b8] sm:$0xff]  ;;  %v792_v5 = vld [vmem:[#allocation2 + $0xf88] sm:$0xff] }
 0x109   :  { %2444 = vmatprep.subr.bf16.mxu1 %v2443_v13  ;;  %v505_v13 = vld [vmem:[#allocation2 + $0x690] sm:$0xff]  ;;  %v796_v24 = vld [vmem:[#allocation2 + $0xfa8] sm:$0xff] }
 0x10a   :  { %2314 = vmatpush1.bf16.msra.mxu0 %v2313_v11  ;;  %v759_v11 = vld [vmem:[#allocation2 + $0xe80] sm:$0xff]  ;;  %v2461_v23 = vpack.c.bf16 %v509_v14, %v505_v13  ;;  %v2347_v13 = vpack.c.bf16 %v796_v24, %v792_v5  ;;  %v585_v5 = vld [vmem:[#allocation2 + $0x910] sm:$0xff] }
 0x10b   :  { %2316 = vmatprep.subr.bf16.mxu0 %v2315_v19  ;;  %v514_v19 = vld [vmem:[#allocation2 + $0x6d8] sm:$0xff]  ;;  %v2333_v26 = vpack.c.bf16 %v763_v31, %v759_v11  ;;  %v541_v11 = vld [vmem:[#allocation2 + $0x7b0] sm:$0xff]  ;;  %v795_v14 = vld [vmem:[#allocation2 + $0xfa0] sm:$0xff] }
 0x10c   :  { %2446 = vmatpush1.bf16.msra.mxu1 %v2445_v28  ;;  %v2463_v28 = vpack.c.bf16 %v518_v20, %v514_v19  ;;  %v550_v31 = vld [vmem:[#allocation2 + $0x7f8] sm:$0xff]  ;;  %v800_v19 = vld [vmem:[#allocation2 + $0xfc8] sm:$0xff]  ;;  %v589_v24 = vld [vmem:[#allocation2 + $0x930] sm:$0xff] }
 0x10d   :  { %2448 = vmatprep.subr.bf16.mxu1 %v2447_v33  ;;  %v513_v33 = vld [vmem:[#allocation2 + $0x6d0] sm:$0xff]  ;;  %v804_v20 = vld [vmem:[#allocation2 + $0xfe8] sm:$0xff]  ;;  %v2501_v27 = vpack.c.bf16 %v589_v24, %v585_v5 }
 0x10e   :  { %2318 = vmatpush1.bf16.msra.mxu0 %v2317_v32  ;;  %v767_v32 = vld [vmem:[#allocation2 + $0xec0] sm:$0xff]  ;;  %v2465_v43 = vpack.c.bf16 %v517_v30, %v513_v33  ;;  %v2351_v33 = vpack.c.bf16 %v804_v20, %v800_v19  ;;  %v610_v19 = vld [vmem:[#allocation2 + $0x9d8] sm:$0xff]  ;;  %v657_v24 = vld [vmem:[#allocation2 + $0xb50] sm:$0xff] }
 0x10f   :  { %2320 = vmatprep.subr.bf16.mxu0 %v2319_v37  ;;  %v522_v37 = vld [vmem:[#allocation2 + $0x718] sm:$0xff]  ;;  %v2337_v45 = vpack.c.bf16 %v771_v35, %v767_v32  ;;  %v549_v32 = vld [vmem:[#allocation2 + $0x7f0] sm:$0xff]  ;;  %v803_v30 = vld [vmem:[#allocation2 + $0xfe0] sm:$0xff] }
 0x110   :  { %2450 = vmatpush1.bf16.msra.mxu1 %v2449_v47  ;;  %v2467_v47 = vpack.c.bf16 %v526_v40, %v522_v37  ;;  %v558_v35 = vld [vmem:[#allocation2 + $0x838] sm:$0xff] }
 0x111   :  { %2452 = vmatprep.subr.bf16.mxu1 %v2451_v50  ;;  %v521_v50 = vld [vmem:[#allocation2 + $0x710] sm:$0xff]  ;;  %v614_v20 = vld [vmem:[#allocation2 + $0x9f8] sm:$0xff] }
 0x112   :  { %2322 = vmatpush1.bf16.msra.mxu0 %v2321_v48  ;;  %v775_v48 = vld [vmem:[#allocation2 + $0xf00] sm:$0xff]  ;;  %v2469_v2 = vpack.c.bf16 %v525_v51, %v521_v50 }
 0x113   :  { %2324 = vmatprep.subr.bf16.mxu0 %v2323_v54  ;;  %v530_v54 = vld [vmem:[#allocation2 + $0x758] sm:$0xff]  ;;  %v2341_v17 = vpack.c.bf16 %v779_v53, %v775_v48  ;;  %v293_v48 = vmax.f32 %v3309_v18, 0.0  ;;  %v565_v53 = vld [vmem:[#allocation2 + $0x870] sm:$0xff]  ;;  %v1568_v18 = vld [vmem:[%s3883_s7] sm:$0xff] }
 0x114   :  { %2454 = vmatpush1.bf16.msra.mxu1 %v2453_v60  ;;  %v2471_v60 = vpack.c.bf16 %v534_v55, %v530_v54  ;;  %v570_v54 = vld [vmem:[#allocation2 + $0x898] sm:$0xff] }
 0x115   :  { %2456 = vmatprep.subr.bf16.mxu1 %v2455_v63  ;;  %v529_v63 = vld [vmem:[#allocation2 + $0x750] sm:$0xff]  ;;  %v574_v55 = vld [vmem:[#allocation2 + $0x8b8] sm:$0xff] }
 0x116   :  { %2326 = vmatpush1.bf16.msra.mxu0 %v2325_v62  ;;  %v783_v62 = vld [vmem:[#allocation2 + $0xf40] sm:$0xff]  ;;  %v2473_v56 = vpack.c.bf16 %v533_v0, %v529_v63  ;;  %v2491_v58 = vpack.c.bf16 %v574_v55, %v570_v54  ;;  %v637_v54 = vld [vmem:[#allocation2 + $0xab0] sm:$0xff]  ;;  %v642_v55 = vld [vmem:[#allocation2 + $0xad8] sm:$0xff] }
 0x117   :  { %2328 = vmatprep.subr.bf16.mxu0 %v2327_v3  ;;  %v538_v3 = vld [vmem:[#allocation2 + $0x798] sm:$0xff]  ;;  %v2345_v8 = vpack.c.bf16 %v787_v36, %v783_v62 }
 0x118   :  { %2458 = vmatpush1.bf16.msra.mxu1 %v2457_v6  ;;  %v2475_v6 = vpack.c.bf16 %v542_v4, %v538_v3  ;;  %v582_v62 = vld [vmem:[#allocation2 + $0x8f8] sm:$0xff] }
 0x119   :  { %2460 = vmatprep.subr.bf16.mxu1 %v2459_v9  ;;  %v537_v9 = vld [vmem:[#allocation2 + $0x790] sm:$0xff]  ;;  %v590_v36 = vld [vmem:[#allocation2 + $0x938] sm:$0xff] }
 0x11a   :  { %2330 = vmatpush1.bf16.msra.mxu0 %v2329_v7  ;;  %v791_v7 = vld [vmem:[#allocation2 + $0xf80] sm:$0xff]  ;;  %v2477_v21 = vpack.c.bf16 %v541_v11, %v537_v9  ;;  %v602_v9 = vld [vmem:[#allocation2 + $0x998] sm:$0xff] }
 0x11b   :  { %2332 = vmatprep.subr.bf16.mxu0 %v2331_v16  ;;  %v546_v16 = vld [vmem:[#allocation2 + $0x7d8] sm:$0xff]  ;;  %v2349_v22 = vpack.c.bf16 %v795_v14, %v791_v7  ;;  %v597_v7 = vld [vmem:[#allocation2 + $0x970] sm:$0xff] }
 0x11c   :  { %2462 = vmatpush1.bf16.msra.mxu1 %v2461_v23  ;;  %v2479_v23 = vpack.c.bf16 %v550_v31, %v546_v16  ;;  %v606_v11 = vld [vmem:[#allocation2 + $0x9b8] sm:$0xff]  ;;  %v601_v16 = vld [vmem:[#allocation2 + $0x990] sm:$0xff] }
 0x11d   :  { %2464 = vmatprep.subr.bf16.mxu1 %v2463_v28  ;;  %v545_v28 = vld [vmem:[#allocation2 + $0x7d0] sm:$0xff]  ;;  %v2507_v14 = vpack.c.bf16 %v606_v11, %v602_v9  ;;  %v674_v11 = vld [vmem:[#allocation2 + $0xbd8] sm:$0xff] }
 0x11e   :  { %2334 = vmatpush1.bf16.msra.mxu0 %v2333_v26  ;;  %v799_v26 = vld [vmem:[#allocation2 + $0xfc0] sm:$0xff]  ;;  %v2481_v37 = vpack.c.bf16 %v549_v32, %v545_v28  ;;  %v605_v31 = vld [vmem:[#allocation2 + $0x9b0] sm:$0xff]  ;;  %v618_v28 = vld [vmem:[#allocation2 + $0xa18] sm:$0xff] }
 0x11f   :  { %2336 = vmatprep.subr.bf16.mxu0 %v2335_v34  ;;  %v554_v34 = vld [vmem:[#allocation2 + $0x818] sm:$0xff]  ;;  %v2353_v40 = vpack.c.bf16 %v803_v30, %v799_v26  ;;  %v613_v26 = vld [vmem:[#allocation2 + $0x9f0] sm:$0xff] }
 0x120   :  { %2466 = vmatpush1.bf16.msra.mxu1 %v2465_v43  ;;  %v2483_v29 = vpack.c.bf16 %v558_v35, %v554_v34  ;;  %v557_v43 = vld [vmem:[#allocation2 + $0x830] sm:$0xff]  ;;  %v622_v32 = vld [vmem:[#allocation2 + $0xa38] sm:$0xff] }
 0x121   :  { %2468 = vmatprep.subr.bf16.mxu1 %v2467_v47  ;;  %v566_v47 = vld [vmem:[#allocation2 + $0x878] sm:$0xff]  ;;  %v2485_v50 = vpack.c.bf16 %v557_v43, %v553_v42  ;;  %v2515_v30 = vpack.c.bf16 %v622_v32, %v618_v28  ;;  %v617_v34 = vld [vmem:[#allocation2 + $0xa10] sm:$0xff] }
 0x122   :  { %2338 = vmatpush1.bf16.msra.mxu0 %v2337_v45  ;;  %v562_v45 = vld [vmem:[#allocation2 + $0x858] sm:$0xff]  ;;  %v621_v35 = vld [vmem:[#allocation2 + $0xa30] sm:$0xff] }
 0x123   :  { %2340 = vmatprep.subr.bf16.mxu0 %v2339_v52  ;;  %v2487_v51 = vpack.c.bf16 %v566_v47, %v562_v45  ;;  %v561_v52 = vld [vmem:[#allocation2 + $0x850] sm:$0xff]  ;;  %v634_v47 = vld [vmem:[#allocation2 + $0xa98] sm:$0xff] }
 0x124   :  { %2470 = vmatpush1.bf16.msra.mxu1 %v2469_v2  ;;  %v2489_v57 = vpack.c.bf16 %v565_v53, %v561_v52  ;;  %v569_v2 = vld [vmem:[#allocation2 + $0x890] sm:$0xff]  ;;  %v690_v32 = vld [vmem:[#allocation2 + $0xc58] sm:$0xff] }
 0x125   :  { %2472 = vmatprep.subr.bf16.mxu1 %v2471_v60  ;;  %v578_v60 = vld [vmem:[#allocation2 + $0x8d8] sm:$0xff]  ;;  %v625_v43 = vld [vmem:[#allocation2 + $0xa50] sm:$0xff] }
 0x126   :  { %2342 = vmatpush1.bf16.msra.mxu0 %v2341_v17  ;;  %v573_v17 = vld [vmem:[#allocation2 + $0x8b0] sm:$0xff]  ;;  %v2495_v0 = vpack.c.bf16 %v582_v62, %v578_v60  ;;  %v650_v62 = vld [vmem:[#allocation2 + $0xb18] sm:$0xff] }
 0x127   :  { %2344 = vmatprep.subr.bf16.mxu0 %v2343_v1  ;;  %v2493_v63 = vpack.c.bf16 %v573_v17, %v569_v2  ;;  %v586_v1 = vld [vmem:[#allocation2 + $0x918] sm:$0xff]  ;;  %v629_v45 = vld [vmem:[#allocation2 + $0xa70] sm:$0xff] }
 0x128   :  { %2474 = vmatpush1.bf16.msra.mxu1 %v2473_v56  ;;  %v2499_v4 = vpack.c.bf16 %v590_v36, %v586_v1  ;;  %v594_v56 = vld [vmem:[#allocation2 + $0x958] sm:$0xff]  ;;  %v633_v53 = vld [vmem:[#allocation2 + $0xa90] sm:$0xff] }
 0x129   :  { %2476 = vmatprep.subr.bf16.mxu1 %v2475_v6  ;;  %v593_v6 = vld [vmem:[#allocation2 + $0x950] sm:$0xff]  ;;  %v658_v36 = vld [vmem:[#allocation2 + $0xb58] sm:$0xff] }
 0x12a   :  { %2346 = vmatpush1.bf16.msra.mxu0 %v2345_v8  ;;  %v598_v8 = vld [vmem:[#allocation2 + $0x978] sm:$0xff]  ;;  %v641_v17 = vld [vmem:[#allocation2 + $0xad0] sm:$0xff] }
 0x12b   :  { %2348 = vmatprep.subr.bf16.mxu0 %v2347_v13  ;;  %v2505_v13 = vpack.c.bf16 %v597_v7, %v593_v6  ;;  %v645_v60 = vld [vmem:[#allocation2 + $0xaf0] sm:$0xff] }
 0x12c   :  { %2478 = vmatpush1.bf16.msra.mxu1 %v2477_v21  ;;  %v2509_v21 = vpack.c.bf16 %v605_v31, %v601_v16  ;;  %v653_v1 = vld [vmem:[#allocation2 + $0xb30] sm:$0xff] }
 0x12d   :  { %2480 = vmatprep.subr.bf16.mxu1 %v2479_v23  ;;  %v609_v23 = vld [vmem:[#allocation2 + $0x9d0] sm:$0xff] }
 0x12e   :  { %2350 = vmatpush1.bf16.msra.mxu0 %v2349_v22  ;;  %v2511_v22 = vpack.c.bf16 %v614_v20, %v610_v19  ;;  %v665_v7 = vld [vmem:[#allocation2 + $0xb90] sm:$0xff]  ;;  %v682_v20 = vld [vmem:[#allocation2 + $0xc18] sm:$0xff] }
 0x12f   :  { %2352 = vmatprep.subr.bf16.mxu0 %v2351_v33  ;;  %v2513_v33 = vpack.c.bf16 %v613_v26, %v609_v23  ;;  %v669_v9 = vld [vmem:[#allocation2 + $0xbb0] sm:$0xff] }
 0x130   :  { %2482 = vmatpush1.bf16.msra.mxu1 %v2481_v37  ;;  %v626_v37 = vld [vmem:[#allocation2 + $0xa58] sm:$0xff]  ;;  %v673_v31 = vld [vmem:[#allocation2 + $0xbd0] sm:$0xff] }
 0x131   :  { %2484 = vmatprep.subr.bf16.mxu1 %v2483_v29  ;;  %v2517_v29 = vpack.c.bf16 %v621_v35, %v617_v34  ;;  %v677_v19 = vld [vmem:[#allocation2 + $0xbf0] sm:$0xff] }
 0x132   :  { %2354 = vmatpush1.bf16.msra.mxu0 %v2353_v40  ;;  %v630_v40 = vld [vmem:[#allocation2 + $0xa78] sm:$0xff]  ;;  %v681_v26 = vld [vmem:[#allocation2 + $0xc10] sm:$0xff] }
 0x133   :  { %1227 = vmatmul.mubr.f32.vlgmr.msra.gmra.mrb[2].mxu1 %v289_v12  ;;  %v581_v12 = vld [vmem:[#allocation2 + $0x8f0] sm:$0xff]  ;;  %v2519_v42 = vpack.c.bf16 %v630_v40, %v626_v37  ;;  %v698_v40 = vld [vmem:[#allocation2 + $0xc98] sm:$0xff] }
 0x134   :  { %2486 = vmatpush1.bf16.msra.mxu1 %v2485_v50  ;;  %1297 = vmatprep.mubr.f32.mxu1 %v292_v38  ;;  %v2497_v3 = vpack.c.bf16 %v581_v12, %v577_v61  ;;  %v2503_v38 = vpack.c.bf16 %v598_v8, %v594_v56  ;;  %v638_v50 = vld [vmem:[#allocation2 + $0xab8] sm:$0xff]  ;;  %v649_v12 = vld [vmem:[#allocation2 + $0xb10] sm:$0xff] }
 0x135   :  { %1085 = vmatmul.mubr.f32.vlgmr.msra.gmra.mrb[0].mxu0 %v293_v48  ;;  %2488 = vmatprep.subr.bf16.mxu1 %v2487_v51  ;;  %v2521_v51 = vpack.c.bf16 %v629_v45, %v625_v43  ;;  %v2523_v52 = vpack.c.bf16 %v638_v50, %v634_v47  ;;  %v661_v56 = vld [vmem:[#allocation2 + $0xb70] sm:$0xff]  ;;  %v666_v8 = vld [vmem:[#allocation2 + $0xb98] sm:$0xff] }
 0x136   :  { %v685_v28 = vld [vmem:[#allocation2 + $0xc30] sm:$0xff]  ;;  %v706_v50 = vld [vmem:[#allocation2 + $0xcd8] sm:$0xff] }
 0x137   :  { %v689_v35 = vld [vmem:[#allocation2 + $0xc50] sm:$0xff] }
 0x138   :  { %2490 = vmatpush1.bf16.msra.mxu1 %v2489_v57  ;;  %v646_v57 = vld [vmem:[#allocation2 + $0xaf8] sm:$0xff]  ;;  %v693_v37 = vld [vmem:[#allocation2 + $0xc70] sm:$0xff] }
 0x139   :  { %2492 = vmatprep.subr.bf16.mxu1 %v2491_v58  ;;  %v2525_v58 = vpack.c.bf16 %v637_v54, %v633_v53  ;;  %v2527_v2 = vpack.c.bf16 %v646_v57, %v642_v55  ;;  %v697_v45 = vld [vmem:[#allocation2 + $0xc90] sm:$0xff]  ;;  %v714_v57 = vld [vmem:[#allocation2 + $0xd18] sm:$0xff] }
 0x13a   :  { %v701_v47 = vld [vmem:[#allocation2 + $0xcb0] sm:$0xff] }
 0x13b   :  { %v705_v54 = vld [vmem:[#allocation2 + $0xcd0] sm:$0xff] }
 0x13c   :  { %2494 = vmatpush1.bf16.msra.mxu1 %v2493_v63  ;;  %v654_v63 = vld [vmem:[#allocation2 + $0xb38] sm:$0xff]  ;;  %v709_v55 = vld [vmem:[#allocation2 + $0xcf0] sm:$0xff] }
 0x13d   :  { %2496 = vmatprep.subr.bf16.mxu1 %v2495_v0  ;;  %v2529_v0 = vpack.c.bf16 %v645_v60, %v641_v17  ;;  %v2531_v61 = vpack.c.bf16 %v654_v63, %v650_v62  ;;  %v726_v17 = vld [vmem:[#allocation2 + $0xd78] sm:$0xff]  ;;  %v721_v63 = vld [vmem:[#allocation2 + $0xd50] sm:$0xff] }
 0x140   :  { %2498 = vmatpush1.bf16.msra.mxu1 %v2497_v3  ;;  %v662_v3 = vld [vmem:[#allocation2 + $0xb78] sm:$0xff] }
 0x141   :  { %2500 = vmatprep.subr.bf16.mxu1 %v2499_v4  ;;  %v2533_v4 = vpack.c.bf16 %v653_v1, %v649_v12  ;;  %v2535_v5 = vpack.c.bf16 %v662_v3, %v658_v36  ;;  %v734_v12 = vld [vmem:[#allocation2 + $0xdb8] sm:$0xff]  ;;  %v729_v3 = vld [vmem:[#allocation2 + $0xd90] sm:$0xff] }
 0x144   :  { %2502 = vmatpush1.bf16.msra.mxu1 %v2501_v27  ;;  %v670_v27 = vld [vmem:[#allocation2 + $0xbb8] sm:$0xff] }
 0x145   :  { %2504 = vmatprep.subr.bf16.mxu1 %v2503_v38  ;;  %v2537_v38 = vpack.c.bf16 %v661_v56, %v657_v24  ;;  %v2539_v6 = vpack.c.bf16 %v670_v27, %v666_v8  ;;  %v738_v24 = vld [vmem:[#allocation2 + $0xdd8] sm:$0xff] }
 0x146   :  { %v742_v56 = vld [vmem:[#allocation2 + $0xdf8] sm:$0xff] }
 0x148   :  { %2506 = vmatpush1.bf16.msra.mxu1 %v2505_v13  ;;  %v678_v13 = vld [vmem:[#allocation2 + $0xbf8] sm:$0xff] }
 0x149   :  { %2508 = vmatprep.subr.bf16.mxu1 %v2507_v14  ;;  %v2541_v14 = vpack.c.bf16 %v669_v9, %v665_v7  ;;  %v2543_v16 = vpack.c.bf16 %v678_v13, %v674_v11  ;;  %v741_v7 = vld [vmem:[#allocation2 + $0xdf0] sm:$0xff]  ;;  %v746_v9 = vld [vmem:[#allocation2 + $0xe18] sm:$0xff] }
 0x14a   :  { %v750_v11 = vld [vmem:[#allocation2 + $0xe38] sm:$0xff] }
 0x14c   :  { %2510 = vmatpush1.bf16.msra.mxu1 %v2509_v21  ;;  %v686_v21 = vld [vmem:[#allocation2 + $0xc38] sm:$0xff] }
 0x14d   :  { %2512 = vmatprep.subr.bf16.mxu1 %v2511_v22  ;;  %v2545_v22 = vpack.c.bf16 %v677_v19, %v673_v31  ;;  %v2547_v23 = vpack.c.bf16 %v686_v21, %v682_v20  ;;  %v749_v31 = vld [vmem:[#allocation2 + $0xe30] sm:$0xff]  ;;  %v754_v19 = vld [vmem:[#allocation2 + $0xe58] sm:$0xff] }
 0x14e   :  { %v758_v20 = vld [vmem:[#allocation2 + $0xe78] sm:$0xff] }
 0x150   :  { %2514 = vmatpush1.bf16.msra.mxu1 %v2513_v33  ;;  %v694_v33 = vld [vmem:[#allocation2 + $0xc78] sm:$0xff] }
 0x151   :  { %2516 = vmatprep.subr.bf16.mxu1 %v2515_v30  ;;  %v2549_v30 = vpack.c.bf16 %v685_v28, %v681_v26  ;;  %v2551_v34 = vpack.c.bf16 %v694_v33, %v690_v32  ;;  %v757_v26 = vld [vmem:[#allocation2 + $0xe70] sm:$0xff]  ;;  %v762_v28 = vld [vmem:[#allocation2 + $0xe98] sm:$0xff] }
 0x152   :  { %v766_v32 = vld [vmem:[#allocation2 + $0xeb8] sm:$0xff] }
 0x154   :  { %2518 = vmatpush1.bf16.msra.mxu1 %v2517_v29  ;;  %v702_v29 = vld [vmem:[#allocation2 + $0xcb8] sm:$0xff] }
 0x155   :  { %2520 = vmatprep.subr.bf16.mxu1 %v2519_v42  ;;  %v2553_v42 = vpack.c.bf16 %v693_v37, %v689_v35  ;;  %v2555_v43 = vpack.c.bf16 %v702_v29, %v698_v40  ;;  %v765_v35 = vld [vmem:[#allocation2 + $0xeb0] sm:$0xff]  ;;  %v770_v37 = vld [vmem:[#allocation2 + $0xed8] sm:$0xff] }
 0x156   :  { %v774_v40 = vld [vmem:[#allocation2 + $0xef8] sm:$0xff] }
 0x158   :  { %2522 = vmatpush1.bf16.msra.mxu1 %v2521_v51  ;;  %v710_v51 = vld [vmem:[#allocation2 + $0xcf8] sm:$0xff] }
 0x159   :  { %2524 = vmatprep.subr.bf16.mxu1 %v2523_v52  ;;  %v2557_v52 = vpack.c.bf16 %v701_v47, %v697_v45  ;;  %v2559_v53 = vpack.c.bf16 %v710_v51, %v706_v50  ;;  %v773_v45 = vld [vmem:[#allocation2 + $0xef0] sm:$0xff]  ;;  %v778_v47 = vld [vmem:[#allocation2 + $0xf18] sm:$0xff] }
 0x15a   :  { %v782_v50 = vld [vmem:[#allocation2 + $0xf38] sm:$0xff] }
 0x15c   :  { %2526 = vmatpush1.bf16.msra.mxu1 %v2525_v58  ;;  %v2563_v58 = vpack.c.bf16 %v718_v39, %v714_v57  ;;  %v790_v57 = vld [vmem:[#allocation2 + $0xf78] sm:$0xff] }
 0x15d   :  { %2528 = vmatprep.subr.bf16.mxu1 %v2527_v2  ;;  %v722_v2 = vld [vmem:[#allocation2 + $0xd58] sm:$0xff] }
 0x15e   :  { %v2567_v62 = vpack.c.bf16 %v726_v17, %v722_v2  ;;  %v798_v2 = vld [vmem:[#allocation2 + $0xfb8] sm:$0xff] }
 0x160   :  { %2530 = vmatpush1.bf16.msra.mxu1 %v2529_v0  ;;  %v725_v0 = vld [vmem:[#allocation2 + $0xd70] sm:$0xff] }
 0x161   :  { %2532 = vmatprep.subr.bf16.mxu1 %v2531_v61  ;;  %v730_v61 = vld [vmem:[#allocation2 + $0xd98] sm:$0xff]  ;;  %v2569_v1 = vpack.c.bf16 %v725_v0, %v721_v63  ;;  %v797_v63 = vld [vmem:[#allocation2 + $0xfb0] sm:$0xff] }
 0x162   :  { %v2571_v36 = vpack.c.bf16 %v734_v12, %v730_v61  ;;  %v802_v0 = vld [vmem:[#allocation2 + $0xfd8] sm:$0xff] }
 0x163   :  { %v806_v61 = vld [vmem:[#allocation2 + $0xff8] sm:$0xff] }
 0x164   :  { %2534 = vmatpush1.bf16.msra.mxu1 %v2533_v4  ;;  %v733_v4 = vld [vmem:[#allocation2 + $0xdb0] sm:$0xff] }
 0x165   :  { %2536 = vmatprep.subr.bf16.mxu1 %v2535_v5  ;;  %v2573_v27 = vpack.c.bf16 %v733_v4, %v729_v3  ;;  %v805_v3 = vld [vmem:[#allocation2 + $0xff0] sm:$0xff] }
 0x168   :  { %2538 = vmatpush1.bf16.msra.mxu1 %v2537_v38  ;;  %v2575_v38 = vpack.c.bf16 %v742_v56, %v738_v24 }
 0x169   :  { %2540 = vmatprep.subr.bf16.mxu1 %v2539_v6  ;;  %v737_v6 = vld [vmem:[#allocation2 + $0xdd0] sm:$0xff] }
 0x16a   :  { %v2577_v13 = vpack.c.bf16 %v741_v7, %v737_v6  ;;  %v1569_v6 = vld [vmem:[%s3883_s7 + $0x8] sm:$0xff]  ;;  %v1571_v7 = vld [vmem:[%s3883_s7 + $0x18] sm:$0xff] }
 0x16c   :  { %2542 = vmatpush1.bf16.msra.mxu1 %v2541_v14  ;;  %v2579_v14 = vpack.c.bf16 %v750_v11, %v746_v9  ;;  %v2611_v9 = vpack.c.bf16 %v1571_v7, %v1569_v6  ;;  %v1575_v11 = vld [vmem:[%s3883_s7 + $0x38] sm:$0xff]  ;;  %v1604_v6 = vld [vmem:[%s3883_s7 + $0x120] sm:$0xff]  ;;  %v1606_v7 = vld [vmem:[%s3883_s7 + $0x130] sm:$0xff] }
 0x16d   :  { %2544 = vmatprep.subr.bf16.mxu1 %v2543_v16  ;;  %v745_v16 = vld [vmem:[#allocation2 + $0xe10] sm:$0xff] }
 0x16e   :  { %v2581_v21 = vpack.c.bf16 %v749_v31, %v745_v16  ;;  %2612 = vmatprep.subr.bf16.mxu0 %v2611_v9  ;;  %v1574_v16 = vld [vmem:[%s3883_s7 + $0x30] sm:$0xff]  ;;  %v2649_v9 = vpack.c.bf16 %v1606_v7, %v1604_v6 }
 0x170   :  { %2546 = vmatpush1.bf16.msra.mxu1 %v2545_v22  ;;  %v2583_v22 = vpack.c.bf16 %v758_v20, %v754_v19  ;;  %v1577_v19 = vld [vmem:[%s3883_s7 + $0x48] sm:$0xff]  ;;  %v1579_v20 = vld [vmem:[%s3883_s7 + $0x58] sm:$0xff] }
 0x171   :  { %2548 = vmatprep.subr.bf16.mxu1 %v2547_v23  ;;  %v753_v23 = vld [vmem:[#allocation2 + $0xe50] sm:$0xff] }
 0x172   :  { %v2585_v33 = vpack.c.bf16 %v757_v26, %v753_v23  ;;  %v1578_v23 = vld [vmem:[%s3883_s7 + $0x50] sm:$0xff] }
 0x173   :  { %1298 = vmatmul.mubr.f32.vlgmr.msra.gmra.mrb[2].mxu1 %v291_v44  ;;  %v2561_v44 = vpack.c.bf16 %v709_v55, %v705_v54  ;;  %v781_v54 = vld [vmem:[#allocation2 + $0xf30] sm:$0xff]  ;;  %v786_v55 = vld [vmem:[#allocation2 + $0xf58] sm:$0xff] }
 0x174   :  { %2550 = vmatpush1.bf16.msra.mxu1 %v2549_v30  ;;  %1368 = vmatprep.mubr.f32.mxu1 %v294_v49  ;;  %v717_v49 = vld [vmem:[#allocation2 + $0xd30] sm:$0xff]  ;;  %v2587_v30 = vpack.c.bf16 %v766_v32, %v762_v28  ;;  %v1581_v28 = vld [vmem:[%s3883_s7 + $0x68] sm:$0xff]  ;;  %v1583_v32 = vld [vmem:[%s3883_s7 + $0x78] sm:$0xff] }
 0x175   :  { %2552 = vmatprep.subr.bf16.mxu1 %v2551_v34  ;;  %v2565_v60 = vpack.c.bf16 %v717_v49, %v713_v41  ;;  %v761_v34 = vld [vmem:[#allocation2 + $0xe90] sm:$0xff]  ;;  %v794_v49 = vld [vmem:[#allocation2 + $0xf98] sm:$0xff] }
 0x176   :  { %v2589_v29 = vpack.c.bf16 %v765_v35, %v761_v34  ;;  %v789_v41 = vld [vmem:[#allocation2 + $0xf70] sm:$0xff] }
 0x177   :  { %v1582_v34 = vld [vmem:[%s3883_s7 + $0x70] sm:$0xff] }
 0x178   :  { %2554 = vmatpush1.bf16.msra.mxu1 %v2553_v42  ;;  %v2591_v42 = vpack.c.bf16 %v774_v40, %v770_v37  ;;  %v1585_v37 = vld [vmem:[%s3883_s7 + $0x88] sm:$0xff]  ;;  %v1587_v40 = vld [vmem:[%s3883_s7 + $0x98] sm:$0xff] }
 0x179   :  { %2556 = vmatprep.subr.bf16.mxu1 %v2555_v43  ;;  %v769_v43 = vld [vmem:[#allocation2 + $0xed0] sm:$0xff] }
 0x17a   :  { %v2593_v51 = vpack.c.bf16 %v773_v45, %v769_v43  ;;  %v1586_v43 = vld [vmem:[%s3883_s7 + $0x90] sm:$0xff] }
 0x17c   :  { %2558 = vmatpush1.bf16.msra.mxu1 %v2557_v52  ;;  %v2595_v52 = vpack.c.bf16 %v782_v50, %v778_v47  ;;  %v1589_v47 = vld [vmem:[%s3883_s7 + $0xa8] sm:$0xff]  ;;  %v1591_v50 = vld [vmem:[%s3883_s7 + $0xb8] sm:$0xff] }
 0x17d   :  { %2560 = vmatprep.subr.bf16.mxu1 %v2559_v53  ;;  %v777_v53 = vld [vmem:[#allocation2 + $0xf10] sm:$0xff] }
 0x17e   :  { %v2597_v39 = vpack.c.bf16 %v781_v54, %v777_v53  ;;  %v1590_v53 = vld [vmem:[%s3883_s7 + $0xb0] sm:$0xff] }
 0x180   :  { %2562 = vmatpush1.bf16.msra.mxu1 %v2561_v44  ;;  %v2599_v44 = vpack.c.bf16 %v790_v57, %v786_v55  ;;  %v1593_v55 = vld [vmem:[%s3883_s7 + $0xc8] sm:$0xff]  ;;  %v1595_v57 = vld [vmem:[%s3883_s7 + $0xd8] sm:$0xff] }
 0x181   :  { %2564 = vmatprep.subr.bf16.mxu1 %v2563_v58  ;;  %v785_v58 = vld [vmem:[#allocation2 + $0xf50] sm:$0xff] }
 0x182   :  { %v2601_v17 = vpack.c.bf16 %v789_v41, %v785_v58  ;;  %v1594_v58 = vld [vmem:[%s3883_s7 + $0xd0] sm:$0xff] }
 0x184   :  { %2566 = vmatpush1.bf16.msra.mxu1 %v2565_v60  ;;  %v2603_v60 = vpack.c.bf16 %v798_v2, %v794_v49  ;;  %v1597_v49 = vld [vmem:[%s3883_s7 + $0xe8] sm:$0xff]  ;;  %v1599_v2 = vld [vmem:[%s3883_s7 + $0xf8] sm:$0xff] }
 0x185   :  { %2568 = vmatprep.subr.bf16.mxu1 %v2567_v62  ;;  %v793_v62 = vld [vmem:[#allocation2 + $0xf90] sm:$0xff] }
 0x186   :  { %v3325_v5 = vpop.f32.mrb[0].mxu1  ;;  %v2605_v12 = vpack.c.bf16 %v797_v63, %v793_v62  ;;  %v1598_v62 = vld [vmem:[%s3883_s7 + $0xf0] sm:$0xff] }
 0x187   :  { %v3327_v8 = vpop.f32.mrb[1].mxu1 }
 0x188   :  { %2570 = vmatpush1.bf16.msra.mxu1 %v2569_v1  ;;  %v2607_v1 = vpack.c.bf16 %v806_v61, %v802_v0  ;;  %v1601_v0 = vld [vmem:[%s3883_s7 + $0x108] sm:$0xff]  ;;  %v1603_v61 = vld [vmem:[%s3883_s7 + $0x118] sm:$0xff] }
 0x189   :  { %2572 = vmatprep.subr.bf16.mxu1 %v2571_v36  ;;  %v801_v36 = vld [vmem:[#allocation2 + $0xfd0] sm:$0xff] }
 0x18a   :  { %v2609_v4 = vpack.c.bf16 %v805_v3, %v801_v36  ;;  %v1602_v36 = vld [vmem:[%s3883_s7 + $0x110] sm:$0xff] }
 0x18c   :  { %2574 = vmatpush1.bf16.msra.mxu1 %v2573_v27 }
 0x18d   :  { %2576 = vmatprep.subr.bf16.mxu1 %v2575_v38 }
 0x190   :  { %2578 = vmatpush1.bf16.msra.mxu1 %v2577_v13 }
 0x191   :  { %2580 = vmatprep.subr.bf16.mxu1 %v2579_v14  ;;  %v1572_v14 = vld [vmem:[%s3883_s7 + $0x20] sm:$0xff] }
 0x192   :  { %v2617_v31 = vpack.c.bf16 %v1574_v16, %v1572_v14  ;;  %v1613_v14 = vld [vmem:[%s3883_s7 + $0x168] sm:$0xff]  ;;  %v1615_v16 = vld [vmem:[%s3883_s7 + $0x178] sm:$0xff] }
 0x194   :  { %2582 = vmatpush1.bf16.msra.mxu1 %v2581_v21  ;;  %v2619_v21 = vpack.c.bf16 %v1579_v20, %v1577_v19  ;;  %v1612_v19 = vld [vmem:[%s3883_s7 + $0x160] sm:$0xff]  ;;  %v1614_v20 = vld [vmem:[%s3883_s7 + $0x170] sm:$0xff] }
 0x195   :  { %2584 = vmatprep.subr.bf16.mxu1 %v2583_v22  ;;  %v1576_v22 = vld [vmem:[%s3883_s7 + $0x40] sm:$0xff] }
 0x196   :  { %v2621_v26 = vpack.c.bf16 %v1578_v23, %v1576_v22  ;;  %v1617_v22 = vld [vmem:[%s3883_s7 + $0x188] sm:$0xff]  ;;  %v1619_v23 = vld [vmem:[%s3883_s7 + $0x198] sm:$0xff] }
 0x198   :  { %2586 = vmatpush1.bf16.msra.mxu1 %v2585_v33  ;;  %v2623_v33 = vpack.c.bf16 %v1583_v32, %v1581_v28  ;;  %v1616_v28 = vld [vmem:[%s3883_s7 + $0x180] sm:$0xff]  ;;  %v1618_v32 = vld [vmem:[%s3883_s7 + $0x190] sm:$0xff] }
 0x199   :  { %2588 = vmatprep.subr.bf16.mxu1 %v2587_v30  ;;  %v1580_v30 = vld [vmem:[%s3883_s7 + $0x60] sm:$0xff] }
 0x19a   :  { %v2625_v35 = vpack.c.bf16 %v1582_v34, %v1580_v30  ;;  %v1621_v30 = vld [vmem:[%s3883_s7 + $0x1a8] sm:$0xff]  ;;  %v1623_v34 = vld [vmem:[%s3883_s7 + $0x1b8] sm:$0xff] }
 0x19c   :  { %2590 = vmatpush1.bf16.msra.mxu1 %v2589_v29  ;;  %v2627_v29 = vpack.c.bf16 %v1587_v40, %v1585_v37  ;;  %v2663_v37 = vpack.c.bf16 %v1623_v34, %v1621_v30  ;;  %v1622_v40 = vld [vmem:[%s3883_s7 + $0x1b0] sm:$0xff] }
 0x19d   :  { %2592 = vmatprep.subr.bf16.mxu1 %v2591_v42  ;;  %v1584_v42 = vld [vmem:[%s3883_s7 + $0x80] sm:$0xff] }
 0x19e   :  { %v2629_v45 = vpack.c.bf16 %v1586_v43, %v1584_v42  ;;  %v1627_v42 = vld [vmem:[%s3883_s7 + $0x1d8] sm:$0xff] }
 0x1a0   :  { %2594 = vmatpush1.bf16.msra.mxu1 %v2593_v51  ;;  %v2631_v51 = vpack.c.bf16 %v1591_v50, %v1589_v47  ;;  %v1624_v47 = vld [vmem:[%s3883_s7 + $0x1c0] sm:$0xff]  ;;  %v1626_v50 = vld [vmem:[%s3883_s7 + $0x1d0] sm:$0xff] }
 0x1a1   :  { %2596 = vmatprep.subr.bf16.mxu1 %v2595_v52  ;;  %v1588_v52 = vld [vmem:[%s3883_s7 + $0xa0] sm:$0xff] }
 0x1a2   :  { %v2633_v54 = vpack.c.bf16 %v1590_v53, %v1588_v52  ;;  %v1631_v52 = vld [vmem:[%s3883_s7 + $0x1f8] sm:$0xff]  ;;  %v2669_v53 = vpack.c.bf16 %v1626_v50, %v1624_v47 }
 0x1a4   :  { %2598 = vmatpush1.bf16.msra.mxu1 %v2597_v39  ;;  %v2635_v39 = vpack.c.bf16 %v1595_v57, %v1593_v55  ;;  %v1628_v55 = vld [vmem:[%s3883_s7 + $0x1e0] sm:$0xff]  ;;  %v1630_v57 = vld [vmem:[%s3883_s7 + $0x1f0] sm:$0xff] }
 0x1a5   :  { %2600 = vmatprep.subr.bf16.mxu1 %v2599_v44  ;;  %v1592_v44 = vld [vmem:[%s3883_s7 + $0xc0] sm:$0xff] }
 0x1a6   :  { %v2637_v41 = vpack.c.bf16 %v1594_v58, %v1592_v44  ;;  %v1633_v44 = vld [vmem:[%s3883_s7 + $0x208] sm:$0xff]  ;;  %v1635_v58 = vld [vmem:[%s3883_s7 + $0x218] sm:$0xff] }
 0x1a8   :  { %2602 = vmatpush1.bf16.msra.mxu1 %v2601_v17  ;;  %v2639_v17 = vpack.c.bf16 %v1599_v2, %v1597_v49 }
 0x1a9   :  { %2604 = vmatprep.subr.bf16.mxu1 %v2603_v60  ;;  %v1596_v60 = vld [vmem:[%s3883_s7 + $0xe0] sm:$0xff] }
 0x1aa   :  { %v2641_v63 = vpack.c.bf16 %v1598_v62, %v1596_v60 }
 0x1ac   :  { %2606 = vmatpush1.bf16.msra.mxu1 %v2605_v12  ;;  %v2643_v12 = vpack.c.bf16 %v1603_v61, %v1601_v0 }
 0x1ad   :  { %2608 = vmatprep.subr.bf16.mxu1 %v2607_v1  ;;  %v1600_v1 = vld [vmem:[%s3883_s7 + $0x100] sm:$0xff] }
 0x1ae   :  { %v2645_v3 = vpack.c.bf16 %v1602_v36, %v1600_v1 }
 0x1b0   :  { %2610 = vmatpush1.bf16.msra.mxu1 %v2609_v4  ;;  %v1605_v4 = vld [vmem:[%s3883_s7 + $0x128] sm:$0xff] }
 0x1b3   :  { %1369 = vmatmul.mubr.f32.vlgmr.msra.gmra.mrb[2].mxu1 %v293_v48  ;;  %v1570_v48 = vld [vmem:[%s3883_s7 + $0x10] sm:$0xff] }
 0x208   :  { %v1086_v24 = vpop.f32.mrb[0].mxu0 }
 0x209   :  { %v3332_v56 = vadd.f32 %v1086_v24, %v3325_v5  ;;  %v1088_v27 = vpop.f32.mrb[1].mxu0  ;;  %v2613_v5 = vpack.c.bf16 %v1570_v48, %v1568_v18  ;;  %v1607_v24 = vld [vmem:[%s3883_s7 + $0x138] sm:$0xff]  ;;  %v1609_v18 = vld [vmem:[%s3883_s7 + $0x148] sm:$0xff] }
 0x20a   :  { %v3335_v38 = vadd.f32 %v1088_v27, %v3327_v8  ;;  %v1573_v8 = vld [vmem:[%s3883_s7 + $0x28] sm:$0xff]  ;;  %v2647_v27 = vpack.c.bf16 %v1607_v24, %v1605_v4  ;;  %v1611_v48 = vld [vmem:[%s3883_s7 + $0x158] sm:$0xff] }
 0x20b   :  { %2614 = vmatpush1.bf16.msra.mxu0 %v2613_v5  ;;  %v2615_v13 = vpack.c.bf16 %v1575_v11, %v1573_v8  ;;  %v2651_v5 = vpack.c.bf16 %v1611_v48, %v1609_v18  ;;  %v1608_v8 = vld [vmem:[%s3883_s7 + $0x140] sm:$0xff]  ;;  %v1610_v11 = vld [vmem:[%s3883_s7 + $0x150] sm:$0xff]  ;;  %v1377_v49 = vrot.slane %v3332_v56, 4 }
 0x20c   :  { %v1383_v2 = vrot.slane %v3335_v38, 4 }
 0x20d   :  { %2616 = vmatprep.subr.bf16.mxu0 %v2615_v13  ;;  %v2653_v13 = vpack.c.bf16 %v1610_v11, %v1608_v8 }
 0x20e   :  { %v1384_v60 = vadd.f32 %v3335_v38, %v1383_v2 }
 0x20f   :  { %2618 = vmatpush1.bf16.msra.mxu0 %v2617_v31  ;;  %v2655_v31 = vpack.c.bf16 %v1615_v16, %v1613_v14 }
 0x210   :  { %2620 = vmatprep.subr.bf16.mxu0 %v2619_v21  ;;  %v2657_v21 = vpack.c.bf16 %v1614_v20, %v1612_v19 }
 0x213   :  { %2622 = vmatpush1.bf16.msra.mxu0 %v2621_v26  ;;  %v2659_v26 = vpack.c.bf16 %v1619_v23, %v1617_v22 }
 0x214   :  { %2624 = vmatprep.subr.bf16.mxu0 %v2623_v33  ;;  %v2661_v33 = vpack.c.bf16 %v1618_v32, %v1616_v28 }
 0x217   :  { %2626 = vmatpush1.bf16.msra.mxu0 %v2625_v35  ;;  %v1620_v35 = vld [vmem:[%s3883_s7 + $0x1a0] sm:$0xff] }
 0x218   :  { %2628 = vmatprep.subr.bf16.mxu0 %v2627_v29  ;;  %v1625_v29 = vld [vmem:[%s3883_s7 + $0x1c8] sm:$0xff]  ;;  %v2665_v43 = vpack.c.bf16 %v1622_v40, %v1620_v35 }
 0x21b   :  { %2630 = vmatpush1.bf16.msra.mxu0 %v2629_v45  ;;  %v2667_v45 = vpack.c.bf16 %v1627_v42, %v1625_v29 }
 0x21c   :  { %2632 = vmatprep.subr.bf16.mxu0 %v2631_v51  ;;  %v1629_v51 = vld [vmem:[%s3883_s7 + $0x1e8] sm:$0xff] }
 0x21f   :  { %2634 = vmatpush1.bf16.msra.mxu0 %v2633_v54  ;;  %v2671_v54 = vpack.c.bf16 %v1631_v52, %v1629_v51 }
 0x220   :  { %2636 = vmatprep.subr.bf16.mxu0 %v2635_v39  ;;  %v2673_v39 = vpack.c.bf16 %v1630_v57, %v1628_v55 }
 0x223   :  { %2638 = vmatpush1.bf16.msra.mxu0 %v2637_v41  ;;  %v2675_v41 = vpack.c.bf16 %v1635_v58, %v1633_v44 }
 0x224   :  { %2640 = vmatprep.subr.bf16.mxu0 %v2639_v17  ;;  %v1378_v17 = vadd.f32 %v3332_v56, %v1377_v49 }
 0x226   :  { %v1379_v62 = vrot.slane %v1378_v17, 2 }
 0x227   :  { %2642 = vmatpush1.bf16.msra.mxu0 %v2641_v63  ;;  %v1385_v63 = vrot.slane %v1384_v60, 2 }
 0x228   :  { %2644 = vmatprep.subr.bf16.mxu0 %v2643_v12  ;;  %v1380_v0 = vadd.f32 %v1379_v62, %v1378_v17 }
 0x229   :  { %v1386_v61 = vadd.f32 %v1385_v63, %v1384_v60 }
 0x22a   :  { %v1381_v12 = vrot.slane %v1380_v0, 1 }
 0x22b   :  { %2646 = vmatpush1.bf16.msra.mxu0 %v2645_v3  ;;  %v1387_v1 = vrot.slane %v1386_v61, 1 }
 0x22c   :  { %2648 = vmatprep.subr.bf16.mxu0 %v2647_v27  ;;  %v1382_v36 = vadd.f32 %v1381_v12, %v1380_v0 }
 0x22d   :  { %v1388_v3 = vadd.f32 %v1387_v1, %v1386_v61 }
 0x22e   :  { %v3539_v4 = vmul.f32 0.125, %v1382_v36 }
 0x22f   :  { %2650 = vmatpush1.bf16.msra.mxu0 %v2649_v9  ;;  %v3541_v24 = vmul.f32 0.125, %v1388_v3 }
 0x230   :  { %2652 = vmatprep.subr.bf16.mxu0 %v2651_v5  ;;  %v1406_v27 = vsub.f32 %v3332_v56, %v3539_v4 }
 0x231   :  { %v1407_v6 = vsub.f32 %v3335_v38, %v3541_v24 }
 0x232   :  { %v1410_v7 = vmul.f32 %v1406_v27, %v1406_v27 }
 0x233   :  { %2654 = vmatpush1.bf16.msra.mxu0 %v2653_v13  ;;  %v1411_v9 = vmul.f32 %v1407_v6, %v1407_v6  ;;  %v2956_v6 = vmov 1966171168  }
 0x234   :  { %2656 = vmatprep.subr.bf16.mxu0 %v2655_v31  ;;  %v1414_v18 = vrot.slane %v1410_v7, 4 }
 0x235   :  { %v1420_v48 = vrot.slane %v1411_v9, 4 }
 0x236   :  { %v1415_v14 = vadd.f32 %v1414_v18, %v1410_v7  ;;  %v1457_v7 = vunpack.c.l.s4 %v2956_v6  ;;  %v1647_v6 = vld [vmem:[%s3883_s7 + $0x278] sm:$0xff] }
 0x237   :  { %2658 = vmatpush1.bf16.msra.mxu0 %v2657_v21  ;;  %v1421_v31 = vadd.f32 %v1420_v48, %v1411_v9 }
 0x238   :  { %2660 = vmatprep.subr.bf16.mxu0 %v2659_v26  ;;  %v1416_v22 = vrot.slane %v1415_v14, 2  ;;  %v1458_v18 = vunpack.c.0.s8 %v1457_v7 }
 0x239   :  { %v1422_v26 = vrot.slane %v1421_v31, 2 }
 0x23a   :  { %v1417_v30 = vadd.f32 %v1416_v22, %v1415_v14  ;;  %v3558_v14 = vsub.s32 %v1458_v18, %v3094_v59  ;;  %v1375_v22 = vld [vmem:[#allocation4] sm:$0xf] }
 0x23b   :  { %2662 = vmatpush1.bf16.msra.mxu0 %v2661_v33  ;;  %v1423_v35 = vadd.f32 %v1422_v26, %v1421_v31  ;;  %v1644_v18 = vld [vmem:[%s3883_s7 + $0x260] sm:$0xff] }
 0x23c   :  { %2664 = vmatprep.subr.bf16.mxu0 %v2663_v37  ;;  %v1418_v42 = vrot.slane %v1417_v30, 1 }
 0x23e   :  { %v1419_v52 = vadd.f32 %v1418_v42, %v1417_v30 }
 0x23f   :  { %2666 = vmatpush1.bf16.msra.mxu0 %v2665_v43 }
 0x240   :  { %2668 = vmatprep.subr.bf16.mxu0 %v2667_v45  ;;  %v1424_v45 = vrot.slane %v1423_v35, 1  ;;  %v1438_v44 = vmul.f32 0.125, %v1419_v52 }
 0x242   :  { %v1442_v60 = vadd.f32 1e-05, %v1438_v44 }
 0x243   :  { %2670 = vmatpush1.bf16.msra.mxu0 %v2669_v53 }
 0x244   :  { %2672 = vmatprep.subr.bf16.mxu0 %v2671_v54  ;;  %v1425_v54 = vadd.f32 %v1424_v45, %v1423_v35  ;;  %2795 = vrsqrt.f32 %v1442_v60  ;;  %v1636_v60 = vld [vmem:[%s3883_s7 + $0x220] sm:$0xff] }
 0x247   :  { %2674 = vmatpush1.bf16.msra.mxu0 %v2673_v39 }
 0x248   :  { %2676 = vmatprep.subr.bf16.mxu0 %v2675_v41  ;;  %v1439_v41 = vmul.f32 0.125, %v1425_v54 }
 0x24a   :  { %v1443_v63 = vadd.f32 1e-05, %v1439_v41 }
 0x24c   :  { %2797 = vrsqrt.f32 %v1443_v63 }
 0x24e   :  { %v2796_v9 = vpop.eup %2795 }
 0x256   :  { %v2798_v48 = vpop.eup %2797 }
 0x286   :  { %v3547_v5 = vpop.f32.mrb[2].mxu1 }
 0x287   :  { %v1389_v8 = vrot.slane %v3547_v5, 4  ;;  %v3550_v11 = vpop.f32.mrb[3].mxu1 }
 0x288   :  { %v1395_v13 = vrot.slane %v3550_v11, 4 }
 0x289   :  { %v1390_v16 = vadd.f32 %v1389_v8, %v3547_v5 }
 0x28a   :  { %v1396_v19 = vadd.f32 %v1395_v13, %v3550_v11  ;;  %v1454_v13 = vcombine.low %v2796_v9, %v2798_v48  ;;  %v1646_v48 = vld [vmem:[%s3883_s7 + $0x270] sm:$0xff] }
 0x28b   :  { %v1391_v20 = vrot.slane %v1390_v16, 2 }
 0x28c   :  { %v1397_v21 = vrot.slane %v1396_v19, 2 }
 0x28d   :  { %v1392_v23 = vadd.f32 %v1391_v20, %v1390_v16 }
 0x28e   :  { %v1398_v28 = vadd.f32 %v1397_v21, %v1396_v19  ;;  %v1462_v19 = vrot.slane %v1454_v13, %v3558_v14  ;;  %v1651_v13 = vld [vmem:[%s3883_s7 + $0x298] sm:$0xff] }
 0x28f   :  { %v1393_v32 = vrot.slane %v1392_v23, 1 }
 0x290   :  { %v1399_v33 = vrot.slane %v1398_v28, 1 }
 0x291   :  { %v1394_v34 = vadd.f32 %v1393_v32, %v1392_v23 }
 0x292   :  { %v1400_v37 = vadd.f32 %v1399_v33, %v1398_v28 }
 0x293   :  { %v1404_v40 = vmul.f32 0.125, %v1394_v34 }
 0x294   :  { %v1405_v29 = vmul.f32 0.125, %v1400_v37 }
 0x295   :  { %v1408_v43 = vsub.f32 %v3547_v5, %v1404_v40 }
 0x296   :  { %v1409_v47 = vsub.f32 %v3550_v11, %v1405_v29 }
 0x297   :  { %v1412_v50 = vmul.f32 %v1408_v43, %v1408_v43 }
 0x298   :  { %v1413_v51 = vmul.f32 %v1409_v47, %v1409_v47 }
 0x299   :  { %v1426_v53 = vrot.slane %v1412_v50, 4 }
 0x29a   :  { %v1432_v55 = vrot.slane %v1413_v51, 4 }
 0x29b   :  { %v1427_v57 = vadd.f32 %v1426_v53, %v1412_v50  ;;  %v1376_v53 = vld [vmem:[#allocation6] sm:$0xf] }
 0x29c   :  { %v1433_v39 = vadd.f32 %v1432_v55, %v1413_v51 }
 0x29d   :  { %v1428_v58 = vrot.slane %v1427_v57, 2 }
 0x29e   :  { %v1434_v49 = vrot.slane %v1433_v39, 2 }
 0x29f   :  { %v1429_v2 = vadd.f32 %v1428_v58, %v1427_v57  ;;  %v1632_v57 = vld [vmem:[%s3883_s7 + $0x200] sm:$0xff] }
 0x2a0   :  { %v1435_v17 = vadd.f32 %v1434_v49, %v1433_v39  ;;  %v1634_v39 = vld [vmem:[%s3883_s7 + $0x210] sm:$0xff] }
 0x2a1   :  { %v1430_v62 = vrot.slane %v1429_v2, 1 }
 0x2a2   :  { %v1436_v0 = vrot.slane %v1435_v17, 1 }
 0x2a3   :  { %v1431_v61 = vadd.f32 %v1430_v62, %v1429_v2  ;;  %v2677_v2 = vpack.c.bf16 %v1634_v39, %v1632_v57  ;;  %v1638_v62 = vld [vmem:[%s3883_s7 + $0x230] sm:$0xff]  ;;  %v1668_v57 = vld [vmem:[%s3883_s7 + $0x320] sm:$0xff] }
 0x2a4   :  { %v1437_v12 = vadd.f32 %v1436_v0, %v1435_v17  ;;  %v1641_v0 = vld [vmem:[%s3883_s7 + $0x248] sm:$0xff]  ;;  %v1670_v39 = vld [vmem:[%s3883_s7 + $0x330] sm:$0xff] }
 0x2a5   :  { %v1440_v1 = vmul.f32 0.125, %v1431_v61  ;;  %v1643_v61 = vld [vmem:[%s3883_s7 + $0x258] sm:$0xff] }
 0x2a6   :  { %v1441_v36 = vmul.f32 0.125, %v1437_v12  ;;  %v2681_v12 = vpack.c.bf16 %v1638_v62, %v1636_v60  ;;  %v1676_v62 = vld [vmem:[%s3883_s7 + $0x360] sm:$0xff] }
 0x2a7   :  { %v1444_v3 = vadd.f32 1e-05, %v1440_v1  ;;  %v2683_v1 = vpack.c.bf16 %v1643_v61, %v1641_v0  ;;  %v1681_v0 = vld [vmem:[%s3883_s7 + $0x388] sm:$0xff]  ;;  %v1683_v61 = vld [vmem:[%s3883_s7 + $0x398] sm:$0xff] }
 0x2a8   :  { %v1445_v27 = vadd.f32 1e-05, %v1441_v36  ;;  %v1640_v36 = vld [vmem:[%s3883_s7 + $0x240] sm:$0xff] }
 0x2a9   :  { %2799 = vrsqrt.f32 %v1444_v3  ;;  %v1642_v3 = vld [vmem:[%s3883_s7 + $0x250] sm:$0xff] }
 0x2aa   :  { %2801 = vrsqrt.f32 %v1445_v27  ;;  %v1645_v27 = vld [vmem:[%s3883_s7 + $0x268] sm:$0xff]  ;;  %v2685_v7 = vpack.c.bf16 %v1642_v3, %v1640_v36  ;;  %v1680_v36 = vld [vmem:[%s3883_s7 + $0x380] sm:$0xff]  ;;  %v1682_v3 = vld [vmem:[%s3883_s7 + $0x390] sm:$0xff] }
 0x2ab   :  { %v2687_v9 = vpack.c.bf16 %v1647_v6, %v1645_v27  ;;  %v1685_v27 = vld [vmem:[%s3883_s7 + $0x3a8] sm:$0xff]  ;;  %v1687_v6 = vld [vmem:[%s3883_s7 + $0x3b8] sm:$0xff] }
 0x2b3   :  { %v2800_v8 = vpop.eup %2799 }
 0x2b4   :  { %v2802_v16 = vpop.eup %2801 }
 0x2b5   :  { %v1455_v31 = vcombine.low %v2800_v8, %v2802_v16  ;;  %v1649_v8 = vld [vmem:[%s3883_s7 + $0x288] sm:$0xff]  ;;  %v2689_v16 = vpack.c.bf16 %v1646_v48, %v1644_v18  ;;  %v1684_v18 = vld [vmem:[%s3883_s7 + $0x3a0] sm:$0xff]  ;;  %v1686_v48 = vld [vmem:[%s3883_s7 + $0x3b0] sm:$0xff] }
 0x2b7   :  { %v1469_v20 = vrot.slane %v1455_v31, %v3558_v14  ;;  %v2691_v31 = vpack.c.bf16 %v1651_v13, %v1649_v8  ;;  %v1689_v8 = vld [vmem:[%s3883_s7 + $0x3c8] sm:$0xff]  ;;  %v1691_v13 = vld [vmem:[%s3883_s7 + $0x3d8] sm:$0xff] }
 0x2b9   :  { %v1470_v21 = vcombine.low %v1462_v19, %v1469_v20  ;;  %v1648_v19 = vld [vmem:[%s3883_s7 + $0x280] sm:$0xff]  ;;  %v1650_v20 = vld [vmem:[%s3883_s7 + $0x290] sm:$0xff] }
 0x2bb   :  { %v1477_v23 = vrot.slane %v1470_v21, %v3558_v14  ;;  %v1653_v21 = vld [vmem:[%s3883_s7 + $0x2a8] sm:$0xff] }
 0x2bd   :  { %v1479_v26 = vmul.f32 %v1477_v23, %v1375_v22  ;;  %v1655_v22 = vld [vmem:[%s3883_s7 + $0x2b8] sm:$0xff]  ;;  %v2693_v23 = vpack.c.bf16 %v1650_v20, %v1648_v19  ;;  %v1688_v19 = vld [vmem:[%s3883_s7 + $0x3c0] sm:$0xff]  ;;  %v1690_v20 = vld [vmem:[%s3883_s7 + $0x3d0] sm:$0xff] }
 0x2bf   :  { %v1492_v28 = vrot.slane %v1479_v26, %v3143_v46  ;;  %v1496_v32 = vrot.slane %v1479_v26, %v3100_v15  ;;  %v1484_v33 = vrot.slane %v1479_v26, %v3112_v25  ;;  %v1488_v59 = vrot.slane %v1479_v26, %v3097_v10 }
 0x2c0   :  { %v2695_v26 = vpack.c.bf16 %v1655_v22, %v1653_v21  ;;  %v1693_v21 = vld [vmem:[%s3883_s7 + $0x3e8] sm:$0xff]  ;;  %v1695_v22 = vld [vmem:[%s3883_s7 + $0x3f8] sm:$0xff] }
 0x2c1   :  { %v1504_v30 = vmul.f32 %v1496_v32, %v3550_v11  ;;  %v1507_v34 = vmul.f32 %v1492_v28, %v1404_v40  ;;  %v1508_v35 = vmul.f32 %v1496_v32, %v1405_v29  ;;  %v1505_v37 = vmul.f32 %v1484_v33, %v3539_v4  ;;  %v1654_v32 = vld [vmem:[%s3883_s7 + $0x2b0] sm:$0xff] }
 0x2c2   :  { %v1506_v42 = vmul.f32 %v1488_v59, %v3541_v24  ;;  %v1503_v43 = vmul.f32 %v1492_v28, %v3547_v5  ;;  %v1502_v11 = vmul.f32 %v3335_v38, %v1488_v59  ;;  %v1501_v40 = vmul.f32 %v3332_v56, %v1484_v33  ;;  %v1637_v56 = vld [vmem:[%s3883_s7 + $0x228] sm:$0xff]  ;;  %v1652_v28 = vld [vmem:[%s3883_s7 + $0x2a0] sm:$0xff]  ;;  %v1659_v59 = vld [vmem:[%s3883_s7 + $0x2d8] sm:$0xff] }
 0x2c3   :  { %v1514_v45 = vcombine.low %v1507_v34, %v1508_v35  ;;  %v1657_v33 = vld [vmem:[%s3883_s7 + $0x2c8] sm:$0xff]  ;;  %v1656_v35 = vld [vmem:[%s3883_s7 + $0x2c0] sm:$0xff] }
 0x2c4   :  { %v1513_v47 = vcombine.low %v1505_v37, %v1506_v42  ;;  %v2699_v34 = vpack.c.bf16 %v1659_v59, %v1657_v33  ;;  %v1658_v37 = vld [vmem:[%s3883_s7 + $0x2d0] sm:$0xff]  ;;  %v1661_v42 = vld [vmem:[%s3883_s7 + $0x2e8] sm:$0xff] }
 0x2c5   :  { %v1528_v50 = vrot.slane %v1514_v45, %v3558_v14  ;;  %v2701_v45 = vpack.c.bf16 %v1658_v37, %v1656_v35  ;;  %v1944_v37 = vld [vmem:[%s3886_s10] sm:$0xff] }
 0x2c6   :  { %v1521_v51 = vrot.slane %v1513_v47, %v3558_v14 }
 0x2c8   :  { %v1529_v52 = vcombine.low %v1521_v51, %v1528_v50  ;;  %v1660_v50 = vld [vmem:[%s3883_s7 + $0x2e0] sm:$0xff]  ;;  %v1662_v51 = vld [vmem:[%s3883_s7 + $0x2f0] sm:$0xff] }
 0x2ca   :  { %v1536_v54 = vrot.slane %v1529_v52, %v3558_v14  ;;  %v1665_v52 = vld [vmem:[%s3883_s7 + $0x308] sm:$0xff] }
 0x2cc   :  { %v1538_v55 = vsub.f32 %v1376_v53, %v1536_v54  ;;  %v1667_v53 = vld [vmem:[%s3883_s7 + $0x318] sm:$0xff]  ;;  %v2705_v54 = vpack.c.bf16 %v1662_v51, %v1660_v50  ;;  %v1946_v50 = vld [vmem:[%s3886_s10 + $0x10] sm:$0xff] }
 0x2cd   :  { %v1947_v51 = vld [vmem:[%s3886_s10 + $0x18] sm:$0xff] }
 0x2ce   :  { %v1547_v4 = vrot.slane %v1538_v55, %v3097_v10  ;;  %v1543_v24 = vrot.slane %v1538_v55, %v3112_v25  ;;  %v1555_v5 = vrot.slane %v1538_v55, %v3100_v15  ;;  %v1551_v29 = vrot.slane %v1538_v55, %v3143_v46  ;;  %v1639_v15 = vld [vmem:[%s3883_s7 + $0x238] sm:$0xff] }
 0x2cf   :  { %v2679_v17 = vpack.c.bf16 %v1639_v15, %v1637_v56  ;;  %v2707_v55 = vpack.c.bf16 %v1667_v53, %v1665_v52  ;;  %v1672_v15 = vld [vmem:[%s3883_s7 + $0x340] sm:$0xff]  ;;  %v2745_v52 = vpack.c.bf16 %v1947_v51, %v1946_v50 }
 0x2d0   :  { %v1561_v44 = vadd.f32 %v1547_v4, %v1502_v11  ;;  %v1560_v38 = vadd.f32 %v1543_v24, %v1501_v40  ;;  %v1563_v58 = vadd.f32 %v1555_v5, %v1504_v30  ;;  %v3592_v46 = vadd.f32 %v1551_v29, %v1503_v43  ;;  %v1663_v43 = vld [vmem:[%s3883_s7 + $0x2f8] sm:$0xff]  ;;  %v1664_v11 = vld [vmem:[%s3883_s7 + $0x300] sm:$0xff]  ;;  %v1666_v40 = vld [vmem:[%s3883_s7 + $0x310] sm:$0xff] }
 0x2d1   :  { %v2697_v30 = vpack.c.bf16 %v1654_v32, %v1652_v28  ;;  %v2703_v47 = vpack.c.bf16 %v1663_v43, %v1661_v42  ;;  %v1669_v4 = vld [vmem:[%s3883_s7 + $0x328] sm:$0xff]  ;;  %v1671_v24 = vld [vmem:[%s3883_s7 + $0x338] sm:$0xff]  ;;  %v2709_v5 = vpack.c.bf16 %v1666_v40, %v1664_v11  ;;  %v1692_v28 = vld [vmem:[%s3883_s7 + $0x3e0] sm:$0xff] }
 0x2d2   :  { %v1565_v41 = vmax.f32 %v1561_v44, 0.0  ;;  %v1564_v49 = vmax.f32 %v1560_v38, 0.0  ;;  %v1567_v63 = vmax.f32 %v1563_v58, 0.0  ;;  %v2711_v29 = vpack.c.bf16 %v1671_v24, %v1669_v4  ;;  %v1673_v44 = vld [vmem:[%s3883_s7 + $0x348] sm:$0xff]  ;;  %v1675_v38 = vld [vmem:[%s3883_s7 + $0x358] sm:$0xff]  ;;  %v1694_v32 = vld [vmem:[%s3883_s7 + $0x3f0] sm:$0xff] }
 0x2d3   :  { %v2713_v58 = vpack.c.bf16 %v1670_v39, %v1668_v57  ;;  %v2715_v56 = vpack.c.bf16 %v1675_v38, %v1673_v44  ;;  %v2737_v33 = vpack.c.bf16 %v1694_v32, %v1692_v28  ;;  %v1566_v59 = vmax.f32 %v3592_v46, 0.0  ;;  %v1945_v42 = vld [vmem:[%s3886_s10 + $0x8] sm:$0xff]  ;;  %v1962_v46 = vld [vmem:[%s3886_s10 + $0x90] sm:$0xff]  ;;  %v1964_v53 = vld [vmem:[%s3886_s10 + $0xa0] sm:$0xff] }
 0x2d4   :  { %1760 = vmatprep.mubr.f32.mxu0 %v1565_v41  ;;  %v1674_v41 = vld [vmem:[%s3883_s7 + $0x350] sm:$0xff]  ;;  %v2741_v43 = vpack.c.bf16 %v1945_v42, %v1944_v37  ;;  %v1948_v11 = vld [vmem:[%s3886_s10 + $0x20] sm:$0xff]  ;;  %v1949_v40 = vld [vmem:[%s3886_s10 + $0x28] sm:$0xff] }
 0x2d5   :  { %1761 = vmatmul.mubr.f32.vlgmr.msra.gmra.mrb[2].mxu0 %v1564_v49  ;;  %v1677_v49 = vld [vmem:[%s3883_s7 + $0x368] sm:$0xff]  ;;  %v2749_v4 = vpack.c.bf16 %v1949_v40, %v1948_v11  ;;  %v1966_v24 = vld [vmem:[%s3886_s10 + $0xb0] sm:$0xff]  ;;  %v1951_v39 = vld [vmem:[%s3886_s10 + $0x38] sm:$0xff] }
 0x2d6   :  { %2678 = vmatpush1.bf16.msra.mxu0 %v2677_v2  ;;  %1831 = vmatprep.mubr.f32.mxu0 %v1567_v63  ;;  %v1679_v2 = vld [vmem:[%s3883_s7 + $0x378] sm:$0xff]  ;;  %v1678_v63 = vld [vmem:[%s3883_s7 + $0x370] sm:$0xff]  ;;  %v1968_v38 = vld [vmem:[%s3886_s10 + $0xc0] sm:$0xff] }
 0x2d7   :  { %2680 = vmatprep.subr.bf16.mxu0 %v2679_v17  ;;  %v2717_v17 = vpack.c.bf16 %v1674_v41, %v1672_v15  ;;  %v2719_v60 = vpack.c.bf16 %v1679_v2, %v1677_v49  ;;  %v1950_v57 = vld [vmem:[%s3886_s10 + $0x30] sm:$0xff]  ;;  %v1952_v15 = vld [vmem:[%s3886_s10 + $0x40] sm:$0xff]  ;;  %v1953_v41 = vld [vmem:[%s3886_s10 + $0x48] sm:$0xff] }
 0x2d8   :  { %v2753_v44 = vpack.c.bf16 %v1951_v39, %v1950_v57  ;;  %v2757_v49 = vpack.c.bf16 %v1953_v41, %v1952_v15  ;;  %v1970_v2 = vld [vmem:[%s3886_s10 + $0xd0] sm:$0xff]  ;;  %v1838_v15 = vld [vmem:[#allocation7] sm:$0x3] }
 0x2da   :  { %2682 = vmatpush1.bf16.msra.mxu0 %v2681_v12  ;;  %v2721_v12 = vpack.c.bf16 %v1678_v63, %v1676_v62  ;;  %v1954_v62 = vld [vmem:[%s3886_s10 + $0x50] sm:$0xff]  ;;  %v1955_v63 = vld [vmem:[%s3886_s10 + $0x58] sm:$0xff] }
 0x2db   :  { %2684 = vmatprep.subr.bf16.mxu0 %v2683_v1  ;;  %v2723_v1 = vpack.c.bf16 %v1683_v61, %v1681_v0  ;;  %v2761_v0 = vpack.c.bf16 %v1955_v63, %v1954_v62  ;;  %v1972_v61 = vld [vmem:[%s3886_s10 + $0xe0] sm:$0xff] }
 0x2de   :  { %2686 = vmatpush1.bf16.msra.mxu0 %v2685_v7  ;;  %v2725_v7 = vpack.c.bf16 %v1682_v3, %v1680_v36  ;;  %v1957_v3 = vld [vmem:[%s3886_s10 + $0x68] sm:$0xff] }
 0x2df   :  { %2688 = vmatprep.subr.bf16.mxu0 %v2687_v9  ;;  %v2727_v9 = vpack.c.bf16 %v1687_v6, %v1685_v27  ;;  %v1974_v27 = vld [vmem:[%s3886_s10 + $0xf0] sm:$0xff]  ;;  %v1975_v6 = vld [vmem:[%s3886_s10 + $0xf8] sm:$0xff] }
 0x2e2   :  { %2690 = vmatpush1.bf16.msra.mxu0 %v2689_v16  ;;  %v2729_v16 = vpack.c.bf16 %v1686_v48, %v1684_v18  ;;  %v1958_v18 = vld [vmem:[%s3886_s10 + $0x70] sm:$0xff]  ;;  %v1959_v48 = vld [vmem:[%s3886_s10 + $0x78] sm:$0xff] }
 0x2e3   :  { %2692 = vmatprep.subr.bf16.mxu0 %v2691_v31  ;;  %v2731_v31 = vpack.c.bf16 %v1691_v13, %v1689_v8  ;;  %v2769_v8 = vpack.c.bf16 %v1959_v48, %v1958_v18 }
 0x2e6   :  { %2694 = vmatpush1.bf16.msra.mxu0 %v2693_v23  ;;  %v2733_v23 = vpack.c.bf16 %v1690_v20, %v1688_v19 }
 0x2e7   :  { %2696 = vmatprep.subr.bf16.mxu0 %v2695_v26  ;;  %v2735_v26 = vpack.c.bf16 %v1695_v22, %v1693_v21 }
 0x2ea   :  { %2698 = vmatpush1.bf16.msra.mxu0 %v2697_v30  ;;  %v1960_v30 = vld [vmem:[%s3886_s10 + $0x80] sm:$0xff] }
 0x2eb   :  { %2700 = vmatprep.subr.bf16.mxu0 %v2699_v34  ;;  %v1961_v34 = vld [vmem:[%s3886_s10 + $0x88] sm:$0xff] }
 0x2ec   :  { %v2739_v35 = vpack.c.bf16 %v1961_v34, %v1960_v30 }
 0x2ee   :  { %2702 = vmatpush1.bf16.msra.mxu0 %v2701_v45  ;;  %2740 = vmatprep.subr.bf16.mxu1 %v2739_v35  ;;  %v1963_v45 = vld [vmem:[%s3886_s10 + $0x98] sm:$0xff] }
 0x2ef   :  { %2704 = vmatprep.subr.bf16.mxu0 %v2703_v47  ;;  %2742 = vmatpush3.bf16.msra.mxu1 %v2741_v43  ;;  %v2743_v47 = vpack.c.bf16 %v1963_v45, %v1962_v46 }
 0x2f1   :  { %2744 = vmatprep.subr.bf16.mxu1 %v2743_v47 }
 0x2f2   :  { %2706 = vmatpush1.bf16.msra.mxu0 %v2705_v54  ;;  %v1965_v54 = vld [vmem:[%s3886_s10 + $0xa8] sm:$0xff] }
 0x2f3   :  { %2708 = vmatprep.subr.bf16.mxu0 %v2707_v55  ;;  %2746 = vmatpush3.bf16.msra.mxu1 %v2745_v52  ;;  %v2747_v55 = vpack.c.bf16 %v1965_v54, %v1964_v53 }
 0x2f5   :  { %2748 = vmatprep.subr.bf16.mxu1 %v2747_v55 }
 0x2f6   :  { %2710 = vmatpush1.bf16.msra.mxu0 %v2709_v5  ;;  %v1967_v5 = vld [vmem:[%s3886_s10 + $0xb8] sm:$0xff] }
 0x2f7   :  { %2712 = vmatprep.subr.bf16.mxu0 %v2711_v29  ;;  %2750 = vmatpush3.bf16.msra.mxu1 %v2749_v4  ;;  %v2751_v29 = vpack.c.bf16 %v1967_v5, %v1966_v24 }
 0x2f9   :  { %2752 = vmatprep.subr.bf16.mxu1 %v2751_v29 }
 0x2fa   :  { %2714 = vmatpush1.bf16.msra.mxu0 %v2713_v58  ;;  %v1969_v58 = vld [vmem:[%s3886_s10 + $0xc8] sm:$0xff] }
 0x2fb   :  { %2716 = vmatprep.subr.bf16.mxu0 %v2715_v56  ;;  %2754 = vmatpush3.bf16.msra.mxu1 %v2753_v44  ;;  %v2755_v56 = vpack.c.bf16 %v1969_v58, %v1968_v38 }
 0x2fd   :  { %2756 = vmatprep.subr.bf16.mxu1 %v2755_v56 }
 0x2fe   :  { %2718 = vmatpush1.bf16.msra.mxu0 %v2717_v17  ;;  %v1971_v17 = vld [vmem:[%s3886_s10 + $0xd8] sm:$0xff] }
 0x2ff   :  { %2720 = vmatprep.subr.bf16.mxu0 %v2719_v60  ;;  %2758 = vmatpush3.bf16.msra.mxu1 %v2757_v49  ;;  %v2759_v60 = vpack.c.bf16 %v1971_v17, %v1970_v2 }
 0x301   :  { %2760 = vmatprep.subr.bf16.mxu1 %v2759_v60 }
 0x302   :  { %2722 = vmatpush1.bf16.msra.mxu0 %v2721_v12  ;;  %v1973_v12 = vld [vmem:[%s3886_s10 + $0xe8] sm:$0xff] }
 0x303   :  { %2724 = vmatprep.subr.bf16.mxu0 %v2723_v1  ;;  %v1956_v1 = vld [vmem:[%s3886_s10 + $0x60] sm:$0xff]  ;;  %v2763_v36 = vpack.c.bf16 %v1973_v12, %v1972_v61  ;;  %2762 = vmatpush3.bf16.msra.mxu1 %v2761_v0 }
 0x305   :  { %2764 = vmatprep.subr.bf16.mxu1 %v2763_v36 }
 0x306   :  { %2726 = vmatpush1.bf16.msra.mxu0 %v2725_v7  ;;  %v2765_v7 = vpack.c.bf16 %v1957_v3, %v1956_v1  ;;  %v1839_v1 = vld [vmem:[#allocation9] sm:$0x3] }
 0x307   :  { %2728 = vmatprep.subr.bf16.mxu0 %v2727_v9  ;;  %v2767_v9 = vpack.c.bf16 %v1975_v6, %v1974_v27 }
 0x308   :  { %2766 = vmatpush3.bf16.msra.mxu1 %v2765_v7 }
 0x309   :  { %2768 = vmatprep.subr.bf16.mxu1 %v2767_v9 }
 0x30a   :  { %2730 = vmatpush1.bf16.msra.mxu0 %v2729_v16 }
 0x30b   :  { %2732 = vmatprep.subr.bf16.mxu0 %v2731_v31 }
 0x30c   :  { %2770 = vmatpush3.bf16.msra.mxu1 %v2769_v8 }
 0x30e   :  { %2734 = vmatpush1.bf16.msra.mxu0 %v2733_v23 }
 0x30f   :  { %2736 = vmatprep.subr.bf16.mxu0 %v2735_v26 }
 0x312   :  { %2738 = vmatpush1.bf16.msra.mxu0 %v2737_v33 }
 0x315   :  { %1832 = vmatmul.mubr.f32.vlgmr.msra.gmra.mrb[2].mxu0 %v1566_v59 }
 0x3e8   :  { %v1833_v13 = vpop.f32.mrb[2].mxu0 }
 0x3e9   :  { %v1840_v16 = vrot.slane %v1833_v13, 4  ;;  %v1835_v31 = vpop.f32.mrb[3].mxu0 }
 0x3ea   :  { %v1846_v19 = vrot.slane %v1835_v31, 4 }
 0x3eb   :  { %v1841_v20 = vadd.f32 %v1840_v16, %v1833_v13  ;;  %v2063_v16 = vld [vmem:[#allocation10] ss:$0 sm:$0xff] }
 0x3ec   :  { %v1847_v21 = vadd.f32 %v1846_v19, %v1835_v31 }
 0x3ed   :  { %v1842_v22 = vrot.slane %v1841_v20, 2 }
 0x3ee   :  { %v1848_v23 = vrot.slane %v1847_v21, 2 }
 0x3ef   :  { %v1843_v26 = vadd.f32 %v1842_v22, %v1841_v20 }
 0x3f0   :  { %v1849_v28 = vadd.f32 %v1848_v23, %v1847_v21 }
 0x3f1   :  { %v1844_v32 = vrot.slane %v1843_v26, 1 }
 0x3f2   :  { %v1850_v33 = vrot.slane %v1849_v28, 1 }
 0x3f3   :  { %v1845_v59 = vadd.f32 %v1844_v32, %v1843_v26 }
 0x3f4   :  { %v1851_v30 = vadd.f32 %v1850_v33, %v1849_v28 }
 0x3f5   :  { %v1852_v34 = vmul.f32 0.125, %v1845_v59 }
 0x3f6   :  { %v1853_v35 = vmul.f32 0.125, %v1851_v30 }
 0x3f7   :  { %v1854_v37 = vsub.f32 %v1833_v13, %v1852_v34 }
 0x3f8   :  { %v1855_v42 = vsub.f32 %v1835_v31, %v1853_v35 }
 0x3f9   :  { %v1856_v43 = vmul.f32 %v1854_v37, %v1854_v37 }
 0x3fa   :  { %v1857_v46 = vmul.f32 %v1855_v42, %v1855_v42 }
 0x3fb   :  { %v1858_v45 = vrot.slane %v1856_v43, 4 }
 0x3fc   :  { %v1864_v47 = vrot.slane %v1857_v46, 4 }
 0x3fd   :  { %v1859_v50 = vadd.f32 %v1858_v45, %v1856_v43 }
 0x3fe   :  { %v1865_v51 = vadd.f32 %v1864_v47, %v1857_v46 }
 0x3ff   :  { %v1860_v52 = vrot.slane %v1859_v50, 2 }
 0x400   :  { %v1866_v53 = vrot.slane %v1865_v51, 2 }
 0x401   :  { %v1861_v54 = vadd.f32 %v1860_v52, %v1859_v50 }
 0x402   :  { %v1867_v55 = vadd.f32 %v1866_v53, %v1865_v51 }
 0x403   :  { %v1862_v11 = vrot.slane %v1861_v54, 1 }
 0x404   :  { %v1868_v40 = vrot.slane %v1867_v55, 1 }
 0x405   :  { %v1863_v4 = vadd.f32 %v1862_v11, %v1861_v54 }
 0x406   :  { %v1869_v24 = vadd.f32 %v1868_v40, %v1867_v55 }
 0x407   :  { %v1870_v5 = vmul.f32 0.125, %v1863_v4 }
 0x408   :  { %v1871_v29 = vmul.f32 0.125, %v1869_v24 }
 0x409   :  { %v1872_v57 = vadd.f32 1e-05, %v1870_v5 }
 0x40a   :  { %v1873_v39 = vadd.f32 1e-05, %v1871_v29 }
 0x40b   :  { %2803 = vrsqrt.f32 %v1872_v57 }
 0x40c   :  { %2805 = vrsqrt.f32 %v1873_v39 }
 0x415   :  { %v2804_v44 = vpop.eup %2803 }
 0x416   :  { %v2806_v38 = vpop.eup %2805 }
 0x417   :  { %v1878_v58 = vcombine.low %v2804_v44, %v2806_v38 }
 0x419   :  { %v1885_v56 = vrot.slane %v1878_v58, %v3558_v14 }
 0x41b   :  { %v1892_v41 = vrot.slane %v1885_v56, %v3558_v14 }
 0x41d   :  { %v1894_v49 = vmul.f32 %v1892_v41, %v1838_v15 }
 0x41f   :  { %v1899_v2 = vrot.slane %v1894_v49, %v3112_v25  ;;  %v1903_v17 = vrot.slane %v1894_v49, %v3097_v10 }
 0x421   :  { %v1907_v60 = vmul.f32 %v1903_v17, %v1835_v31  ;;  %v1908_v62 = vmul.f32 %v1899_v2, %v1852_v34  ;;  %v1909_v63 = vmul.f32 %v1903_v17, %v1853_v35  ;;  %v1906_v0 = vmul.f32 %v1899_v2, %v1833_v13 }
 0x423   :  { %v1912_v61 = vcombine.low %v1908_v62, %v1909_v63 }
 0x425   :  { %v1919_v12 = vrot.slane %v1912_v61, %v3558_v14 }
 0x427   :  { %v1926_v36 = vrot.slane %v1919_v12, %v3558_v14 }
 0x429   :  { %v1928_v3 = vsub.f32 %v1839_v1, %v1926_v36 }
 0x42b   :  { %v1937_v27 = vrot.slane %v1928_v3, %v3097_v10  ;;  %v1933_v6 = vrot.slane %v1928_v3, %v3112_v25 }
 0x42d   :  { %v1941_v7 = vadd.f32 %v1937_v27, %v1907_v60  ;;  %v1940_v9 = vadd.f32 %v1933_v6, %v1906_v0 }
 0x42f   :  { %v1943_v18 = vmax.f32 %v1941_v7, 0.0  ;;  %v1942_v48 = vmax.f32 %v1940_v9, 0.0 }
 0x431   :  { %2047 = vmatprep.mubr.f32.mxu1 %v1943_v18 }
 0x432   :  { %2048 = vmatmul.mubr.f32.vlgmr.msra.gmra.mrb[4].mxu1 %v1942_v48 }
 0x505   :  { %v2096_v8 = vpop.f32.mrb[4].mxu1 }
 0x506   :  { %v2097_v13 = vpop.f32.mrb[5].mxu1 }
 0x507   :  { %v2098_v31 = vadd.f32 %v2097_v13, %v2096_v8 }
 0x509   :  { %v2050_v19 = vadd.f32 %v2098_v31, %v2063_v16 }
 0x50b   :  { %2054 = vst.msk [vmem:[%s3888_s12] sm:$0xff] %vm2053_vm9, %v2050_v19 }
 0x50c   :  { %2059 = vsyncpa [#allocation3], 1 }
 0x50d   :  { %2060 = vsyncpa [#allocation5], 1 }
 0x50e   :  { %2061 = vsyncpa [#allocation8], 1 }
 0x50f   :  { %2062 = vsyncpa [#allocation11], 1 }

</bundles_post_ra>
